<compile_context>
chip_gen: v6e
topology: v6e:2x2x1
jax: 0.10.0
libtpu: 0.0.40
codegen_flags: <defaults>
</compile_context>

<pallas_src>
import math
import jax
import jax.numpy as jnp
from jax import lax
from jax.experimental import pallas as pl
from jax.experimental.pallas import tpu as pltpu

# ---------------- synthetic config (small) ----------------
B = 2             # batch
T_TEXT = 8        # text tokens (one of them is <AUDIO>)
P_AUDIO = 4       # cfg.audio_patches
F_AUDIO = 16      # raw audio feature dim per patch
D_AUD = 32        # audio encoder hidden
A_MLP = 2 * D_AUD
D_LM = 32         # language model hidden
N_HEADS = 4
D_MLP = 64
VOCAB_BASE = 63
VOCAB = VOCAB_BASE + 1          # after adding the <AUDIO> special token
AUDIO_TOKEN_ID = VOCAB_BASE     # id of <AUDIO>
N_DEC_LAYERS = 2
S_FULL = T_TEXT - 1 + P_AUDIO   # spliced sequence length (11)
BS = B * S_FULL                 # folded decoder rows (22)
BT = B * T_TEXT                 # folded text rows (16)
BP = B * P_AUDIO                # folded audio rows (8)
LANE = 128
V_PAD = LANE                    # lane-dense padded vocab for head/logits
NEG_INF = -1e9


# ---------------- in-kernel helpers (traced values) ----------------
def _row(ref, i, w):
    """Static row slice of a packed (R, 128) small-parameter array -> (1, w)."""
    return ref[i:i + 1, :w]


def _dot(a, b, trans_b=False):
    """bf16-operand matmul with f32 accumulation on the MXU."""
    contract = ((1,), (1,)) if trans_b else ((1,), (0,))
    return lax.dot_general(a.astype(jnp.bfloat16), b.astype(jnp.bfloat16),
                           (contract, ((), ())),
                           preferred_element_type=jnp.float32)


def _dot_f32(a, b):
    """Exact f32 matmul (used for the 0/1 splice selection matrices)."""
    return lax.dot_general(a, b, (((1,), (0,)), ((), ())),
                           preferred_element_type=jnp.float32)


def _layernorm(x, g, b, eps=1e-5):
    mu = jnp.mean(x, axis=-1, keepdims=True)
    var = jnp.mean(jnp.square(x - mu), axis=-1, keepdims=True)
    return (x - mu) * lax.rsqrt(var + eps) * g + b


def _block_bias(n, blk, causal, mask_row=None):
    """Block-diagonal (per-sample) bias for batch-folded attention, optionally
    causal and key-padding masked.  Built with iotas only (no int div/mod)."""
    r = lax.broadcasted_iota(jnp.int32, (n, n), 0)
    c = lax.broadcasted_iota(jnp.int32, (n, n), 1)
    same = r < 0                                   # all-False
    for b in range(n // blk):
        same = same | ((r >= b * blk) & (r < (b + 1) * blk) &
                       (c >= b * blk) & (c < (b + 1) * blk))
    keep = same
    if causal:
        keep = keep & (c <= r)
    if mask_row is not None:
        keep = keep & (mask_row > 0.0)
    return jnp.where(keep, 0.0, NEG_INF)


def _transformer_block(x, bias, num_heads, w_q, w_k, w_v, w_o, w_fc1, w_fc2,
                       ln1_g, ln1_b, b_q, b_k, b_v, b_o, ln2_g, ln2_b,
                       b_fc1, b_fc2):
    """Pre-LN transformer block on a batch-folded (M, D) f32 activation.

    Per-head score / PV matmuls use head-column masking (q*hm)@k^T and
    p@(v*hm) so every MXU contraction is K=D (no K=8, no lane-offset slices),
    and the out-projection is a single merged (M, D)@(D, D) matmul.
    """
    M, D = x.shape
    dh = D // num_heads
    scale = 1.0 / math.sqrt(dh)

    h = _layernorm(x, ln1_g, ln1_b)
    q = _dot(h, w_q) + b_q
    k = _dot(h, w_k) + b_k
    v = _dot(h, w_v) + b_v

    lane = lax.broadcasted_iota(jnp.int32, (1, D), 1)
    attn = jnp.zeros((M, D), jnp.float32)
    for hh in range(num_heads):                    # static unroll, stays in vregs
        hm = ((lane >= hh * dh) & (lane < (hh + 1) * dh)).astype(jnp.float32)
        s = _dot(q * hm, k, trans_b=True) * scale + bias        # (M, M), K=D
        s = s - jnp.max(s, axis=-1, keepdims=True)
        p = jnp.exp(s)
        p = p * pl.reciprocal(jnp.sum(p, axis=-1, keepdims=True), approx=True)
        attn = attn + _dot(p, v * hm)              # nonzero only in head-hh cols
    x = x + _dot(attn, w_o) + b_o                  # single merged out-projection

    h2 = _layernorm(x, ln2_g, ln2_b)
    mlp = jax.nn.gelu(_dot(h2, w_fc1) + b_fc1, approximate=True)
    return x + _dot(mlp, w_fc2) + b_fc2


# ---------------- the single fused kernel ----------------
def _alm_kernel(aidx_ref,                                   # (B,) int32, SMEM (scalar prefetch)
                audio_ref, text_ref, mask_ref, tgt_ref,     # data
                a_w_in, a_w_qkv, a_w_o, a_w_fc1, a_w_fc2, a_mp_w, a_small,
                d_w_qkv, d_w_o, d_w_fc1, d_w_fc2, head_w, d_small,
                logits_ref, stats_ref):
    # ---- audio encoder + modality projector, batch folded to (B*P, .) ----
    a = audio_ref[...].astype(jnp.float32)                          # (BP, F)
    x = _dot(a, a_w_in[...]) + _row(a_small, 0, D_AUD)
    abias = _block_bias(BP, P_AUDIO, causal=False)                  # per-sample blocks
    x = _transformer_block(
        x, abias, N_HEADS,
        a_w_qkv[0], a_w_qkv[1], a_w_qkv[2],
        a_w_o[...], a_w_fc1[...], a_w_fc2[...],
        _row(a_small, 1, D_AUD), _row(a_small, 2, D_AUD),
        _row(a_small, 3, D_AUD), _row(a_small, 4, D_AUD), _row(a_small, 5, D_AUD),
        _row(a_small, 6, D_AUD), _row(a_small, 7, D_AUD), _row(a_small, 8, D_AUD),
        _row(a_small, 9, A_MLP), _row(a_small, 10, D_AUD))
    x = _layernorm(x, _row(a_small, 11, D_AUD), _row(a_small, 12, D_AUD))
    audio_emb = _dot(x, a_mp_w[...]) + _row(a_small, 13, D_LM)      # (BP, D_LM), stays in VMEM

    # ---- in-kernel <AUDIO> splice via 0/1 selection matmuls (no HBM trip) ----
    text = text_ref[...].astype(jnp.float32)                        # (BT, D_LM)
    rs_t = lax.broadcasted_iota(jnp.int32, (BS, BT), 0)
    cs_t = lax.broadcasted_iota(jnp.int32, (BS, BT), 1)
    rs_a = lax.broadcasted_iota(jnp.int32, (BS, BP), 0)
    cs_a = lax.broadcasted_iota(jnp.int32, (BS, BP), 1)
    sel_t = jnp.zeros((BS, BT), jnp.float32)
    sel_a = jnp.zeros((BS, BP), jnp.float32)
    for b in range(B):
        idx = aidx_ref[b]                                           # runtime scalar
        s_loc = rs_t - b * S_FULL
        t_loc = cs_t - b * T_TEXT
        in_t = ((rs_t >= b * S_FULL) & (rs_t < (b + 1) * S_FULL) &
                (cs_t >= b * T_TEXT) & (cs_t < (b + 1) * T_TEXT))
        pick_t = in_t & (((s_loc < idx) & (t_loc == s_loc)) |
                         ((s_loc >= idx + P_AUDIO) &
                          (t_loc == s_loc - (P_AUDIO - 1))))
        sel_t = sel_t + pick_t.astype(jnp.float32)

        sa_loc = rs_a - b * S_FULL
        p_loc = cs_a - b * P_AUDIO
        in_a = ((rs_a >= b * S_FULL) & (rs_a < (b + 1) * S_FULL) &
                (cs_a >= b * P_AUDIO) & (cs_a < (b + 1) * P_AUDIO))
        pick_a = (in_a & (sa_loc >= idx) & (sa_loc < idx + P_AUDIO) &
                  (p_loc == sa_loc - idx))
        sel_a = sel_a + pick_a.astype(jnp.float32)
    x = _dot_f32(sel_t, text) + _dot_f32(sel_a, audio_emb)          # (BS, D_LM)

    # ---- decoder: pre-LN blocks with block-diag causal + key-padding bias ----
    mask_row = mask_ref[...]                                        # (1, BS) f32
    dbias = _block_bias(BS, S_FULL, causal=True, mask_row=mask_row)
    for l in range(N_DEC_LAYERS):                                   # static unroll (2 layers)
        r0 = 10 * l
        x = _transformer_block(
            x, dbias, N_HEADS,
            d_w_qkv[3 * l + 0], d_w_qkv[3 * l + 1], d_w_qkv[3 * l + 2],
            d_w_o[l], d_w_fc1[l], d_w_fc2[l],
            _row(d_small, r0 + 0, D_LM), _row(d_small, r0 + 1, D_LM),
            _row(d_small, r0 + 2, D_LM), _row(d_small, r0 + 3, D_LM),
            _row(d_small, r0 + 4, D_LM), _row(d_small, r0 + 5, D_LM),
            _row(d_small, r0 + 6, D_LM), _row(d_small, r0 + 7, D_LM),
            _row(d_small, r0 + 8, D_MLP), _row(d_small, r0 + 9, D_LM))

    h = _layernorm(x, _row(d_small, 10 * N_DEC_LAYERS, D_LM),
                   _row(d_small, 10 * N_DEC_LAYERS + 1, D_LM))
    logits = _dot(h, head_w[...]) + _row(d_small, 10 * N_DEC_LAYERS + 2, V_PAD)
    logits_ref[...] = logits                                        # (BS, 128) lane-dense store

    # ---- cross-entropy (ignore_index=-100), reduced to scalars in-kernel ----
    tg = tgt_ref[...]                                               # (BS, 1) int32
    colsv = lax.broadcasted_iota(jnp.int32, (BS, V_PAD), 1)
    lg = jnp.where(colsv < VOCAB, logits, NEG_INF)                  # mask padded vocab cols
    m = jnp.max(lg, axis=-1, keepdims=True)
    lse = jnp.log(jnp.sum(jnp.exp(lg - m), axis=-1, keepdims=True)) + m
    tgt_logit = jnp.sum(jnp.where(colsv == tg, logits, 0.0), axis=-1, keepdims=True)
    valid = (tg != -100).astype(jnp.float32)
    loss_sum = jnp.sum((lse - tgt_logit) * valid)
    cnt = jnp.sum(valid)
    lane = lax.broadcasted_iota(jnp.int32, (1, LANE), 1)
    stats_ref[...] = (jnp.where(lane == 0, loss_sum, 0.0) +
                      jnp.where(lane == 1, cnt, 0.0))               # lane-dense scalar slab


def alm_pallas(audio_idx, audio_flat, text_flat, mask_row, tgt_col, params):
    data = [audio_flat, text_flat, mask_row, tgt_col]
    weights = [params["a_w_in"], params["a_w_qkv"], params["a_w_o"],
               params["a_w_fc1"], params["a_w_fc2"], params["mp_w"], params["a_small"],
               params["d_w_qkv"], params["d_w_o"], params["d_w_fc1"],
               params["d_w_fc2"], params["head_w"], params["d_small"]]

    def fullspec(x):
        nd = x.ndim
        return pl.BlockSpec(x.shape, lambda i, *_: (0,) * nd)

    grid_spec = pltpu.PrefetchScalarGridSpec(
        num_scalar_prefetch=1,
        grid=(1,),
        in_specs=[fullspec(x) for x in data + weights],
        out_specs=(pl.BlockSpec((BS, V_PAD), lambda i, *_: (0, 0)),
                   pl.BlockSpec((1, LANE), lambda i, *_: (0, 0))),
    )
    return pl.pallas_call(
        _alm_kernel,
        out_shape=(jax.ShapeDtypeStruct((BS, V_PAD), jnp.float32),
                   jax.ShapeDtypeStruct((1, LANE), jnp.float32)),
        grid_spec=grid_spec,
        compiler_params=pltpu.CompilerParams(
            dimension_semantics=("arbitrary",),
            vmem_limit_bytes=32 * 1024 * 1024),
    )(audio_idx, *data, *weights)


# ---------------- tiny splice glue for mask / targets (plain JAX) ----------------
def _splice_1d(src, ids, insert):
    """Replace the single <AUDIO> position in a length-T vector with `insert`."""
    # TODO(synk): the PyTorch module raises ValueError when no <AUDIO> token is
    # present; data-dependent error raising has no in-graph equivalent here.
    T = src.shape[0]
    P = insert.shape[0]
    S = T - 1 + P
    idx = jnp.argmax(ids == AUDIO_TOKEN_ID)
    pos = jnp.arange(S)
    text_src = jnp.clip(jnp.where(pos < idx, pos, pos - P + 1), 0, T - 1)
    from_audio = (pos >= idx) & (pos < idx + P)
    audio_src = jnp.clip(pos - idx, 0, P - 1)
    return jnp.where(from_audio, insert[audio_src], src[text_src])


def splice_mask(attention_mask, input_ids):
    ones = jnp.ones((P_AUDIO,), attention_mask.dtype)
    return jax.vmap(lambda am, ids: _splice_1d(am, ids, ones))(attention_mask, input_ids)


def splice_targets(targets, input_ids):
    pad = jnp.full((P_AUDIO,), -100, targets.dtype)
    return jax.vmap(lambda tg, ids: _splice_1d(tg, ids, pad))(targets, input_ids)


# ---------------- forward ----------------
def alm_forward(params, input_ids, audio, attention_mask, targets):
    audio_idx = jnp.argmax(input_ids == AUDIO_TOKEN_ID, axis=1).astype(jnp.int32)
    text_embeds = params["tok_emb"][input_ids]                   # embedding gather (plain JAX)
    combined_mask = splice_mask(attention_mask, input_ids)       # (B, S) tiny int glue
    final_targets = splice_targets(targets, input_ids)           # (B, S) tiny int glue

    audio_flat = audio.reshape(BP, F_AUDIO)
    text_flat = text_embeds.reshape(BT, D_LM)
    mask_row = combined_mask.reshape(1, BS).astype(jnp.float32)
    tgt_col = final_targets.reshape(BS, 1).astype(jnp.int32)

    logits_flat, stats = alm_pallas(audio_idx, audio_flat, text_flat,
                                    mask_row, tgt_col, params)
    logits = logits_flat.reshape(B, S_FULL, V_PAD)[..., :VOCAB]
    loss = stats[0, 0] / jnp.maximum(stats[0, 1], 1.0)           # guard: all targets ignored
    return logits, loss


# ---------------- deterministic parameter init ----------------
def _dense(key, fan_in, fan_out, scale=0.02):
    return scale * jax.random.normal(key, (fan_in, fan_out), jnp.float32)


def _pad_row(v):
    v = jnp.asarray(v, jnp.float32).reshape(1, -1)
    return jnp.pad(v, ((0, 0), (0, LANE - v.shape[1])))


def init_params(key):
    ka, kd, ke, kh = jax.random.split(key, 4)

    # ----- audio encoder + modality projector -----
    ka0, ka1, ka2, ka3, ka4, ka5 = jax.random.split(ka, 6)
    a_w_in = _dense(ka0, F_AUDIO, D_AUD)
    a_wq, a_wk, a_wv = jnp.split(_dense(ka1, D_AUD, 3 * D_AUD), 3, axis=1)
    a_w_o = _dense(ka2, D_AUD, D_AUD)
    a_w_fc1 = _dense(ka3, D_AUD, A_MLP)
    a_w_fc2 = _dense(ka4, A_MLP, D_AUD)
    mp_w = _dense(ka5, D_AUD, D_LM)
    zA, oA = jnp.zeros((D_AUD,)), jnp.ones((D_AUD,))
    a_small = jnp.concatenate([
        _pad_row(zA),                                    # 0  in_b
        _pad_row(oA), _pad_row(zA),                      # 1,2  ln1 g/b
        _pad_row(zA), _pad_row(zA), _pad_row(zA),        # 3-5  b_q b_k b_v
        _pad_row(zA),                                    # 6    b_o
        _pad_row(oA), _pad_row(zA),                      # 7,8  ln2 g/b
        _pad_row(jnp.zeros((A_MLP,))), _pad_row(zA),     # 9,10 b_fc1 b_fc2
        _pad_row(oA), _pad_row(zA),                      # 11,12 final audio LN
        _pad_row(jnp.zeros((D_LM,))),                    # 13   mp_b
    ], axis=0)

    # ----- decoder stack -----
    qkv_rows, o_rows, fc1_rows, fc2_rows, small_rows = [], [], [], [], []
    zL, oL = jnp.zeros((D_LM,)), jnp.ones((D_LM,))
    for kl in jax.random.split(kd, N_DEC_LAYERS):
        k0, k1, k2, k3 = jax.random.split(kl, 4)
        wq, wk, wv = jnp.split(_dense(k0, D_LM, 3 * D_LM), 3, axis=1)
        qkv_rows += [wq, wk, wv]
        o_rows.append(_dense(k1, D_LM, D_LM))
        fc1_rows.append(_dense(k2, D_LM, D_MLP))
        fc2_rows.append(_dense(k3, D_MLP, D_LM))
        small_rows += [_pad_row(oL), _pad_row(zL),                       # ln1 g/b
                       _pad_row(zL), _pad_row(zL), _pad_row(zL),         # b_q b_k b_v
                       _pad_row(zL),                                     # b_o
                       _pad_row(oL), _pad_row(zL),                       # ln2 g/b
                       _pad_row(jnp.zeros((D_MLP,))), _pad_row(zL)]      # b_fc1 b_fc2
    small_rows += [_pad_row(oL), _pad_row(zL)]                           # final LN g/b
    small_rows += [_pad_row(jnp.zeros((V_PAD,)))]                        # head bias (128-wide)
    d_small = jnp.concatenate(small_rows, axis=0)                        # (23, 128)

    head_w = jnp.zeros((D_LM, V_PAD), jnp.float32)
    head_w = head_w.at[:, :VOCAB].set(_dense(kh, D_LM, VOCAB))

    bf = lambda x: x.astype(jnp.bfloat16)     # review: pre-cast matmul weights once
    return {
        "tok_emb": 0.02 * jax.random.normal(ke, (VOCAB, D_LM), jnp.float32),
        "a_w_in": bf(a_w_in),
        "a_w_qkv": bf(jnp.stack([a_wq, a_wk, a_wv], axis=0)),   # (3, D_AUD, D_AUD)
        "a_w_o": bf(a_w_o),
        "a_w_fc1": bf(a_w_fc1),
        "a_w_fc2": bf(a_w_fc2),
        "mp_w": bf(mp_w),
        "a_small": a_small,
        "d_w_qkv": bf(jnp.stack(qkv_rows, axis=0)),             # (L*3, D, D)
        "d_w_o": bf(jnp.stack(o_rows, axis=0)),                 # (L, D, D)
        "d_w_fc1": bf(jnp.stack(fc1_rows, axis=0)),             # (L, D, D_MLP)
        "d_w_fc2": bf(jnp.stack(fc2_rows, axis=0)),             # (L, D_MLP, D)
        "head_w": bf(head_w),                                   # (D, 128)
        "d_small": d_small,
    }


# TODO(synk): tokenizer handling, generate()/top-k-p sampling loop and
# safetensors loading/saving are host-side / I/O logic with no Pallas equivalent.

if __name__ == "__main__":
    key = jax.random.PRNGKey(0)
    pkey, ikey, akey, tkey = jax.random.split(key, 4)
    params = init_params(pkey)

    input_ids = jax.random.randint(ikey, (B, T_TEXT), 0, VOCAB_BASE, dtype=jnp.int32)
    # exactly one <AUDIO> token per sample, at different positions
    input_ids = input_ids.at[0, 2].set(AUDIO_TOKEN_ID)
    input_ids = input_ids.at[1, 5].set(AUDIO_TOKEN_ID)
    audio = jax.random.normal(akey, (B, P_AUDIO, F_AUDIO), jnp.float32)
    attention_mask = jnp.ones((B, T_TEXT), jnp.int32)
    targets = jax.random.randint(tkey, (B, T_TEXT), 0, VOCAB_BASE, dtype=jnp.int32)
    targets = targets.at[0, 0].set(-100)   # some ignored positions

    fwd = jax.jit(alm_forward)
    logits, loss = fwd(params, input_ids, audio, attention_mask, targets)
    jax.block_until_ready((logits, loss))

    assert logits.shape == (B, S_FULL, VOCAB), logits.shape
    assert bool(jnp.isfinite(loss)), loss
    print("KERNEL_OK")
</pallas_src>

<mosaic_0001>
module attributes {stable_mosaic.version = 11 : i64} {
  func.func @_alm_kernel(%arg0: i32, %arg1: memref<2xi32, #tpu.memory_space<smem>>, %arg2: memref<8x16xf32, #tpu.memory_space<vmem>>, %arg3: memref<16x32xf32, #tpu.memory_space<vmem>>, %arg4: memref<1x22xf32, #tpu.memory_space<vmem>>, %arg5: memref<22x1xi32, #tpu.memory_space<vmem>>, %arg6: memref<16x32xbf16, #tpu.memory_space<vmem>>, %arg7: memref<3x32x32xbf16, #tpu.memory_space<vmem>>, %arg8: memref<32x32xbf16, #tpu.memory_space<vmem>>, %arg9: memref<32x64xbf16, #tpu.memory_space<vmem>>, %arg10: memref<64x32xbf16, #tpu.memory_space<vmem>>, %arg11: memref<32x32xbf16, #tpu.memory_space<vmem>>, %arg12: memref<14x128xf32, #tpu.memory_space<vmem>>, %arg13: memref<6x32x32xbf16, #tpu.memory_space<vmem>>, %arg14: memref<2x32x32xbf16, #tpu.memory_space<vmem>>, %arg15: memref<2x32x64xbf16, #tpu.memory_space<vmem>>, %arg16: memref<2x64x32xbf16, #tpu.memory_space<vmem>>, %arg17: memref<32x128xbf16, #tpu.memory_space<vmem>>, %arg18: memref<23x128xf32, #tpu.memory_space<vmem>>, %arg19: memref<22x128xf32, #tpu.memory_space<vmem>>, %arg20: memref<1x128xf32, #tpu.memory_space<vmem>>) attributes {dimension_semantics = [#tpu.dimension_semantics<arbitrary>], iteration_bounds = array<i64: 1>, scalar_prefetch = 1 : i64, scratch_operands = 0 : i64, tpu.core_type = #tpu.core_type<tc>, window_params = [{pipeline_mode = #tpu.pipeline_mode<synchronous>, transform_indices = @transform_0, window_bounds = array<i64: 8, 16>}, {pipeline_mode = #tpu.pipeline_mode<synchronous>, transform_indices = @transform_1, window_bounds = array<i64: 16, 32>}, {pipeline_mode = #tpu.pipeline_mode<synchronous>, transform_indices = @transform_2, window_bounds = array<i64: 1, 22>}, {pipeline_mode = #tpu.pipeline_mode<synchronous>, transform_indices = @transform_3, window_bounds = array<i64: 22, 1>}, {pipeline_mode = #tpu.pipeline_mode<synchronous>, transform_indices = @transform_4, window_bounds = array<i64: 16, 32>}, {pipeline_mode = #tpu.pipeline_mode<synchronous>, transform_indices = @transform_5, window_bounds = array<i64: 3, 32, 32>}, {pipeline_mode = #tpu.pipeline_mode<synchronous>, transform_indices = @transform_6, window_bounds = array<i64: 32, 32>}, {pipeline_mode = #tpu.pipeline_mode<synchronous>, transform_indices = @transform_7, window_bounds = array<i64: 32, 64>}, {pipeline_mode = #tpu.pipeline_mode<synchronous>, transform_indices = @transform_8, window_bounds = array<i64: 64, 32>}, {pipeline_mode = #tpu.pipeline_mode<synchronous>, transform_indices = @transform_9, window_bounds = array<i64: 32, 32>}, {pipeline_mode = #tpu.pipeline_mode<synchronous>, transform_indices = @transform_10, window_bounds = array<i64: 14, 128>}, {pipeline_mode = #tpu.pipeline_mode<synchronous>, transform_indices = @transform_11, window_bounds = array<i64: 6, 32, 32>}, {pipeline_mode = #tpu.pipeline_mode<synchronous>, transform_indices = @transform_12, window_bounds = array<i64: 2, 32, 32>}, {pipeline_mode = #tpu.pipeline_mode<synchronous>, transform_indices = @transform_13, window_bounds = array<i64: 2, 32, 64>}, {pipeline_mode = #tpu.pipeline_mode<synchronous>, transform_indices = @transform_14, window_bounds = array<i64: 2, 64, 32>}, {pipeline_mode = #tpu.pipeline_mode<synchronous>, transform_indices = @transform_15, window_bounds = array<i64: 32, 128>}, {pipeline_mode = #tpu.pipeline_mode<synchronous>, transform_indices = @transform_16, window_bounds = array<i64: 23, 128>}, {pipeline_mode = #tpu.pipeline_mode<synchronous>, transform_indices = @transform_17, window_bounds = array<i64: 22, 128>}, {pipeline_mode = #tpu.pipeline_mode<synchronous>, transform_indices = @transform_18, window_bounds = array<i64: 1, 128>}]} {
    %c0 = arith.constant 0 : index
    %c0_0 = arith.constant 0 : index
    %0 = vector.load %arg2[%c0, %c0_0] : memref<8x16xf32, #tpu.memory_space<vmem>>, vector<8x16xf32>
    %c0_1 = arith.constant 0 : index
    %c0_2 = arith.constant 0 : index
    %1 = vector.load %arg6[%c0_1, %c0_2] : memref<16x32xbf16, #tpu.memory_space<vmem>>, vector<16x32xbf16>
    %2 = arith.truncf %0 : vector<8x16xf32> to vector<8x16xbf16>
    %cst = arith.constant dense<0.000000e+00> : vector<8x32xf32>
    %3 = tpu.matmul %2, %1, %cst {dimension_numbers = #tpu.dot_dimension_numbers<[1], [0], [0], [1], [0, 0, 1, 1], [], []>} : vector<8x16xbf16>, vector<16x32xbf16>, vector<8x32xf32> -> vector<8x32xf32>
    %c0_3 = arith.constant 0 : index
    %c0_4 = arith.constant 0 : index
    %4 = vector.load %arg12[%c0_3, %c0_4] : memref<14x128xf32, #tpu.memory_space<vmem>>, vector<1x32xf32>
    %5 = vector.broadcast %4 : vector<1x32xf32> to vector<8x32xf32>
    %6 = arith.addf %3, %5 : vector<8x32xf32>
    %7 = tpu.iota {dimensions = array<i32: 0>} : vector<8x8xi32>
    %8 = tpu.iota {dimensions = array<i32: 1>} : vector<8x8xi32>
    %c0_i32 = arith.constant 0 : i32
    %9 = vector.broadcast %c0_i32 : i32 to vector<8x8xi32>
    %10 = arith.cmpi slt, %7, %9 : vector<8x8xi32>
    %c0_i32_5 = arith.constant 0 : i32
    %11 = vector.broadcast %c0_i32_5 : i32 to vector<8x8xi32>
    %12 = arith.cmpi sge, %7, %11 : vector<8x8xi32>
    %c4_i32 = arith.constant 4 : i32
    %13 = vector.broadcast %c4_i32 : i32 to vector<8x8xi32>
    %14 = arith.cmpi slt, %7, %13 : vector<8x8xi32>
    %15 = arith.andi %12, %14 : vector<8x8xi1>
    %c0_i32_6 = arith.constant 0 : i32
    %16 = vector.broadcast %c0_i32_6 : i32 to vector<8x8xi32>
    %17 = arith.cmpi sge, %8, %16 : vector<8x8xi32>
    %18 = arith.andi %15, %17 : vector<8x8xi1>
    %c4_i32_7 = arith.constant 4 : i32
    %19 = vector.broadcast %c4_i32_7 : i32 to vector<8x8xi32>
    %20 = arith.cmpi slt, %8, %19 : vector<8x8xi32>
    %21 = arith.andi %18, %20 : vector<8x8xi1>
    %22 = arith.ori %10, %21 : vector<8x8xi1>
    %c4_i32_8 = arith.constant 4 : i32
    %23 = vector.broadcast %c4_i32_8 : i32 to vector<8x8xi32>
    %24 = arith.cmpi sge, %7, %23 : vector<8x8xi32>
    %c8_i32 = arith.constant 8 : i32
    %25 = vector.broadcast %c8_i32 : i32 to vector<8x8xi32>
    %26 = arith.cmpi slt, %7, %25 : vector<8x8xi32>
    %27 = arith.andi %24, %26 : vector<8x8xi1>
    %c4_i32_9 = arith.constant 4 : i32
    %28 = vector.broadcast %c4_i32_9 : i32 to vector<8x8xi32>
    %29 = arith.cmpi sge, %8, %28 : vector<8x8xi32>
    %30 = arith.andi %27, %29 : vector<8x8xi1>
    %c8_i32_10 = arith.constant 8 : i32
    %31 = vector.broadcast %c8_i32_10 : i32 to vector<8x8xi32>
    %32 = arith.cmpi slt, %8, %31 : vector<8x8xi32>
    %33 = arith.andi %30, %32 : vector<8x8xi1>
    %34 = arith.ori %22, %33 : vector<8x8xi1>
    %cst_11 = arith.constant 0.000000e+00 : f32
    %cst_12 = arith.constant -1.000000e+09 : f32
    %35 = vector.broadcast %cst_11 : f32 to vector<8x8xf32>
    %36 = vector.broadcast %cst_12 : f32 to vector<8x8xf32>
    %37 = arith.select %34, %35, %36 : vector<8x8xi1>, vector<8x8xf32>
    %c0_13 = arith.constant 0 : index
    %c0_14 = arith.constant 0 : index
    %c0_15 = arith.constant 0 : index
    %38 = vector.load %arg7[%c0_13, %c0_14, %c0_15] : memref<3x32x32xbf16, #tpu.memory_space<vmem>>, vector<1x32x32xbf16>
    %39 = vector.shape_cast %38 : vector<1x32x32xbf16> to vector<32x32xbf16>
    %c1 = arith.constant 1 : index
    %c0_16 = arith.constant 0 : index
    %c0_17 = arith.constant 0 : index
    %40 = vector.load %arg7[%c1, %c0_16, %c0_17] : memref<3x32x32xbf16, #tpu.memory_space<vmem>>, vector<1x32x32xbf16>
    %41 = vector.shape_cast %40 : vector<1x32x32xbf16> to vector<32x32xbf16>
    %c2 = arith.constant 2 : index
    %c0_18 = arith.constant 0 : index
    %c0_19 = arith.constant 0 : index
    %42 = vector.load %arg7[%c2, %c0_18, %c0_19] : memref<3x32x32xbf16, #tpu.memory_space<vmem>>, vector<1x32x32xbf16>
    %43 = vector.shape_cast %42 : vector<1x32x32xbf16> to vector<32x32xbf16>
    %c0_20 = arith.constant 0 : index
    %c0_21 = arith.constant 0 : index
    %44 = vector.load %arg8[%c0_20, %c0_21] : memref<32x32xbf16, #tpu.memory_space<vmem>>, vector<32x32xbf16>
    %c0_22 = arith.constant 0 : index
    %c0_23 = arith.constant 0 : index
    %45 = vector.load %arg9[%c0_22, %c0_23] : memref<32x64xbf16, #tpu.memory_space<vmem>>, vector<32x64xbf16>
    %c0_24 = arith.constant 0 : index
    %c0_25 = arith.constant 0 : index
    %46 = vector.load %arg10[%c0_24, %c0_25] : memref<64x32xbf16, #tpu.memory_space<vmem>>, vector<64x32xbf16>
    %c1_26 = arith.constant 1 : index
    %c0_27 = arith.constant 0 : index
    %47 = vector.load %arg12[%c1_26, %c0_27] : memref<14x128xf32, #tpu.memory_space<vmem>>, vector<1x32xf32>
    %c2_28 = arith.constant 2 : index
    %c0_29 = arith.constant 0 : index
    %48 = vector.load %arg12[%c2_28, %c0_29] : memref<14x128xf32, #tpu.memory_space<vmem>>, vector<1x32xf32>
    %c3 = arith.constant 3 : index
    %c0_30 = arith.constant 0 : index
    %49 = vector.load %arg12[%c3, %c0_30] : memref<14x128xf32, #tpu.memory_space<vmem>>, vector<1x32xf32>
    %c4 = arith.constant 4 : index
    %c0_31 = arith.constant 0 : index
    %50 = vector.load %arg12[%c4, %c0_31] : memref<14x128xf32, #tpu.memory_space<vmem>>, vector<1x32xf32>
    %c5 = arith.constant 5 : index
    %c0_32 = arith.constant 0 : index
    %51 = vector.load %arg12[%c5, %c0_32] : memref<14x128xf32, #tpu.memory_space<vmem>>, vector<1x32xf32>
    %c6 = arith.constant 6 : index
    %c0_33 = arith.constant 0 : index
    %52 = vector.load %arg12[%c6, %c0_33] : memref<14x128xf32, #tpu.memory_space<vmem>>, vector<1x32xf32>
    %c7 = arith.constant 7 : index
    %c0_34 = arith.constant 0 : index
    %53 = vector.load %arg12[%c7, %c0_34] : memref<14x128xf32, #tpu.memory_space<vmem>>, vector<1x32xf32>
    %c8 = arith.constant 8 : index
    %c0_35 = arith.constant 0 : index
    %54 = vector.load %arg12[%c8, %c0_35] : memref<14x128xf32, #tpu.memory_space<vmem>>, vector<1x32xf32>
    %c9 = arith.constant 9 : index
    %c0_36 = arith.constant 0 : index
    %55 = vector.load %arg12[%c9, %c0_36] : memref<14x128xf32, #tpu.memory_space<vmem>>, vector<1x64xf32>
    %c10 = arith.constant 10 : index
    %c0_37 = arith.constant 0 : index
    %56 = vector.load %arg12[%c10, %c0_37] : memref<14x128xf32, #tpu.memory_space<vmem>>, vector<1x32xf32>
    %cst_38 = arith.constant dense<0.000000e+00> : vector<8xf32>
    %57 = vector.multi_reduction <add>, %6, %cst_38 [1] : vector<8x32xf32> to vector<8xf32>
    %58 = vector.shape_cast %57 : vector<8xf32> to vector<8x1xf32>
    %cst_39 = arith.constant 3.200000e+01 : f32
    %59 = vector.broadcast %cst_39 : f32 to vector<8x1xf32>
    %60 = arith.divf %58, %59 : vector<8x1xf32>
    %61 = vector.broadcast %60 : vector<8x1xf32> to vector<8x32xf32>
    %62 = arith.subf %6, %61 : vector<8x32xf32>
    %63 = arith.mulf %62, %62 : vector<8x32xf32>
    %cst_40 = arith.constant dense<0.000000e+00> : vector<8xf32>
    %64 = vector.multi_reduction <add>, %63, %cst_40 [1] : vector<8x32xf32> to vector<8xf32>
    %65 = vector.shape_cast %64 : vector<8xf32> to vector<8x1xf32>
    %cst_41 = arith.constant 3.200000e+01 : f32
    %66 = vector.broadcast %cst_41 : f32 to vector<8x1xf32>
    %67 = arith.divf %65, %66 : vector<8x1xf32>
    %68 = vector.broadcast %60 : vector<8x1xf32> to vector<8x32xf32>
    %69 = arith.subf %6, %68 : vector<8x32xf32>
    %cst_42 = arith.constant 9.99999974E-6 : f32
    %70 = vector.broadcast %cst_42 : f32 to vector<8x1xf32>
    %71 = arith.addf %67, %70 : vector<8x1xf32>
    %72 = math.rsqrt %71 : vector<8x1xf32>
    %73 = vector.broadcast %72 : vector<8x1xf32> to vector<8x32xf32>
    %74 = arith.mulf %69, %73 : vector<8x32xf32>
    %75 = vector.broadcast %47 : vector<1x32xf32> to vector<8x32xf32>
    %76 = arith.mulf %74, %75 : vector<8x32xf32>
    %77 = vector.broadcast %48 : vector<1x32xf32> to vector<8x32xf32>
    %78 = arith.addf %76, %77 : vector<8x32xf32>
    %79 = arith.truncf %78 : vector<8x32xf32> to vector<8x32xbf16>
    %cst_43 = arith.constant dense<0.000000e+00> : vector<8x32xf32>
    %80 = tpu.matmul %79, %39, %cst_43 {dimension_numbers = #tpu.dot_dimension_numbers<[1], [0], [0], [1], [0, 0, 1, 1], [], []>} : vector<8x32xbf16>, vector<32x32xbf16>, vector<8x32xf32> -> vector<8x32xf32>
    %81 = vector.broadcast %49 : vector<1x32xf32> to vector<8x32xf32>
    %82 = arith.addf %80, %81 : vector<8x32xf32>
    %83 = arith.truncf %78 : vector<8x32xf32> to vector<8x32xbf16>
    %cst_44 = arith.constant dense<0.000000e+00> : vector<8x32xf32>
    %84 = tpu.matmul %83, %41, %cst_44 {dimension_numbers = #tpu.dot_dimension_numbers<[1], [0], [0], [1], [0, 0, 1, 1], [], []>} : vector<8x32xbf16>, vector<32x32xbf16>, vector<8x32xf32> -> vector<8x32xf32>
    %85 = vector.broadcast %50 : vector<1x32xf32> to vector<8x32xf32>
    %86 = arith.addf %84, %85 : vector<8x32xf32>
    %87 = arith.truncf %78 : vector<8x32xf32> to vector<8x32xbf16>
    %cst_45 = arith.constant dense<0.000000e+00> : vector<8x32xf32>
    %88 = tpu.matmul %87, %43, %cst_45 {dimension_numbers = #tpu.dot_dimension_numbers<[1], [0], [0], [1], [0, 0, 1, 1], [], []>} : vector<8x32xbf16>, vector<32x32xbf16>, vector<8x32xf32> -> vector<8x32xf32>
    %89 = vector.broadcast %51 : vector<1x32xf32> to vector<8x32xf32>
    %90 = arith.addf %88, %89 : vector<8x32xf32>
    %91 = tpu.iota {dimensions = array<i32: 1>} : vector<1x32xi32>
    %cst_46 = arith.constant 0.000000e+00 : f32
    %92 = vector.broadcast %cst_46 : f32 to vector<8x32xf32>
    %c0_i32_47 = arith.constant 0 : i32
    %93 = vector.broadcast %c0_i32_47 : i32 to vector<1x32xi32>
    %94 = arith.cmpi sge, %91, %93 : vector<1x32xi32>
    %c8_i32_48 = arith.constant 8 : i32
    %95 = vector.broadcast %c8_i32_48 : i32 to vector<1x32xi32>
    %96 = arith.cmpi slt, %91, %95 : vector<1x32xi32>
    %97 = arith.andi %94, %96 : vector<1x32xi1>
    %98 = arith.extui %97 : vector<1x32xi1> to vector<1x32xi32>
    %99 = arith.sitofp %98 : vector<1x32xi32> to vector<1x32xf32>
    %100 = vector.broadcast %99 : vector<1x32xf32> to vector<8x32xf32>
    %101 = arith.mulf %82, %100 : vector<8x32xf32>
    %102 = arith.truncf %101 : vector<8x32xf32> to vector<8x32xbf16>
    %103 = arith.truncf %86 : vector<8x32xf32> to vector<8x32xbf16>
    %cst_49 = arith.constant dense<0.000000e+00> : vector<8x8xf32>
    %104 = tpu.matmul %102, %103, %cst_49 {dimension_numbers = #tpu.dot_dimension_numbers<[1], [1], [0], [0], [0, 0, 1, 0], [], []>} : vector<8x32xbf16>, vector<8x32xbf16>, vector<8x8xf32> -> vector<8x8xf32>
    %cst_50 = arith.constant 0.353553385 : f32
    %105 = vector.broadcast %cst_50 : f32 to vector<8x8xf32>
    %106 = arith.mulf %104, %105 : vector<8x8xf32>
    %107 = arith.addf %106, %37 : vector<8x8xf32>
    %cst_51 = arith.constant dense<0xFF800000> : vector<8xf32>
    %108 = vector.multi_reduction <maximumf>, %107, %cst_51 [1] : vector<8x8xf32> to vector<8xf32>
    %109 = vector.shape_cast %108 : vector<8xf32> to vector<8x1xf32>
    %110 = vector.broadcast %109 : vector<8x1xf32> to vector<8x8xf32>
    %111 = arith.subf %107, %110 : vector<8x8xf32>
    %112 = math.exp %111 : vector<8x8xf32>
    %cst_52 = arith.constant dense<0.000000e+00> : vector<8xf32>
    %113 = vector.multi_reduction <add>, %112, %cst_52 [1] : vector<8x8xf32> to vector<8xf32>
    %114 = vector.shape_cast %113 : vector<8xf32> to vector<8x1xf32>
    %115 = tpu.reciprocal %114 {approx = true} : vector<8x1xf32> -> vector<8x1xf32>
    %116 = vector.broadcast %115 : vector<8x1xf32> to vector<8x8xf32>
    %117 = arith.mulf %112, %116 : vector<8x8xf32>
    %118 = vector.broadcast %99 : vector<1x32xf32> to vector<8x32xf32>
    %119 = arith.mulf %90, %118 : vector<8x32xf32>
    %120 = arith.truncf %117 : vector<8x8xf32> to vector<8x8xbf16>
    %121 = arith.truncf %119 : vector<8x32xf32> to vector<8x32xbf16>
    %cst_53 = arith.constant dense<0.000000e+00> : vector<8x32xf32>
    %122 = tpu.matmul %120, %121, %cst_53 {dimension_numbers = #tpu.dot_dimension_numbers<[1], [0], [0], [1], [0, 0, 1, 1], [], []>} : vector<8x8xbf16>, vector<8x32xbf16>, vector<8x32xf32> -> vector<8x32xf32>
    %123 = arith.addf %92, %122 : vector<8x32xf32>
    %c8_i32_54 = arith.constant 8 : i32
    %124 = vector.broadcast %c8_i32_54 : i32 to vector<1x32xi32>
    %125 = arith.cmpi sge, %91, %124 : vector<1x32xi32>
    %c16_i32 = arith.constant 16 : i32
    %126 = vector.broadcast %c16_i32 : i32 to vector<1x32xi32>
    %127 = arith.cmpi slt, %91, %126 : vector<1x32xi32>
    %128 = arith.andi %125, %127 : vector<1x32xi1>
    %129 = arith.extui %128 : vector<1x32xi1> to vector<1x32xi32>
    %130 = arith.sitofp %129 : vector<1x32xi32> to vector<1x32xf32>
    %131 = vector.broadcast %130 : vector<1x32xf32> to vector<8x32xf32>
    %132 = arith.mulf %82, %131 : vector<8x32xf32>
    %133 = arith.truncf %132 : vector<8x32xf32> to vector<8x32xbf16>
    %134 = arith.truncf %86 : vector<8x32xf32> to vector<8x32xbf16>
    %cst_55 = arith.constant dense<0.000000e+00> : vector<8x8xf32>
    %135 = tpu.matmul %133, %134, %cst_55 {dimension_numbers = #tpu.dot_dimension_numbers<[1], [1], [0], [0], [0, 0, 1, 0], [], []>} : vector<8x32xbf16>, vector<8x32xbf16>, vector<8x8xf32> -> vector<8x8xf32>
    %cst_56 = arith.constant 0.353553385 : f32
    %136 = vector.broadcast %cst_56 : f32 to vector<8x8xf32>
    %137 = arith.mulf %135, %136 : vector<8x8xf32>
    %138 = arith.addf %137, %37 : vector<8x8xf32>
    %cst_57 = arith.constant dense<0xFF800000> : vector<8xf32>
    %139 = vector.multi_reduction <maximumf>, %138, %cst_57 [1] : vector<8x8xf32> to vector<8xf32>
    %140 = vector.shape_cast %139 : vector<8xf32> to vector<8x1xf32>
    %141 = vector.broadcast %140 : vector<8x1xf32> to vector<8x8xf32>
    %142 = arith.subf %138, %141 : vector<8x8xf32>
    %143 = math.exp %142 : vector<8x8xf32>
    %cst_58 = arith.constant dense<0.000000e+00> : vector<8xf32>
    %144 = vector.multi_reduction <add>, %143, %cst_58 [1] : vector<8x8xf32> to vector<8xf32>
    %145 = vector.shape_cast %144 : vector<8xf32> to vector<8x1xf32>
    %146 = tpu.reciprocal %145 {approx = true} : vector<8x1xf32> -> vector<8x1xf32>
    %147 = vector.broadcast %146 : vector<8x1xf32> to vector<8x8xf32>
    %148 = arith.mulf %143, %147 : vector<8x8xf32>
    %149 = vector.broadcast %130 : vector<1x32xf32> to vector<8x32xf32>
    %150 = arith.mulf %90, %149 : vector<8x32xf32>
    %151 = arith.truncf %148 : vector<8x8xf32> to vector<8x8xbf16>
    %152 = arith.truncf %150 : vector<8x32xf32> to vector<8x32xbf16>
    %cst_59 = arith.constant dense<0.000000e+00> : vector<8x32xf32>
    %153 = tpu.matmul %151, %152, %cst_59 {dimension_numbers = #tpu.dot_dimension_numbers<[1], [0], [0], [1], [0, 0, 1, 1], [], []>} : vector<8x8xbf16>, vector<8x32xbf16>, vector<8x32xf32> -> vector<8x32xf32>
    %154 = arith.addf %123, %153 : vector<8x32xf32>
    %c16_i32_60 = arith.constant 16 : i32
    %155 = vector.broadcast %c16_i32_60 : i32 to vector<1x32xi32>
    %156 = arith.cmpi sge, %91, %155 : vector<1x32xi32>
    %c24_i32 = arith.constant 24 : i32
    %157 = vector.broadcast %c24_i32 : i32 to vector<1x32xi32>
    %158 = arith.cmpi slt, %91, %157 : vector<1x32xi32>
    %159 = arith.andi %156, %158 : vector<1x32xi1>
    %160 = arith.extui %159 : vector<1x32xi1> to vector<1x32xi32>
    %161 = arith.sitofp %160 : vector<1x32xi32> to vector<1x32xf32>
    %162 = vector.broadcast %161 : vector<1x32xf32> to vector<8x32xf32>
    %163 = arith.mulf %82, %162 : vector<8x32xf32>
    %164 = arith.truncf %163 : vector<8x32xf32> to vector<8x32xbf16>
    %165 = arith.truncf %86 : vector<8x32xf32> to vector<8x32xbf16>
    %cst_61 = arith.constant dense<0.000000e+00> : vector<8x8xf32>
    %166 = tpu.matmul %164, %165, %cst_61 {dimension_numbers = #tpu.dot_dimension_numbers<[1], [1], [0], [0], [0, 0, 1, 0], [], []>} : vector<8x32xbf16>, vector<8x32xbf16>, vector<8x8xf32> -> vector<8x8xf32>
    %cst_62 = arith.constant 0.353553385 : f32
    %167 = vector.broadcast %cst_62 : f32 to vector<8x8xf32>
    %168 = arith.mulf %166, %167 : vector<8x8xf32>
    %169 = arith.addf %168, %37 : vector<8x8xf32>
    %cst_63 = arith.constant dense<0xFF800000> : vector<8xf32>
    %170 = vector.multi_reduction <maximumf>, %169, %cst_63 [1] : vector<8x8xf32> to vector<8xf32>
    %171 = vector.shape_cast %170 : vector<8xf32> to vector<8x1xf32>
    %172 = vector.broadcast %171 : vector<8x1xf32> to vector<8x8xf32>
    %173 = arith.subf %169, %172 : vector<8x8xf32>
    %174 = math.exp %173 : vector<8x8xf32>
    %cst_64 = arith.constant dense<0.000000e+00> : vector<8xf32>
    %175 = vector.multi_reduction <add>, %174, %cst_64 [1] : vector<8x8xf32> to vector<8xf32>
    %176 = vector.shape_cast %175 : vector<8xf32> to vector<8x1xf32>
    %177 = tpu.reciprocal %176 {approx = true} : vector<8x1xf32> -> vector<8x1xf32>
    %178 = vector.broadcast %177 : vector<8x1xf32> to vector<8x8xf32>
    %179 = arith.mulf %174, %178 : vector<8x8xf32>
    %180 = vector.broadcast %161 : vector<1x32xf32> to vector<8x32xf32>
    %181 = arith.mulf %90, %180 : vector<8x32xf32>
    %182 = arith.truncf %179 : vector<8x8xf32> to vector<8x8xbf16>
    %183 = arith.truncf %181 : vector<8x32xf32> to vector<8x32xbf16>
    %cst_65 = arith.constant dense<0.000000e+00> : vector<8x32xf32>
    %184 = tpu.matmul %182, %183, %cst_65 {dimension_numbers = #tpu.dot_dimension_numbers<[1], [0], [0], [1], [0, 0, 1, 1], [], []>} : vector<8x8xbf16>, vector<8x32xbf16>, vector<8x32xf32> -> vector<8x32xf32>
    %185 = arith.addf %154, %184 : vector<8x32xf32>
    %c24_i32_66 = arith.constant 24 : i32
    %186 = vector.broadcast %c24_i32_66 : i32 to vector<1x32xi32>
    %187 = arith.cmpi sge, %91, %186 : vector<1x32xi32>
    %c32_i32 = arith.constant 32 : i32
    %188 = vector.broadcast %c32_i32 : i32 to vector<1x32xi32>
    %189 = arith.cmpi slt, %91, %188 : vector<1x32xi32>
    %190 = arith.andi %187, %189 : vector<1x32xi1>
    %191 = arith.extui %190 : vector<1x32xi1> to vector<1x32xi32>
    %192 = arith.sitofp %191 : vector<1x32xi32> to vector<1x32xf32>
    %193 = vector.broadcast %192 : vector<1x32xf32> to vector<8x32xf32>
    %194 = arith.mulf %82, %193 : vector<8x32xf32>
    %195 = arith.truncf %194 : vector<8x32xf32> to vector<8x32xbf16>
    %196 = arith.truncf %86 : vector<8x32xf32> to vector<8x32xbf16>
    %cst_67 = arith.constant dense<0.000000e+00> : vector<8x8xf32>
    %197 = tpu.matmul %195, %196, %cst_67 {dimension_numbers = #tpu.dot_dimension_numbers<[1], [1], [0], [0], [0, 0, 1, 0], [], []>} : vector<8x32xbf16>, vector<8x32xbf16>, vector<8x8xf32> -> vector<8x8xf32>
    %cst_68 = arith.constant 0.353553385 : f32
    %198 = vector.broadcast %cst_68 : f32 to vector<8x8xf32>
    %199 = arith.mulf %197, %198 : vector<8x8xf32>
    %200 = arith.addf %199, %37 : vector<8x8xf32>
    %cst_69 = arith.constant dense<0xFF800000> : vector<8xf32>
    %201 = vector.multi_reduction <maximumf>, %200, %cst_69 [1] : vector<8x8xf32> to vector<8xf32>
    %202 = vector.shape_cast %201 : vector<8xf32> to vector<8x1xf32>
    %203 = vector.broadcast %202 : vector<8x1xf32> to vector<8x8xf32>
    %204 = arith.subf %200, %203 : vector<8x8xf32>
    %205 = math.exp %204 : vector<8x8xf32>
    %cst_70 = arith.constant dense<0.000000e+00> : vector<8xf32>
    %206 = vector.multi_reduction <add>, %205, %cst_70 [1] : vector<8x8xf32> to vector<8xf32>
    %207 = vector.shape_cast %206 : vector<8xf32> to vector<8x1xf32>
    %208 = tpu.reciprocal %207 {approx = true} : vector<8x1xf32> -> vector<8x1xf32>
    %209 = vector.broadcast %208 : vector<8x1xf32> to vector<8x8xf32>
    %210 = arith.mulf %205, %209 : vector<8x8xf32>
    %211 = vector.broadcast %192 : vector<1x32xf32> to vector<8x32xf32>
    %212 = arith.mulf %90, %211 : vector<8x32xf32>
    %213 = arith.truncf %210 : vector<8x8xf32> to vector<8x8xbf16>
    %214 = arith.truncf %212 : vector<8x32xf32> to vector<8x32xbf16>
    %cst_71 = arith.constant dense<0.000000e+00> : vector<8x32xf32>
    %215 = tpu.matmul %213, %214, %cst_71 {dimension_numbers = #tpu.dot_dimension_numbers<[1], [0], [0], [1], [0, 0, 1, 1], [], []>} : vector<8x8xbf16>, vector<8x32xbf16>, vector<8x32xf32> -> vector<8x32xf32>
    %216 = arith.addf %185, %215 : vector<8x32xf32>
    %217 = arith.truncf %216 : vector<8x32xf32> to vector<8x32xbf16>
    %cst_72 = arith.constant dense<0.000000e+00> : vector<8x32xf32>
    %218 = tpu.matmul %217, %44, %cst_72 {dimension_numbers = #tpu.dot_dimension_numbers<[1], [0], [0], [1], [0, 0, 1, 1], [], []>} : vector<8x32xbf16>, vector<32x32xbf16>, vector<8x32xf32> -> vector<8x32xf32>
    %219 = arith.addf %6, %218 : vector<8x32xf32>
    %220 = vector.broadcast %52 : vector<1x32xf32> to vector<8x32xf32>
    %221 = arith.addf %219, %220 : vector<8x32xf32>
    %cst_73 = arith.constant dense<0.000000e+00> : vector<8xf32>
    %222 = vector.multi_reduction <add>, %221, %cst_73 [1] : vector<8x32xf32> to vector<8xf32>
    %223 = vector.shape_cast %222 : vector<8xf32> to vector<8x1xf32>
    %cst_74 = arith.constant 3.200000e+01 : f32
    %224 = vector.broadcast %cst_74 : f32 to vector<8x1xf32>
    %225 = arith.divf %223, %224 : vector<8x1xf32>
    %226 = vector.broadcast %225 : vector<8x1xf32> to vector<8x32xf32>
    %227 = arith.subf %221, %226 : vector<8x32xf32>
    %228 = arith.mulf %227, %227 : vector<8x32xf32>
    %cst_75 = arith.constant dense<0.000000e+00> : vector<8xf32>
    %229 = vector.multi_reduction <add>, %228, %cst_75 [1] : vector<8x32xf32> to vector<8xf32>
    %230 = vector.shape_cast %229 : vector<8xf32> to vector<8x1xf32>
    %cst_76 = arith.constant 3.200000e+01 : f32
    %231 = vector.broadcast %cst_76 : f32 to vector<8x1xf32>
    %232 = arith.divf %230, %231 : vector<8x1xf32>
    %233 = vector.broadcast %225 : vector<8x1xf32> to vector<8x32xf32>
    %234 = arith.subf %221, %233 : vector<8x32xf32>
    %cst_77 = arith.constant 9.99999974E-6 : f32
    %235 = vector.broadcast %cst_77 : f32 to vector<8x1xf32>
    %236 = arith.addf %232, %235 : vector<8x1xf32>
    %237 = math.rsqrt %236 : vector<8x1xf32>
    %238 = vector.broadcast %237 : vector<8x1xf32> to vector<8x32xf32>
    %239 = arith.mulf %234, %238 : vector<8x32xf32>
    %240 = vector.broadcast %53 : vector<1x32xf32> to vector<8x32xf32>
    %241 = arith.mulf %239, %240 : vector<8x32xf32>
    %242 = vector.broadcast %54 : vector<1x32xf32> to vector<8x32xf32>
    %243 = arith.addf %241, %242 : vector<8x32xf32>
    %244 = arith.truncf %243 : vector<8x32xf32> to vector<8x32xbf16>
    %cst_78 = arith.constant dense<0.000000e+00> : vector<8x64xf32>
    %245 = tpu.matmul %244, %45, %cst_78 {dimension_numbers = #tpu.dot_dimension_numbers<[1], [0], [0], [1], [0, 0, 1, 1], [], []>} : vector<8x32xbf16>, vector<32x64xbf16>, vector<8x64xf32> -> vector<8x64xf32>
    %246 = vector.broadcast %55 : vector<1x64xf32> to vector<8x64xf32>
    %247 = arith.addf %245, %246 : vector<8x64xf32>
    %248 = arith.mulf %247, %247 : vector<8x64xf32>
    %249 = arith.mulf %247, %248 : vector<8x64xf32>
    %cst_79 = arith.constant 4.471500e-02 : f32
    %250 = vector.broadcast %cst_79 : f32 to vector<8x64xf32>
    %251 = arith.mulf %250, %249 : vector<8x64xf32>
    %252 = arith.addf %247, %251 : vector<8x64xf32>
    %cst_80 = arith.constant 0.797884583 : f32
    %253 = vector.broadcast %cst_80 : f32 to vector<8x64xf32>
    %254 = arith.mulf %253, %252 : vector<8x64xf32>
    %255 = math.tanh %254 : vector<8x64xf32>
    %cst_81 = arith.constant 1.000000e+00 : f32
    %256 = vector.broadcast %cst_81 : f32 to vector<8x64xf32>
    %257 = arith.addf %256, %255 : vector<8x64xf32>
    %cst_82 = arith.constant 5.000000e-01 : f32
    %258 = vector.broadcast %cst_82 : f32 to vector<8x64xf32>
    %259 = arith.mulf %258, %257 : vector<8x64xf32>
    %260 = arith.mulf %247, %259 : vector<8x64xf32>
    %261 = arith.truncf %260 : vector<8x64xf32> to vector<8x64xbf16>
    %cst_83 = arith.constant dense<0.000000e+00> : vector<8x32xf32>
    %262 = tpu.matmul %261, %46, %cst_83 {dimension_numbers = #tpu.dot_dimension_numbers<[1], [0], [0], [1], [0, 0, 1, 1], [], []>} : vector<8x64xbf16>, vector<64x32xbf16>, vector<8x32xf32> -> vector<8x32xf32>
    %263 = arith.addf %221, %262 : vector<8x32xf32>
    %264 = vector.broadcast %56 : vector<1x32xf32> to vector<8x32xf32>
    %265 = arith.addf %263, %264 : vector<8x32xf32>
    %c11 = arith.constant 11 : index
    %c0_84 = arith.constant 0 : index
    %266 = vector.load %arg12[%c11, %c0_84] : memref<14x128xf32, #tpu.memory_space<vmem>>, vector<1x32xf32>
    %c12 = arith.constant 12 : index
    %c0_85 = arith.constant 0 : index
    %267 = vector.load %arg12[%c12, %c0_85] : memref<14x128xf32, #tpu.memory_space<vmem>>, vector<1x32xf32>
    %cst_86 = arith.constant dense<0.000000e+00> : vector<8xf32>
    %268 = vector.multi_reduction <add>, %265, %cst_86 [1] : vector<8x32xf32> to vector<8xf32>
    %269 = vector.shape_cast %268 : vector<8xf32> to vector<8x1xf32>
    %cst_87 = arith.constant 3.200000e+01 : f32
    %270 = vector.broadcast %cst_87 : f32 to vector<8x1xf32>
    %271 = arith.divf %269, %270 : vector<8x1xf32>
    %272 = vector.broadcast %271 : vector<8x1xf32> to vector<8x32xf32>
    %273 = arith.subf %265, %272 : vector<8x32xf32>
    %274 = arith.mulf %273, %273 : vector<8x32xf32>
    %cst_88 = arith.constant dense<0.000000e+00> : vector<8xf32>
    %275 = vector.multi_reduction <add>, %274, %cst_88 [1] : vector<8x32xf32> to vector<8xf32>
    %276 = vector.shape_cast %275 : vector<8xf32> to vector<8x1xf32>
    %cst_89 = arith.constant 3.200000e+01 : f32
    %277 = vector.broadcast %cst_89 : f32 to vector<8x1xf32>
    %278 = arith.divf %276, %277 : vector<8x1xf32>
    %279 = vector.broadcast %271 : vector<8x1xf32> to vector<8x32xf32>
    %280 = arith.subf %265, %279 : vector<8x32xf32>
    %cst_90 = arith.constant 9.99999974E-6 : f32
    %281 = vector.broadcast %cst_90 : f32 to vector<8x1xf32>
    %282 = arith.addf %278, %281 : vector<8x1xf32>
    %283 = math.rsqrt %282 : vector<8x1xf32>
    %284 = vector.broadcast %283 : vector<8x1xf32> to vector<8x32xf32>
    %285 = arith.mulf %280, %284 : vector<8x32xf32>
    %286 = vector.broadcast %266 : vector<1x32xf32> to vector<8x32xf32>
    %287 = arith.mulf %285, %286 : vector<8x32xf32>
    %288 = vector.broadcast %267 : vector<1x32xf32> to vector<8x32xf32>
    %289 = arith.addf %287, %288 : vector<8x32xf32>
    %c0_91 = arith.constant 0 : index
    %c0_92 = arith.constant 0 : index
    %290 = vector.load %arg11[%c0_91, %c0_92] : memref<32x32xbf16, #tpu.memory_space<vmem>>, vector<32x32xbf16>
    %291 = arith.truncf %289 : vector<8x32xf32> to vector<8x32xbf16>
    %cst_93 = arith.constant dense<0.000000e+00> : vector<8x32xf32>
    %292 = tpu.matmul %291, %290, %cst_93 {dimension_numbers = #tpu.dot_dimension_numbers<[1], [0], [0], [1], [0, 0, 1, 1], [], []>} : vector<8x32xbf16>, vector<32x32xbf16>, vector<8x32xf32> -> vector<8x32xf32>
    %c13 = arith.constant 13 : index
    %c0_94 = arith.constant 0 : index
    %293 = vector.load %arg12[%c13, %c0_94] : memref<14x128xf32, #tpu.memory_space<vmem>>, vector<1x32xf32>
    %294 = vector.broadcast %293 : vector<1x32xf32> to vector<8x32xf32>
    %295 = arith.addf %292, %294 : vector<8x32xf32>
    %c0_95 = arith.constant 0 : index
    %c0_96 = arith.constant 0 : index
    %296 = vector.load %arg3[%c0_95, %c0_96] : memref<16x32xf32, #tpu.memory_space<vmem>>, vector<16x32xf32>
    %297 = tpu.iota {dimensions = array<i32: 0>} : vector<22x16xi32>
    %298 = tpu.iota {dimensions = array<i32: 1>} : vector<22x16xi32>
    %299 = tpu.iota {dimensions = array<i32: 0>} : vector<22x8xi32>
    %300 = tpu.iota {dimensions = array<i32: 1>} : vector<22x8xi32>
    %cst_97 = arith.constant 0.000000e+00 : f32
    %301 = vector.broadcast %cst_97 : f32 to vector<22x16xf32>
    %cst_98 = arith.constant 0.000000e+00 : f32
    %302 = vector.broadcast %cst_98 : f32 to vector<22x8xf32>
    %c0_99 = arith.constant 0 : index
    %303 = memref.load %arg1[%c0_99] : memref<2xi32, #tpu.memory_space<smem>>
    %c0_i32_100 = arith.constant 0 : i32
    %304 = vector.broadcast %c0_i32_100 : i32 to vector<22x16xi32>
    %305 = arith.subi %297, %304 : vector<22x16xi32>
    %c0_i32_101 = arith.constant 0 : i32
    %306 = vector.broadcast %c0_i32_101 : i32 to vector<22x16xi32>
    %307 = arith.subi %298, %306 : vector<22x16xi32>
    %c0_i32_102 = arith.constant 0 : i32
    %308 = vector.broadcast %c0_i32_102 : i32 to vector<22x16xi32>
    %309 = arith.cmpi sge, %297, %308 : vector<22x16xi32>
    %c11_i32 = arith.constant 11 : i32
    %310 = vector.broadcast %c11_i32 : i32 to vector<22x16xi32>
    %311 = arith.cmpi slt, %297, %310 : vector<22x16xi32>
    %312 = arith.andi %309, %311 : vector<22x16xi1>
    %c0_i32_103 = arith.constant 0 : i32
    %313 = vector.broadcast %c0_i32_103 : i32 to vector<22x16xi32>
    %314 = arith.cmpi sge, %298, %313 : vector<22x16xi32>
    %315 = arith.andi %312, %314 : vector<22x16xi1>
    %c8_i32_104 = arith.constant 8 : i32
    %316 = vector.broadcast %c8_i32_104 : i32 to vector<22x16xi32>
    %317 = arith.cmpi slt, %298, %316 : vector<22x16xi32>
    %318 = arith.andi %315, %317 : vector<22x16xi1>
    %319 = vector.broadcast %303 : i32 to vector<22x16xi32>
    %320 = arith.cmpi slt, %305, %319 : vector<22x16xi32>
    %321 = arith.cmpi eq, %307, %305 : vector<22x16xi32>
    %322 = arith.andi %320, %321 : vector<22x16xi1>
    %c4_i32_105 = arith.constant 4 : i32
    %323 = arith.addi %303, %c4_i32_105 : i32
    %324 = vector.broadcast %323 : i32 to vector<22x16xi32>
    %325 = arith.cmpi sge, %305, %324 : vector<22x16xi32>
    %c3_i32 = arith.constant 3 : i32
    %326 = vector.broadcast %c3_i32 : i32 to vector<22x16xi32>
    %327 = arith.subi %305, %326 : vector<22x16xi32>
    %328 = arith.cmpi eq, %307, %327 : vector<22x16xi32>
    %329 = arith.andi %325, %328 : vector<22x16xi1>
    %330 = arith.ori %322, %329 : vector<22x16xi1>
    %331 = arith.andi %318, %330 : vector<22x16xi1>
    %332 = arith.extui %331 : vector<22x16xi1> to vector<22x16xi32>
    %333 = arith.sitofp %332 : vector<22x16xi32> to vector<22x16xf32>
    %334 = arith.addf %301, %333 : vector<22x16xf32>
    %c0_i32_106 = arith.constant 0 : i32
    %335 = vector.broadcast %c0_i32_106 : i32 to vector<22x8xi32>
    %336 = arith.subi %299, %335 : vector<22x8xi32>
    %c0_i32_107 = arith.constant 0 : i32
    %337 = vector.broadcast %c0_i32_107 : i32 to vector<22x8xi32>
    %338 = arith.subi %300, %337 : vector<22x8xi32>
    %c0_i32_108 = arith.constant 0 : i32
    %339 = vector.broadcast %c0_i32_108 : i32 to vector<22x8xi32>
    %340 = arith.cmpi sge, %299, %339 : vector<22x8xi32>
    %c11_i32_109 = arith.constant 11 : i32
    %341 = vector.broadcast %c11_i32_109 : i32 to vector<22x8xi32>
    %342 = arith.cmpi slt, %299, %341 : vector<22x8xi32>
    %343 = arith.andi %340, %342 : vector<22x8xi1>
    %c0_i32_110 = arith.constant 0 : i32
    %344 = vector.broadcast %c0_i32_110 : i32 to vector<22x8xi32>
    %345 = arith.cmpi sge, %300, %344 : vector<22x8xi32>
    %346 = arith.andi %343, %345 : vector<22x8xi1>
    %c4_i32_111 = arith.constant 4 : i32
    %347 = vector.broadcast %c4_i32_111 : i32 to vector<22x8xi32>
    %348 = arith.cmpi slt, %300, %347 : vector<22x8xi32>
    %349 = arith.andi %346, %348 : vector<22x8xi1>
    %350 = vector.broadcast %303 : i32 to vector<22x8xi32>
    %351 = arith.cmpi sge, %336, %350 : vector<22x8xi32>
    %352 = arith.andi %349, %351 : vector<22x8xi1>
    %c4_i32_112 = arith.constant 4 : i32
    %353 = arith.addi %303, %c4_i32_112 : i32
    %354 = vector.broadcast %353 : i32 to vector<22x8xi32>
    %355 = arith.cmpi slt, %336, %354 : vector<22x8xi32>
    %356 = arith.andi %352, %355 : vector<22x8xi1>
    %357 = vector.broadcast %303 : i32 to vector<22x8xi32>
    %358 = arith.subi %336, %357 : vector<22x8xi32>
    %359 = arith.cmpi eq, %338, %358 : vector<22x8xi32>
    %360 = arith.andi %356, %359 : vector<22x8xi1>
    %361 = arith.extui %360 : vector<22x8xi1> to vector<22x8xi32>
    %362 = arith.sitofp %361 : vector<22x8xi32> to vector<22x8xf32>
    %363 = arith.addf %302, %362 : vector<22x8xf32>
    %c1_113 = arith.constant 1 : index
    %364 = memref.load %arg1[%c1_113] : memref<2xi32, #tpu.memory_space<smem>>
    %c11_i32_114 = arith.constant 11 : i32
    %365 = vector.broadcast %c11_i32_114 : i32 to vector<22x16xi32>
    %366 = arith.subi %297, %365 : vector<22x16xi32>
    %c8_i32_115 = arith.constant 8 : i32
    %367 = vector.broadcast %c8_i32_115 : i32 to vector<22x16xi32>
    %368 = arith.subi %298, %367 : vector<22x16xi32>
    %c11_i32_116 = arith.constant 11 : i32
    %369 = vector.broadcast %c11_i32_116 : i32 to vector<22x16xi32>
    %370 = arith.cmpi sge, %297, %369 : vector<22x16xi32>
    %c22_i32 = arith.constant 22 : i32
    %371 = vector.broadcast %c22_i32 : i32 to vector<22x16xi32>
    %372 = arith.cmpi slt, %297, %371 : vector<22x16xi32>
    %373 = arith.andi %370, %372 : vector<22x16xi1>
    %c8_i32_117 = arith.constant 8 : i32
    %374 = vector.broadcast %c8_i32_117 : i32 to vector<22x16xi32>
    %375 = arith.cmpi sge, %298, %374 : vector<22x16xi32>
    %376 = arith.andi %373, %375 : vector<22x16xi1>
    %c16_i32_118 = arith.constant 16 : i32
    %377 = vector.broadcast %c16_i32_118 : i32 to vector<22x16xi32>
    %378 = arith.cmpi slt, %298, %377 : vector<22x16xi32>
    %379 = arith.andi %376, %378 : vector<22x16xi1>
    %380 = vector.broadcast %364 : i32 to vector<22x16xi32>
    %381 = arith.cmpi slt, %366, %380 : vector<22x16xi32>
    %382 = arith.cmpi eq, %368, %366 : vector<22x16xi32>
    %383 = arith.andi %381, %382 : vector<22x16xi1>
    %c4_i32_119 = arith.constant 4 : i32
    %384 = arith.addi %364, %c4_i32_119 : i32
    %385 = vector.broadcast %384 : i32 to vector<22x16xi32>
    %386 = arith.cmpi sge, %366, %385 : vector<22x16xi32>
    %c3_i32_120 = arith.constant 3 : i32
    %387 = vector.broadcast %c3_i32_120 : i32 to vector<22x16xi32>
    %388 = arith.subi %366, %387 : vector<22x16xi32>
    %389 = arith.cmpi eq, %368, %388 : vector<22x16xi32>
    %390 = arith.andi %386, %389 : vector<22x16xi1>
    %391 = arith.ori %383, %390 : vector<22x16xi1>
    %392 = arith.andi %379, %391 : vector<22x16xi1>
    %393 = arith.extui %392 : vector<22x16xi1> to vector<22x16xi32>
    %394 = arith.sitofp %393 : vector<22x16xi32> to vector<22x16xf32>
    %395 = arith.addf %334, %394 : vector<22x16xf32>
    %c11_i32_121 = arith.constant 11 : i32
    %396 = vector.broadcast %c11_i32_121 : i32 to vector<22x8xi32>
    %397 = arith.subi %299, %396 : vector<22x8xi32>
    %c4_i32_122 = arith.constant 4 : i32
    %398 = vector.broadcast %c4_i32_122 : i32 to vector<22x8xi32>
    %399 = arith.subi %300, %398 : vector<22x8xi32>
    %c11_i32_123 = arith.constant 11 : i32
    %400 = vector.broadcast %c11_i32_123 : i32 to vector<22x8xi32>
    %401 = arith.cmpi sge, %299, %400 : vector<22x8xi32>
    %c22_i32_124 = arith.constant 22 : i32
    %402 = vector.broadcast %c22_i32_124 : i32 to vector<22x8xi32>
    %403 = arith.cmpi slt, %299, %402 : vector<22x8xi32>
    %404 = arith.andi %401, %403 : vector<22x8xi1>
    %c4_i32_125 = arith.constant 4 : i32
    %405 = vector.broadcast %c4_i32_125 : i32 to vector<22x8xi32>
    %406 = arith.cmpi sge, %300, %405 : vector<22x8xi32>
    %407 = arith.andi %404, %406 : vector<22x8xi1>
    %c8_i32_126 = arith.constant 8 : i32
    %408 = vector.broadcast %c8_i32_126 : i32 to vector<22x8xi32>
    %409 = arith.cmpi slt, %300, %408 : vector<22x8xi32>
    %410 = arith.andi %407, %409 : vector<22x8xi1>
    %411 = vector.broadcast %364 : i32 to vector<22x8xi32>
    %412 = arith.cmpi sge, %397, %411 : vector<22x8xi32>
    %413 = arith.andi %410, %412 : vector<22x8xi1>
    %c4_i32_127 = arith.constant 4 : i32
    %414 = arith.addi %364, %c4_i32_127 : i32
    %415 = vector.broadcast %414 : i32 to vector<22x8xi32>
    %416 = arith.cmpi slt, %397, %415 : vector<22x8xi32>
    %417 = arith.andi %413, %416 : vector<22x8xi1>
    %418 = vector.broadcast %364 : i32 to vector<22x8xi32>
    %419 = arith.subi %397, %418 : vector<22x8xi32>
    %420 = arith.cmpi eq, %399, %419 : vector<22x8xi32>
    %421 = arith.andi %417, %420 : vector<22x8xi1>
    %422 = arith.extui %421 : vector<22x8xi1> to vector<22x8xi32>
    %423 = arith.sitofp %422 : vector<22x8xi32> to vector<22x8xf32>
    %424 = arith.addf %363, %423 : vector<22x8xf32>
    %cst_128 = arith.constant dense<0.000000e+00> : vector<22x32xf32>
    %425 = tpu.matmul %395, %296, %cst_128 {dimension_numbers = #tpu.dot_dimension_numbers<[1], [0], [0], [1], [0, 0, 1, 1], [], []>} : vector<22x16xf32>, vector<16x32xf32>, vector<22x32xf32> -> vector<22x32xf32>
    %cst_129 = arith.constant dense<0.000000e+00> : vector<22x32xf32>
    %426 = tpu.matmul %424, %295, %cst_129 {dimension_numbers = #tpu.dot_dimension_numbers<[1], [0], [0], [1], [0, 0, 1, 1], [], []>} : vector<22x8xf32>, vector<8x32xf32>, vector<22x32xf32> -> vector<22x32xf32>
    %427 = arith.addf %425, %426 : vector<22x32xf32>
    %c0_130 = arith.constant 0 : index
    %c0_131 = arith.constant 0 : index
    %428 = vector.load %arg4[%c0_130, %c0_131] : memref<1x22xf32, #tpu.memory_space<vmem>>, vector<1x22xf32>
    %429 = tpu.iota {dimensions = array<i32: 0>} : vector<22x22xi32>
    %430 = tpu.iota {dimensions = array<i32: 1>} : vector<22x22xi32>
    %c0_i32_132 = arith.constant 0 : i32
    %431 = vector.broadcast %c0_i32_132 : i32 to vector<22x22xi32>
    %432 = arith.cmpi slt, %429, %431 : vector<22x22xi32>
    %c0_i32_133 = arith.constant 0 : i32
    %433 = vector.broadcast %c0_i32_133 : i32 to vector<22x22xi32>
    %434 = arith.cmpi sge, %429, %433 : vector<22x22xi32>
    %c11_i32_134 = arith.constant 11 : i32
    %435 = vector.broadcast %c11_i32_134 : i32 to vector<22x22xi32>
    %436 = arith.cmpi slt, %429, %435 : vector<22x22xi32>
    %437 = arith.andi %434, %436 : vector<22x22xi1>
    %c0_i32_135 = arith.constant 0 : i32
    %438 = vector.broadcast %c0_i32_135 : i32 to vector<22x22xi32>
    %439 = arith.cmpi sge, %430, %438 : vector<22x22xi32>
    %440 = arith.andi %437, %439 : vector<22x22xi1>
    %c11_i32_136 = arith.constant 11 : i32
    %441 = vector.broadcast %c11_i32_136 : i32 to vector<22x22xi32>
    %442 = arith.cmpi slt, %430, %441 : vector<22x22xi32>
    %443 = arith.andi %440, %442 : vector<22x22xi1>
    %444 = arith.ori %432, %443 : vector<22x22xi1>
    %c11_i32_137 = arith.constant 11 : i32
    %445 = vector.broadcast %c11_i32_137 : i32 to vector<22x22xi32>
    %446 = arith.cmpi sge, %429, %445 : vector<22x22xi32>
    %c22_i32_138 = arith.constant 22 : i32
    %447 = vector.broadcast %c22_i32_138 : i32 to vector<22x22xi32>
    %448 = arith.cmpi slt, %429, %447 : vector<22x22xi32>
    %449 = arith.andi %446, %448 : vector<22x22xi1>
    %c11_i32_139 = arith.constant 11 : i32
    %450 = vector.broadcast %c11_i32_139 : i32 to vector<22x22xi32>
    %451 = arith.cmpi sge, %430, %450 : vector<22x22xi32>
    %452 = arith.andi %449, %451 : vector<22x22xi1>
    %c22_i32_140 = arith.constant 22 : i32
    %453 = vector.broadcast %c22_i32_140 : i32 to vector<22x22xi32>
    %454 = arith.cmpi slt, %430, %453 : vector<22x22xi32>
    %455 = arith.andi %452, %454 : vector<22x22xi1>
    %456 = arith.ori %444, %455 : vector<22x22xi1>
    %457 = arith.cmpi sle, %430, %429 : vector<22x22xi32>
    %458 = arith.andi %456, %457 : vector<22x22xi1>
    %cst_141 = arith.constant 0.000000e+00 : f32
    %459 = vector.broadcast %cst_141 : f32 to vector<1x22xf32>
    %460 = arith.cmpf ogt, %428, %459 : vector<1x22xf32>
    %461 = vector.broadcast %460 : vector<1x22xi1> to vector<22x22xi1>
    %462 = arith.andi %458, %461 : vector<22x22xi1>
    %cst_142 = arith.constant 0.000000e+00 : f32
    %cst_143 = arith.constant -1.000000e+09 : f32
    %463 = vector.broadcast %cst_142 : f32 to vector<22x22xf32>
    %464 = vector.broadcast %cst_143 : f32 to vector<22x22xf32>
    %465 = arith.select %462, %463, %464 : vector<22x22xi1>, vector<22x22xf32>
    %c0_144 = arith.constant 0 : index
    %c0_145 = arith.constant 0 : index
    %c0_146 = arith.constant 0 : index
    %466 = vector.load %arg13[%c0_144, %c0_145, %c0_146] : memref<6x32x32xbf16, #tpu.memory_space<vmem>>, vector<1x32x32xbf16>
    %467 = vector.shape_cast %466 : vector<1x32x32xbf16> to vector<32x32xbf16>
    %c1_147 = arith.constant 1 : index
    %c0_148 = arith.constant 0 : index
    %c0_149 = arith.constant 0 : index
    %468 = vector.load %arg13[%c1_147, %c0_148, %c0_149] : memref<6x32x32xbf16, #tpu.memory_space<vmem>>, vector<1x32x32xbf16>
    %469 = vector.shape_cast %468 : vector<1x32x32xbf16> to vector<32x32xbf16>
    %c2_150 = arith.constant 2 : index
    %c0_151 = arith.constant 0 : index
    %c0_152 = arith.constant 0 : index
    %470 = vector.load %arg13[%c2_150, %c0_151, %c0_152] : memref<6x32x32xbf16, #tpu.memory_space<vmem>>, vector<1x32x32xbf16>
    %471 = vector.shape_cast %470 : vector<1x32x32xbf16> to vector<32x32xbf16>
    %c0_153 = arith.constant 0 : index
    %c0_154 = arith.constant 0 : index
    %c0_155 = arith.constant 0 : index
    %472 = vector.load %arg14[%c0_153, %c0_154, %c0_155] : memref<2x32x32xbf16, #tpu.memory_space<vmem>>, vector<1x32x32xbf16>
    %473 = vector.shape_cast %472 : vector<1x32x32xbf16> to vector<32x32xbf16>
    %c0_156 = arith.constant 0 : index
    %c0_157 = arith.constant 0 : index
    %c0_158 = arith.constant 0 : index
    %474 = vector.load %arg15[%c0_156, %c0_157, %c0_158] : memref<2x32x64xbf16, #tpu.memory_space<vmem>>, vector<1x32x64xbf16>
    %475 = vector.shape_cast %474 : vector<1x32x64xbf16> to vector<32x64xbf16>
    %c0_159 = arith.constant 0 : index
    %c0_160 = arith.constant 0 : index
    %c0_161 = arith.constant 0 : index
    %476 = vector.load %arg16[%c0_159, %c0_160, %c0_161] : memref<2x64x32xbf16, #tpu.memory_space<vmem>>, vector<1x64x32xbf16>
    %477 = vector.shape_cast %476 : vector<1x64x32xbf16> to vector<64x32xbf16>
    %c0_162 = arith.constant 0 : index
    %c0_163 = arith.constant 0 : index
    %478 = vector.load %arg18[%c0_162, %c0_163] : memref<23x128xf32, #tpu.memory_space<vmem>>, vector<1x32xf32>
    %c1_164 = arith.constant 1 : index
    %c0_165 = arith.constant 0 : index
    %479 = vector.load %arg18[%c1_164, %c0_165] : memref<23x128xf32, #tpu.memory_space<vmem>>, vector<1x32xf32>
    %c2_166 = arith.constant 2 : index
    %c0_167 = arith.constant 0 : index
    %480 = vector.load %arg18[%c2_166, %c0_167] : memref<23x128xf32, #tpu.memory_space<vmem>>, vector<1x32xf32>
    %c3_168 = arith.constant 3 : index
    %c0_169 = arith.constant 0 : index
    %481 = vector.load %arg18[%c3_168, %c0_169] : memref<23x128xf32, #tpu.memory_space<vmem>>, vector<1x32xf32>
    %c4_170 = arith.constant 4 : index
    %c0_171 = arith.constant 0 : index
    %482 = vector.load %arg18[%c4_170, %c0_171] : memref<23x128xf32, #tpu.memory_space<vmem>>, vector<1x32xf32>
    %c5_172 = arith.constant 5 : index
    %c0_173 = arith.constant 0 : index
    %483 = vector.load %arg18[%c5_172, %c0_173] : memref<23x128xf32, #tpu.memory_space<vmem>>, vector<1x32xf32>
    %c6_174 = arith.constant 6 : index
    %c0_175 = arith.constant 0 : index
    %484 = vector.load %arg18[%c6_174, %c0_175] : memref<23x128xf32, #tpu.memory_space<vmem>>, vector<1x32xf32>
    %c7_176 = arith.constant 7 : index
    %c0_177 = arith.constant 0 : index
    %485 = vector.load %arg18[%c7_176, %c0_177] : memref<23x128xf32, #tpu.memory_space<vmem>>, vector<1x32xf32>
    %c8_178 = arith.constant 8 : index
    %c0_179 = arith.constant 0 : index
    %486 = vector.load %arg18[%c8_178, %c0_179] : memref<23x128xf32, #tpu.memory_space<vmem>>, vector<1x64xf32>
    %c9_180 = arith.constant 9 : index
    %c0_181 = arith.constant 0 : index
    %487 = vector.load %arg18[%c9_180, %c0_181] : memref<23x128xf32, #tpu.memory_space<vmem>>, vector<1x32xf32>
    %cst_182 = arith.constant dense<0.000000e+00> : vector<22xf32>
    %488 = vector.multi_reduction <add>, %427, %cst_182 [1] : vector<22x32xf32> to vector<22xf32>
    %489 = vector.shape_cast %488 : vector<22xf32> to vector<22x1xf32>
    %cst_183 = arith.constant 3.200000e+01 : f32
    %490 = vector.broadcast %cst_183 : f32 to vector<22x1xf32>
    %491 = arith.divf %489, %490 : vector<22x1xf32>
    %492 = vector.broadcast %491 : vector<22x1xf32> to vector<22x32xf32>
    %493 = arith.subf %427, %492 : vector<22x32xf32>
    %494 = arith.mulf %493, %493 : vector<22x32xf32>
    %cst_184 = arith.constant dense<0.000000e+00> : vector<22xf32>
    %495 = vector.multi_reduction <add>, %494, %cst_184 [1] : vector<22x32xf32> to vector<22xf32>
    %496 = vector.shape_cast %495 : vector<22xf32> to vector<22x1xf32>
    %cst_185 = arith.constant 3.200000e+01 : f32
    %497 = vector.broadcast %cst_185 : f32 to vector<22x1xf32>
    %498 = arith.divf %496, %497 : vector<22x1xf32>
    %499 = vector.broadcast %491 : vector<22x1xf32> to vector<22x32xf32>
    %500 = arith.subf %427, %499 : vector<22x32xf32>
    %cst_186 = arith.constant 9.99999974E-6 : f32
    %501 = vector.broadcast %cst_186 : f32 to vector<22x1xf32>
    %502 = arith.addf %498, %501 : vector<22x1xf32>
    %503 = math.rsqrt %502 : vector<22x1xf32>
    %504 = vector.broadcast %503 : vector<22x1xf32> to vector<22x32xf32>
    %505 = arith.mulf %500, %504 : vector<22x32xf32>
    %506 = vector.broadcast %478 : vector<1x32xf32> to vector<22x32xf32>
    %507 = arith.mulf %505, %506 : vector<22x32xf32>
    %508 = vector.broadcast %479 : vector<1x32xf32> to vector<22x32xf32>
    %509 = arith.addf %507, %508 : vector<22x32xf32>
    %510 = arith.truncf %509 : vector<22x32xf32> to vector<22x32xbf16>
    %cst_187 = arith.constant dense<0.000000e+00> : vector<22x32xf32>
    %511 = tpu.matmul %510, %467, %cst_187 {dimension_numbers = #tpu.dot_dimension_numbers<[1], [0], [0], [1], [0, 0, 1, 1], [], []>} : vector<22x32xbf16>, vector<32x32xbf16>, vector<22x32xf32> -> vector<22x32xf32>
    %512 = vector.broadcast %480 : vector<1x32xf32> to vector<22x32xf32>
    %513 = arith.addf %511, %512 : vector<22x32xf32>
    %514 = arith.truncf %509 : vector<22x32xf32> to vector<22x32xbf16>
    %cst_188 = arith.constant dense<0.000000e+00> : vector<22x32xf32>
    %515 = tpu.matmul %514, %469, %cst_188 {dimension_numbers = #tpu.dot_dimension_numbers<[1], [0], [0], [1], [0, 0, 1, 1], [], []>} : vector<22x32xbf16>, vector<32x32xbf16>, vector<22x32xf32> -> vector<22x32xf32>
    %516 = vector.broadcast %481 : vector<1x32xf32> to vector<22x32xf32>
    %517 = arith.addf %515, %516 : vector<22x32xf32>
    %518 = arith.truncf %509 : vector<22x32xf32> to vector<22x32xbf16>
    %cst_189 = arith.constant dense<0.000000e+00> : vector<22x32xf32>
    %519 = tpu.matmul %518, %471, %cst_189 {dimension_numbers = #tpu.dot_dimension_numbers<[1], [0], [0], [1], [0, 0, 1, 1], [], []>} : vector<22x32xbf16>, vector<32x32xbf16>, vector<22x32xf32> -> vector<22x32xf32>
    %520 = vector.broadcast %482 : vector<1x32xf32> to vector<22x32xf32>
    %521 = arith.addf %519, %520 : vector<22x32xf32>
    %522 = tpu.iota {dimensions = array<i32: 1>} : vector<1x32xi32>
    %cst_190 = arith.constant 0.000000e+00 : f32
    %523 = vector.broadcast %cst_190 : f32 to vector<22x32xf32>
    %c0_i32_191 = arith.constant 0 : i32
    %524 = vector.broadcast %c0_i32_191 : i32 to vector<1x32xi32>
    %525 = arith.cmpi sge, %522, %524 : vector<1x32xi32>
    %c8_i32_192 = arith.constant 8 : i32
    %526 = vector.broadcast %c8_i32_192 : i32 to vector<1x32xi32>
    %527 = arith.cmpi slt, %522, %526 : vector<1x32xi32>
    %528 = arith.andi %525, %527 : vector<1x32xi1>
    %529 = arith.extui %528 : vector<1x32xi1> to vector<1x32xi32>
    %530 = arith.sitofp %529 : vector<1x32xi32> to vector<1x32xf32>
    %531 = vector.broadcast %530 : vector<1x32xf32> to vector<22x32xf32>
    %532 = arith.mulf %513, %531 : vector<22x32xf32>
    %533 = arith.truncf %532 : vector<22x32xf32> to vector<22x32xbf16>
    %534 = arith.truncf %517 : vector<22x32xf32> to vector<22x32xbf16>
    %cst_193 = arith.constant dense<0.000000e+00> : vector<22x22xf32>
    %535 = tpu.matmul %533, %534, %cst_193 {dimension_numbers = #tpu.dot_dimension_numbers<[1], [1], [0], [0], [0, 0, 1, 0], [], []>} : vector<22x32xbf16>, vector<22x32xbf16>, vector<22x22xf32> -> vector<22x22xf32>
    %cst_194 = arith.constant 0.353553385 : f32
    %536 = vector.broadcast %cst_194 : f32 to vector<22x22xf32>
    %537 = arith.mulf %535, %536 : vector<22x22xf32>
    %538 = arith.addf %537, %465 : vector<22x22xf32>
    %cst_195 = arith.constant dense<0xFF800000> : vector<22xf32>
    %539 = vector.multi_reduction <maximumf>, %538, %cst_195 [1] : vector<22x22xf32> to vector<22xf32>
    %540 = vector.shape_cast %539 : vector<22xf32> to vector<22x1xf32>
    %541 = vector.broadcast %540 : vector<22x1xf32> to vector<22x22xf32>
    %542 = arith.subf %538, %541 : vector<22x22xf32>
    %543 = math.exp %542 : vector<22x22xf32>
    %cst_196 = arith.constant dense<0.000000e+00> : vector<22xf32>
    %544 = vector.multi_reduction <add>, %543, %cst_196 [1] : vector<22x22xf32> to vector<22xf32>
    %545 = vector.shape_cast %544 : vector<22xf32> to vector<22x1xf32>
    %546 = tpu.reciprocal %545 {approx = true} : vector<22x1xf32> -> vector<22x1xf32>
    %547 = vector.broadcast %546 : vector<22x1xf32> to vector<22x22xf32>
    %548 = arith.mulf %543, %547 : vector<22x22xf32>
    %549 = vector.broadcast %530 : vector<1x32xf32> to vector<22x32xf32>
    %550 = arith.mulf %521, %549 : vector<22x32xf32>
    %551 = arith.truncf %548 : vector<22x22xf32> to vector<22x22xbf16>
    %552 = arith.truncf %550 : vector<22x32xf32> to vector<22x32xbf16>
    %cst_197 = arith.constant dense<0.000000e+00> : vector<22x32xf32>
    %553 = tpu.matmul %551, %552, %cst_197 {dimension_numbers = #tpu.dot_dimension_numbers<[1], [0], [0], [1], [0, 0, 1, 1], [], []>} : vector<22x22xbf16>, vector<22x32xbf16>, vector<22x32xf32> -> vector<22x32xf32>
    %554 = arith.addf %523, %553 : vector<22x32xf32>
    %c8_i32_198 = arith.constant 8 : i32
    %555 = vector.broadcast %c8_i32_198 : i32 to vector<1x32xi32>
    %556 = arith.cmpi sge, %522, %555 : vector<1x32xi32>
    %c16_i32_199 = arith.constant 16 : i32
    %557 = vector.broadcast %c16_i32_199 : i32 to vector<1x32xi32>
    %558 = arith.cmpi slt, %522, %557 : vector<1x32xi32>
    %559 = arith.andi %556, %558 : vector<1x32xi1>
    %560 = arith.extui %559 : vector<1x32xi1> to vector<1x32xi32>
    %561 = arith.sitofp %560 : vector<1x32xi32> to vector<1x32xf32>
    %562 = vector.broadcast %561 : vector<1x32xf32> to vector<22x32xf32>
    %563 = arith.mulf %513, %562 : vector<22x32xf32>
    %564 = arith.truncf %563 : vector<22x32xf32> to vector<22x32xbf16>
    %565 = arith.truncf %517 : vector<22x32xf32> to vector<22x32xbf16>
    %cst_200 = arith.constant dense<0.000000e+00> : vector<22x22xf32>
    %566 = tpu.matmul %564, %565, %cst_200 {dimension_numbers = #tpu.dot_dimension_numbers<[1], [1], [0], [0], [0, 0, 1, 0], [], []>} : vector<22x32xbf16>, vector<22x32xbf16>, vector<22x22xf32> -> vector<22x22xf32>
    %cst_201 = arith.constant 0.353553385 : f32
    %567 = vector.broadcast %cst_201 : f32 to vector<22x22xf32>
    %568 = arith.mulf %566, %567 : vector<22x22xf32>
    %569 = arith.addf %568, %465 : vector<22x22xf32>
    %cst_202 = arith.constant dense<0xFF800000> : vector<22xf32>
    %570 = vector.multi_reduction <maximumf>, %569, %cst_202 [1] : vector<22x22xf32> to vector<22xf32>
    %571 = vector.shape_cast %570 : vector<22xf32> to vector<22x1xf32>
    %572 = vector.broadcast %571 : vector<22x1xf32> to vector<22x22xf32>
    %573 = arith.subf %569, %572 : vector<22x22xf32>
    %574 = math.exp %573 : vector<22x22xf32>
    %cst_203 = arith.constant dense<0.000000e+00> : vector<22xf32>
    %575 = vector.multi_reduction <add>, %574, %cst_203 [1] : vector<22x22xf32> to vector<22xf32>
    %576 = vector.shape_cast %575 : vector<22xf32> to vector<22x1xf32>
    %577 = tpu.reciprocal %576 {approx = true} : vector<22x1xf32> -> vector<22x1xf32>
    %578 = vector.broadcast %577 : vector<22x1xf32> to vector<22x22xf32>
    %579 = arith.mulf %574, %578 : vector<22x22xf32>
    %580 = vector.broadcast %561 : vector<1x32xf32> to vector<22x32xf32>
    %581 = arith.mulf %521, %580 : vector<22x32xf32>
    %582 = arith.truncf %579 : vector<22x22xf32> to vector<22x22xbf16>
    %583 = arith.truncf %581 : vector<22x32xf32> to vector<22x32xbf16>
    %cst_204 = arith.constant dense<0.000000e+00> : vector<22x32xf32>
    %584 = tpu.matmul %582, %583, %cst_204 {dimension_numbers = #tpu.dot_dimension_numbers<[1], [0], [0], [1], [0, 0, 1, 1], [], []>} : vector<22x22xbf16>, vector<22x32xbf16>, vector<22x32xf32> -> vector<22x32xf32>
    %585 = arith.addf %554, %584 : vector<22x32xf32>
    %c16_i32_205 = arith.constant 16 : i32
    %586 = vector.broadcast %c16_i32_205 : i32 to vector<1x32xi32>
    %587 = arith.cmpi sge, %522, %586 : vector<1x32xi32>
    %c24_i32_206 = arith.constant 24 : i32
    %588 = vector.broadcast %c24_i32_206 : i32 to vector<1x32xi32>
    %589 = arith.cmpi slt, %522, %588 : vector<1x32xi32>
    %590 = arith.andi %587, %589 : vector<1x32xi1>
    %591 = arith.extui %590 : vector<1x32xi1> to vector<1x32xi32>
    %592 = arith.sitofp %591 : vector<1x32xi32> to vector<1x32xf32>
    %593 = vector.broadcast %592 : vector<1x32xf32> to vector<22x32xf32>
    %594 = arith.mulf %513, %593 : vector<22x32xf32>
    %595 = arith.truncf %594 : vector<22x32xf32> to vector<22x32xbf16>
    %596 = arith.truncf %517 : vector<22x32xf32> to vector<22x32xbf16>
    %cst_207 = arith.constant dense<0.000000e+00> : vector<22x22xf32>
    %597 = tpu.matmul %595, %596, %cst_207 {dimension_numbers = #tpu.dot_dimension_numbers<[1], [1], [0], [0], [0, 0, 1, 0], [], []>} : vector<22x32xbf16>, vector<22x32xbf16>, vector<22x22xf32> -> vector<22x22xf32>
    %cst_208 = arith.constant 0.353553385 : f32
    %598 = vector.broadcast %cst_208 : f32 to vector<22x22xf32>
    %599 = arith.mulf %597, %598 : vector<22x22xf32>
    %600 = arith.addf %599, %465 : vector<22x22xf32>
    %cst_209 = arith.constant dense<0xFF800000> : vector<22xf32>
    %601 = vector.multi_reduction <maximumf>, %600, %cst_209 [1] : vector<22x22xf32> to vector<22xf32>
    %602 = vector.shape_cast %601 : vector<22xf32> to vector<22x1xf32>
    %603 = vector.broadcast %602 : vector<22x1xf32> to vector<22x22xf32>
    %604 = arith.subf %600, %603 : vector<22x22xf32>
    %605 = math.exp %604 : vector<22x22xf32>
    %cst_210 = arith.constant dense<0.000000e+00> : vector<22xf32>
    %606 = vector.multi_reduction <add>, %605, %cst_210 [1] : vector<22x22xf32> to vector<22xf32>
    %607 = vector.shape_cast %606 : vector<22xf32> to vector<22x1xf32>
    %608 = tpu.reciprocal %607 {approx = true} : vector<22x1xf32> -> vector<22x1xf32>
    %609 = vector.broadcast %608 : vector<22x1xf32> to vector<22x22xf32>
    %610 = arith.mulf %605, %609 : vector<22x22xf32>
    %611 = vector.broadcast %592 : vector<1x32xf32> to vector<22x32xf32>
    %612 = arith.mulf %521, %611 : vector<22x32xf32>
    %613 = arith.truncf %610 : vector<22x22xf32> to vector<22x22xbf16>
    %614 = arith.truncf %612 : vector<22x32xf32> to vector<22x32xbf16>
    %cst_211 = arith.constant dense<0.000000e+00> : vector<22x32xf32>
    %615 = tpu.matmul %613, %614, %cst_211 {dimension_numbers = #tpu.dot_dimension_numbers<[1], [0], [0], [1], [0, 0, 1, 1], [], []>} : vector<22x22xbf16>, vector<22x32xbf16>, vector<22x32xf32> -> vector<22x32xf32>
    %616 = arith.addf %585, %615 : vector<22x32xf32>
    %c24_i32_212 = arith.constant 24 : i32
    %617 = vector.broadcast %c24_i32_212 : i32 to vector<1x32xi32>
    %618 = arith.cmpi sge, %522, %617 : vector<1x32xi32>
    %c32_i32_213 = arith.constant 32 : i32
    %619 = vector.broadcast %c32_i32_213 : i32 to vector<1x32xi32>
    %620 = arith.cmpi slt, %522, %619 : vector<1x32xi32>
    %621 = arith.andi %618, %620 : vector<1x32xi1>
    %622 = arith.extui %621 : vector<1x32xi1> to vector<1x32xi32>
    %623 = arith.sitofp %622 : vector<1x32xi32> to vector<1x32xf32>
    %624 = vector.broadcast %623 : vector<1x32xf32> to vector<22x32xf32>
    %625 = arith.mulf %513, %624 : vector<22x32xf32>
    %626 = arith.truncf %625 : vector<22x32xf32> to vector<22x32xbf16>
    %627 = arith.truncf %517 : vector<22x32xf32> to vector<22x32xbf16>
    %cst_214 = arith.constant dense<0.000000e+00> : vector<22x22xf32>
    %628 = tpu.matmul %626, %627, %cst_214 {dimension_numbers = #tpu.dot_dimension_numbers<[1], [1], [0], [0], [0, 0, 1, 0], [], []>} : vector<22x32xbf16>, vector<22x32xbf16>, vector<22x22xf32> -> vector<22x22xf32>
    %cst_215 = arith.constant 0.353553385 : f32
    %629 = vector.broadcast %cst_215 : f32 to vector<22x22xf32>
    %630 = arith.mulf %628, %629 : vector<22x22xf32>
    %631 = arith.addf %630, %465 : vector<22x22xf32>
    %cst_216 = arith.constant dense<0xFF800000> : vector<22xf32>
    %632 = vector.multi_reduction <maximumf>, %631, %cst_216 [1] : vector<22x22xf32> to vector<22xf32>
    %633 = vector.shape_cast %632 : vector<22xf32> to vector<22x1xf32>
    %634 = vector.broadcast %633 : vector<22x1xf32> to vector<22x22xf32>
    %635 = arith.subf %631, %634 : vector<22x22xf32>
    %636 = math.exp %635 : vector<22x22xf32>
    %cst_217 = arith.constant dense<0.000000e+00> : vector<22xf32>
    %637 = vector.multi_reduction <add>, %636, %cst_217 [1] : vector<22x22xf32> to vector<22xf32>
    %638 = vector.shape_cast %637 : vector<22xf32> to vector<22x1xf32>
    %639 = tpu.reciprocal %638 {approx = true} : vector<22x1xf32> -> vector<22x1xf32>
    %640 = vector.broadcast %639 : vector<22x1xf32> to vector<22x22xf32>
    %641 = arith.mulf %636, %640 : vector<22x22xf32>
    %642 = vector.broadcast %623 : vector<1x32xf32> to vector<22x32xf32>
    %643 = arith.mulf %521, %642 : vector<22x32xf32>
    %644 = arith.truncf %641 : vector<22x22xf32> to vector<22x22xbf16>
    %645 = arith.truncf %643 : vector<22x32xf32> to vector<22x32xbf16>
    %cst_218 = arith.constant dense<0.000000e+00> : vector<22x32xf32>
    %646 = tpu.matmul %644, %645, %cst_218 {dimension_numbers = #tpu.dot_dimension_numbers<[1], [0], [0], [1], [0, 0, 1, 1], [], []>} : vector<22x22xbf16>, vector<22x32xbf16>, vector<22x32xf32> -> vector<22x32xf32>
    %647 = arith.addf %616, %646 : vector<22x32xf32>
    %648 = arith.truncf %647 : vector<22x32xf32> to vector<22x32xbf16>
    %cst_219 = arith.constant dense<0.000000e+00> : vector<22x32xf32>
    %649 = tpu.matmul %648, %473, %cst_219 {dimension_numbers = #tpu.dot_dimension_numbers<[1], [0], [0], [1], [0, 0, 1, 1], [], []>} : vector<22x32xbf16>, vector<32x32xbf16>, vector<22x32xf32> -> vector<22x32xf32>
    %650 = arith.addf %427, %649 : vector<22x32xf32>
    %651 = vector.broadcast %483 : vector<1x32xf32> to vector<22x32xf32>
    %652 = arith.addf %650, %651 : vector<22x32xf32>
    %cst_220 = arith.constant dense<0.000000e+00> : vector<22xf32>
    %653 = vector.multi_reduction <add>, %652, %cst_220 [1] : vector<22x32xf32> to vector<22xf32>
    %654 = vector.shape_cast %653 : vector<22xf32> to vector<22x1xf32>
    %cst_221 = arith.constant 3.200000e+01 : f32
    %655 = vector.broadcast %cst_221 : f32 to vector<22x1xf32>
    %656 = arith.divf %654, %655 : vector<22x1xf32>
    %657 = vector.broadcast %656 : vector<22x1xf32> to vector<22x32xf32>
    %658 = arith.subf %652, %657 : vector<22x32xf32>
    %659 = arith.mulf %658, %658 : vector<22x32xf32>
    %cst_222 = arith.constant dense<0.000000e+00> : vector<22xf32>
    %660 = vector.multi_reduction <add>, %659, %cst_222 [1] : vector<22x32xf32> to vector<22xf32>
    %661 = vector.shape_cast %660 : vector<22xf32> to vector<22x1xf32>
    %cst_223 = arith.constant 3.200000e+01 : f32
    %662 = vector.broadcast %cst_223 : f32 to vector<22x1xf32>
    %663 = arith.divf %661, %662 : vector<22x1xf32>
    %664 = vector.broadcast %656 : vector<22x1xf32> to vector<22x32xf32>
    %665 = arith.subf %652, %664 : vector<22x32xf32>
    %cst_224 = arith.constant 9.99999974E-6 : f32
    %666 = vector.broadcast %cst_224 : f32 to vector<22x1xf32>
    %667 = arith.addf %663, %666 : vector<22x1xf32>
    %668 = math.rsqrt %667 : vector<22x1xf32>
    %669 = vector.broadcast %668 : vector<22x1xf32> to vector<22x32xf32>
    %670 = arith.mulf %665, %669 : vector<22x32xf32>
    %671 = vector.broadcast %484 : vector<1x32xf32> to vector<22x32xf32>
    %672 = arith.mulf %670, %671 : vector<22x32xf32>
    %673 = vector.broadcast %485 : vector<1x32xf32> to vector<22x32xf32>
    %674 = arith.addf %672, %673 : vector<22x32xf32>
    %675 = arith.truncf %674 : vector<22x32xf32> to vector<22x32xbf16>
    %cst_225 = arith.constant dense<0.000000e+00> : vector<22x64xf32>
    %676 = tpu.matmul %675, %475, %cst_225 {dimension_numbers = #tpu.dot_dimension_numbers<[1], [0], [0], [1], [0, 0, 1, 1], [], []>} : vector<22x32xbf16>, vector<32x64xbf16>, vector<22x64xf32> -> vector<22x64xf32>
    %677 = vector.broadcast %486 : vector<1x64xf32> to vector<22x64xf32>
    %678 = arith.addf %676, %677 : vector<22x64xf32>
    %679 = arith.mulf %678, %678 : vector<22x64xf32>
    %680 = arith.mulf %678, %679 : vector<22x64xf32>
    %cst_226 = arith.constant 4.471500e-02 : f32
    %681 = vector.broadcast %cst_226 : f32 to vector<22x64xf32>
    %682 = arith.mulf %681, %680 : vector<22x64xf32>
    %683 = arith.addf %678, %682 : vector<22x64xf32>
    %cst_227 = arith.constant 0.797884583 : f32
    %684 = vector.broadcast %cst_227 : f32 to vector<22x64xf32>
    %685 = arith.mulf %684, %683 : vector<22x64xf32>
    %686 = math.tanh %685 : vector<22x64xf32>
    %cst_228 = arith.constant 1.000000e+00 : f32
    %687 = vector.broadcast %cst_228 : f32 to vector<22x64xf32>
    %688 = arith.addf %687, %686 : vector<22x64xf32>
    %cst_229 = arith.constant 5.000000e-01 : f32
    %689 = vector.broadcast %cst_229 : f32 to vector<22x64xf32>
    %690 = arith.mulf %689, %688 : vector<22x64xf32>
    %691 = arith.mulf %678, %690 : vector<22x64xf32>
    %692 = arith.truncf %691 : vector<22x64xf32> to vector<22x64xbf16>
    %cst_230 = arith.constant dense<0.000000e+00> : vector<22x32xf32>
    %693 = tpu.matmul %692, %477, %cst_230 {dimension_numbers = #tpu.dot_dimension_numbers<[1], [0], [0], [1], [0, 0, 1, 1], [], []>} : vector<22x64xbf16>, vector<64x32xbf16>, vector<22x32xf32> -> vector<22x32xf32>
    %694 = arith.addf %652, %693 : vector<22x32xf32>
    %695 = vector.broadcast %487 : vector<1x32xf32> to vector<22x32xf32>
    %696 = arith.addf %694, %695 : vector<22x32xf32>
    %c3_231 = arith.constant 3 : index
    %c0_232 = arith.constant 0 : index
    %c0_233 = arith.constant 0 : index
    %697 = vector.load %arg13[%c3_231, %c0_232, %c0_233] : memref<6x32x32xbf16, #tpu.memory_space<vmem>>, vector<1x32x32xbf16>
    %698 = vector.shape_cast %697 : vector<1x32x32xbf16> to vector<32x32xbf16>
    %c4_234 = arith.constant 4 : index
    %c0_235 = arith.constant 0 : index
    %c0_236 = arith.constant 0 : index
    %699 = vector.load %arg13[%c4_234, %c0_235, %c0_236] : memref<6x32x32xbf16, #tpu.memory_space<vmem>>, vector<1x32x32xbf16>
    %700 = vector.shape_cast %699 : vector<1x32x32xbf16> to vector<32x32xbf16>
    %c5_237 = arith.constant 5 : index
    %c0_238 = arith.constant 0 : index
    %c0_239 = arith.constant 0 : index
    %701 = vector.load %arg13[%c5_237, %c0_238, %c0_239] : memref<6x32x32xbf16, #tpu.memory_space<vmem>>, vector<1x32x32xbf16>
    %702 = vector.shape_cast %701 : vector<1x32x32xbf16> to vector<32x32xbf16>
    %c1_240 = arith.constant 1 : index
    %c0_241 = arith.constant 0 : index
    %c0_242 = arith.constant 0 : index
    %703 = vector.load %arg14[%c1_240, %c0_241, %c0_242] : memref<2x32x32xbf16, #tpu.memory_space<vmem>>, vector<1x32x32xbf16>
    %704 = vector.shape_cast %703 : vector<1x32x32xbf16> to vector<32x32xbf16>
    %c1_243 = arith.constant 1 : index
    %c0_244 = arith.constant 0 : index
    %c0_245 = arith.constant 0 : index
    %705 = vector.load %arg15[%c1_243, %c0_244, %c0_245] : memref<2x32x64xbf16, #tpu.memory_space<vmem>>, vector<1x32x64xbf16>
    %706 = vector.shape_cast %705 : vector<1x32x64xbf16> to vector<32x64xbf16>
    %c1_246 = arith.constant 1 : index
    %c0_247 = arith.constant 0 : index
    %c0_248 = arith.constant 0 : index
    %707 = vector.load %arg16[%c1_246, %c0_247, %c0_248] : memref<2x64x32xbf16, #tpu.memory_space<vmem>>, vector<1x64x32xbf16>
    %708 = vector.shape_cast %707 : vector<1x64x32xbf16> to vector<64x32xbf16>
    %c10_249 = arith.constant 10 : index
    %c0_250 = arith.constant 0 : index
    %709 = vector.load %arg18[%c10_249, %c0_250] : memref<23x128xf32, #tpu.memory_space<vmem>>, vector<1x32xf32>
    %c11_251 = arith.constant 11 : index
    %c0_252 = arith.constant 0 : index
    %710 = vector.load %arg18[%c11_251, %c0_252] : memref<23x128xf32, #tpu.memory_space<vmem>>, vector<1x32xf32>
    %c12_253 = arith.constant 12 : index
    %c0_254 = arith.constant 0 : index
    %711 = vector.load %arg18[%c12_253, %c0_254] : memref<23x128xf32, #tpu.memory_space<vmem>>, vector<1x32xf32>
    %c13_255 = arith.constant 13 : index
    %c0_256 = arith.constant 0 : index
    %712 = vector.load %arg18[%c13_255, %c0_256] : memref<23x128xf32, #tpu.memory_space<vmem>>, vector<1x32xf32>
    %c14 = arith.constant 14 : index
    %c0_257 = arith.constant 0 : index
    %713 = vector.load %arg18[%c14, %c0_257] : memref<23x128xf32, #tpu.memory_space<vmem>>, vector<1x32xf32>
    %c15 = arith.constant 15 : index
    %c0_258 = arith.constant 0 : index
    %714 = vector.load %arg18[%c15, %c0_258] : memref<23x128xf32, #tpu.memory_space<vmem>>, vector<1x32xf32>
    %c16 = arith.constant 16 : index
    %c0_259 = arith.constant 0 : index
    %715 = vector.load %arg18[%c16, %c0_259] : memref<23x128xf32, #tpu.memory_space<vmem>>, vector<1x32xf32>
    %c17 = arith.constant 17 : index
    %c0_260 = arith.constant 0 : index
    %716 = vector.load %arg18[%c17, %c0_260] : memref<23x128xf32, #tpu.memory_space<vmem>>, vector<1x32xf32>
    %c18 = arith.constant 18 : index
    %c0_261 = arith.constant 0 : index
    %717 = vector.load %arg18[%c18, %c0_261] : memref<23x128xf32, #tpu.memory_space<vmem>>, vector<1x64xf32>
    %c19 = arith.constant 19 : index
    %c0_262 = arith.constant 0 : index
    %718 = vector.load %arg18[%c19, %c0_262] : memref<23x128xf32, #tpu.memory_space<vmem>>, vector<1x32xf32>
    %cst_263 = arith.constant dense<0.000000e+00> : vector<22xf32>
    %719 = vector.multi_reduction <add>, %696, %cst_263 [1] : vector<22x32xf32> to vector<22xf32>
    %720 = vector.shape_cast %719 : vector<22xf32> to vector<22x1xf32>
    %cst_264 = arith.constant 3.200000e+01 : f32
    %721 = vector.broadcast %cst_264 : f32 to vector<22x1xf32>
    %722 = arith.divf %720, %721 : vector<22x1xf32>
    %723 = vector.broadcast %722 : vector<22x1xf32> to vector<22x32xf32>
    %724 = arith.subf %696, %723 : vector<22x32xf32>
    %725 = arith.mulf %724, %724 : vector<22x32xf32>
    %cst_265 = arith.constant dense<0.000000e+00> : vector<22xf32>
    %726 = vector.multi_reduction <add>, %725, %cst_265 [1] : vector<22x32xf32> to vector<22xf32>
    %727 = vector.shape_cast %726 : vector<22xf32> to vector<22x1xf32>
    %cst_266 = arith.constant 3.200000e+01 : f32
    %728 = vector.broadcast %cst_266 : f32 to vector<22x1xf32>
    %729 = arith.divf %727, %728 : vector<22x1xf32>
    %730 = vector.broadcast %722 : vector<22x1xf32> to vector<22x32xf32>
    %731 = arith.subf %696, %730 : vector<22x32xf32>
    %cst_267 = arith.constant 9.99999974E-6 : f32
    %732 = vector.broadcast %cst_267 : f32 to vector<22x1xf32>
    %733 = arith.addf %729, %732 : vector<22x1xf32>
    %734 = math.rsqrt %733 : vector<22x1xf32>
    %735 = vector.broadcast %734 : vector<22x1xf32> to vector<22x32xf32>
    %736 = arith.mulf %731, %735 : vector<22x32xf32>
    %737 = vector.broadcast %709 : vector<1x32xf32> to vector<22x32xf32>
    %738 = arith.mulf %736, %737 : vector<22x32xf32>
    %739 = vector.broadcast %710 : vector<1x32xf32> to vector<22x32xf32>
    %740 = arith.addf %738, %739 : vector<22x32xf32>
    %741 = arith.truncf %740 : vector<22x32xf32> to vector<22x32xbf16>
    %cst_268 = arith.constant dense<0.000000e+00> : vector<22x32xf32>
    %742 = tpu.matmul %741, %698, %cst_268 {dimension_numbers = #tpu.dot_dimension_numbers<[1], [0], [0], [1], [0, 0, 1, 1], [], []>} : vector<22x32xbf16>, vector<32x32xbf16>, vector<22x32xf32> -> vector<22x32xf32>
    %743 = vector.broadcast %711 : vector<1x32xf32> to vector<22x32xf32>
    %744 = arith.addf %742, %743 : vector<22x32xf32>
    %745 = arith.truncf %740 : vector<22x32xf32> to vector<22x32xbf16>
    %cst_269 = arith.constant dense<0.000000e+00> : vector<22x32xf32>
    %746 = tpu.matmul %745, %700, %cst_269 {dimension_numbers = #tpu.dot_dimension_numbers<[1], [0], [0], [1], [0, 0, 1, 1], [], []>} : vector<22x32xbf16>, vector<32x32xbf16>, vector<22x32xf32> -> vector<22x32xf32>
    %747 = vector.broadcast %712 : vector<1x32xf32> to vector<22x32xf32>
    %748 = arith.addf %746, %747 : vector<22x32xf32>
    %749 = arith.truncf %740 : vector<22x32xf32> to vector<22x32xbf16>
    %cst_270 = arith.constant dense<0.000000e+00> : vector<22x32xf32>
    %750 = tpu.matmul %749, %702, %cst_270 {dimension_numbers = #tpu.dot_dimension_numbers<[1], [0], [0], [1], [0, 0, 1, 1], [], []>} : vector<22x32xbf16>, vector<32x32xbf16>, vector<22x32xf32> -> vector<22x32xf32>
    %751 = vector.broadcast %713 : vector<1x32xf32> to vector<22x32xf32>
    %752 = arith.addf %750, %751 : vector<22x32xf32>
    %753 = tpu.iota {dimensions = array<i32: 1>} : vector<1x32xi32>
    %cst_271 = arith.constant 0.000000e+00 : f32
    %754 = vector.broadcast %cst_271 : f32 to vector<22x32xf32>
    %c0_i32_272 = arith.constant 0 : i32
    %755 = vector.broadcast %c0_i32_272 : i32 to vector<1x32xi32>
    %756 = arith.cmpi sge, %753, %755 : vector<1x32xi32>
    %c8_i32_273 = arith.constant 8 : i32
    %757 = vector.broadcast %c8_i32_273 : i32 to vector<1x32xi32>
    %758 = arith.cmpi slt, %753, %757 : vector<1x32xi32>
    %759 = arith.andi %756, %758 : vector<1x32xi1>
    %760 = arith.extui %759 : vector<1x32xi1> to vector<1x32xi32>
    %761 = arith.sitofp %760 : vector<1x32xi32> to vector<1x32xf32>
    %762 = vector.broadcast %761 : vector<1x32xf32> to vector<22x32xf32>
    %763 = arith.mulf %744, %762 : vector<22x32xf32>
    %764 = arith.truncf %763 : vector<22x32xf32> to vector<22x32xbf16>
    %765 = arith.truncf %748 : vector<22x32xf32> to vector<22x32xbf16>
    %cst_274 = arith.constant dense<0.000000e+00> : vector<22x22xf32>
    %766 = tpu.matmul %764, %765, %cst_274 {dimension_numbers = #tpu.dot_dimension_numbers<[1], [1], [0], [0], [0, 0, 1, 0], [], []>} : vector<22x32xbf16>, vector<22x32xbf16>, vector<22x22xf32> -> vector<22x22xf32>
    %cst_275 = arith.constant 0.353553385 : f32
    %767 = vector.broadcast %cst_275 : f32 to vector<22x22xf32>
    %768 = arith.mulf %766, %767 : vector<22x22xf32>
    %769 = arith.addf %768, %465 : vector<22x22xf32>
    %cst_276 = arith.constant dense<0xFF800000> : vector<22xf32>
    %770 = vector.multi_reduction <maximumf>, %769, %cst_276 [1] : vector<22x22xf32> to vector<22xf32>
    %771 = vector.shape_cast %770 : vector<22xf32> to vector<22x1xf32>
    %772 = vector.broadcast %771 : vector<22x1xf32> to vector<22x22xf32>
    %773 = arith.subf %769, %772 : vector<22x22xf32>
    %774 = math.exp %773 : vector<22x22xf32>
    %cst_277 = arith.constant dense<0.000000e+00> : vector<22xf32>
    %775 = vector.multi_reduction <add>, %774, %cst_277 [1] : vector<22x22xf32> to vector<22xf32>
    %776 = vector.shape_cast %775 : vector<22xf32> to vector<22x1xf32>
    %777 = tpu.reciprocal %776 {approx = true} : vector<22x1xf32> -> vector<22x1xf32>
    %778 = vector.broadcast %777 : vector<22x1xf32> to vector<22x22xf32>
    %779 = arith.mulf %774, %778 : vector<22x22xf32>
    %780 = vector.broadcast %761 : vector<1x32xf32> to vector<22x32xf32>
    %781 = arith.mulf %752, %780 : vector<22x32xf32>
    %782 = arith.truncf %779 : vector<22x22xf32> to vector<22x22xbf16>
    %783 = arith.truncf %781 : vector<22x32xf32> to vector<22x32xbf16>
    %cst_278 = arith.constant dense<0.000000e+00> : vector<22x32xf32>
    %784 = tpu.matmul %782, %783, %cst_278 {dimension_numbers = #tpu.dot_dimension_numbers<[1], [0], [0], [1], [0, 0, 1, 1], [], []>} : vector<22x22xbf16>, vector<22x32xbf16>, vector<22x32xf32> -> vector<22x32xf32>
    %785 = arith.addf %754, %784 : vector<22x32xf32>
    %c8_i32_279 = arith.constant 8 : i32
    %786 = vector.broadcast %c8_i32_279 : i32 to vector<1x32xi32>
    %787 = arith.cmpi sge, %753, %786 : vector<1x32xi32>
    %c16_i32_280 = arith.constant 16 : i32
    %788 = vector.broadcast %c16_i32_280 : i32 to vector<1x32xi32>
    %789 = arith.cmpi slt, %753, %788 : vector<1x32xi32>
    %790 = arith.andi %787, %789 : vector<1x32xi1>
    %791 = arith.extui %790 : vector<1x32xi1> to vector<1x32xi32>
    %792 = arith.sitofp %791 : vector<1x32xi32> to vector<1x32xf32>
    %793 = vector.broadcast %792 : vector<1x32xf32> to vector<22x32xf32>
    %794 = arith.mulf %744, %793 : vector<22x32xf32>
    %795 = arith.truncf %794 : vector<22x32xf32> to vector<22x32xbf16>
    %796 = arith.truncf %748 : vector<22x32xf32> to vector<22x32xbf16>
    %cst_281 = arith.constant dense<0.000000e+00> : vector<22x22xf32>
    %797 = tpu.matmul %795, %796, %cst_281 {dimension_numbers = #tpu.dot_dimension_numbers<[1], [1], [0], [0], [0, 0, 1, 0], [], []>} : vector<22x32xbf16>, vector<22x32xbf16>, vector<22x22xf32> -> vector<22x22xf32>
    %cst_282 = arith.constant 0.353553385 : f32
    %798 = vector.broadcast %cst_282 : f32 to vector<22x22xf32>
    %799 = arith.mulf %797, %798 : vector<22x22xf32>
    %800 = arith.addf %799, %465 : vector<22x22xf32>
    %cst_283 = arith.constant dense<0xFF800000> : vector<22xf32>
    %801 = vector.multi_reduction <maximumf>, %800, %cst_283 [1] : vector<22x22xf32> to vector<22xf32>
    %802 = vector.shape_cast %801 : vector<22xf32> to vector<22x1xf32>
    %803 = vector.broadcast %802 : vector<22x1xf32> to vector<22x22xf32>
    %804 = arith.subf %800, %803 : vector<22x22xf32>
    %805 = math.exp %804 : vector<22x22xf32>
    %cst_284 = arith.constant dense<0.000000e+00> : vector<22xf32>
    %806 = vector.multi_reduction <add>, %805, %cst_284 [1] : vector<22x22xf32> to vector<22xf32>
    %807 = vector.shape_cast %806 : vector<22xf32> to vector<22x1xf32>
    %808 = tpu.reciprocal %807 {approx = true} : vector<22x1xf32> -> vector<22x1xf32>
    %809 = vector.broadcast %808 : vector<22x1xf32> to vector<22x22xf32>
    %810 = arith.mulf %805, %809 : vector<22x22xf32>
    %811 = vector.broadcast %792 : vector<1x32xf32> to vector<22x32xf32>
    %812 = arith.mulf %752, %811 : vector<22x32xf32>
    %813 = arith.truncf %810 : vector<22x22xf32> to vector<22x22xbf16>
    %814 = arith.truncf %812 : vector<22x32xf32> to vector<22x32xbf16>
    %cst_285 = arith.constant dense<0.000000e+00> : vector<22x32xf32>
    %815 = tpu.matmul %813, %814, %cst_285 {dimension_numbers = #tpu.dot_dimension_numbers<[1], [0], [0], [1], [0, 0, 1, 1], [], []>} : vector<22x22xbf16>, vector<22x32xbf16>, vector<22x32xf32> -> vector<22x32xf32>
    %816 = arith.addf %785, %815 : vector<22x32xf32>
    %c16_i32_286 = arith.constant 16 : i32
    %817 = vector.broadcast %c16_i32_286 : i32 to vector<1x32xi32>
    %818 = arith.cmpi sge, %753, %817 : vector<1x32xi32>
    %c24_i32_287 = arith.constant 24 : i32
    %819 = vector.broadcast %c24_i32_287 : i32 to vector<1x32xi32>
    %820 = arith.cmpi slt, %753, %819 : vector<1x32xi32>
    %821 = arith.andi %818, %820 : vector<1x32xi1>
    %822 = arith.extui %821 : vector<1x32xi1> to vector<1x32xi32>
    %823 = arith.sitofp %822 : vector<1x32xi32> to vector<1x32xf32>
    %824 = vector.broadcast %823 : vector<1x32xf32> to vector<22x32xf32>
    %825 = arith.mulf %744, %824 : vector<22x32xf32>
    %826 = arith.truncf %825 : vector<22x32xf32> to vector<22x32xbf16>
    %827 = arith.truncf %748 : vector<22x32xf32> to vector<22x32xbf16>
    %cst_288 = arith.constant dense<0.000000e+00> : vector<22x22xf32>
    %828 = tpu.matmul %826, %827, %cst_288 {dimension_numbers = #tpu.dot_dimension_numbers<[1], [1], [0], [0], [0, 0, 1, 0], [], []>} : vector<22x32xbf16>, vector<22x32xbf16>, vector<22x22xf32> -> vector<22x22xf32>
    %cst_289 = arith.constant 0.353553385 : f32
    %829 = vector.broadcast %cst_289 : f32 to vector<22x22xf32>
    %830 = arith.mulf %828, %829 : vector<22x22xf32>
    %831 = arith.addf %830, %465 : vector<22x22xf32>
    %cst_290 = arith.constant dense<0xFF800000> : vector<22xf32>
    %832 = vector.multi_reduction <maximumf>, %831, %cst_290 [1] : vector<22x22xf32> to vector<22xf32>
    %833 = vector.shape_cast %832 : vector<22xf32> to vector<22x1xf32>
    %834 = vector.broadcast %833 : vector<22x1xf32> to vector<22x22xf32>
    %835 = arith.subf %831, %834 : vector<22x22xf32>
    %836 = math.exp %835 : vector<22x22xf32>
    %cst_291 = arith.constant dense<0.000000e+00> : vector<22xf32>
    %837 = vector.multi_reduction <add>, %836, %cst_291 [1] : vector<22x22xf32> to vector<22xf32>
    %838 = vector.shape_cast %837 : vector<22xf32> to vector<22x1xf32>
    %839 = tpu.reciprocal %838 {approx = true} : vector<22x1xf32> -> vector<22x1xf32>
    %840 = vector.broadcast %839 : vector<22x1xf32> to vector<22x22xf32>
    %841 = arith.mulf %836, %840 : vector<22x22xf32>
    %842 = vector.broadcast %823 : vector<1x32xf32> to vector<22x32xf32>
    %843 = arith.mulf %752, %842 : vector<22x32xf32>
    %844 = arith.truncf %841 : vector<22x22xf32> to vector<22x22xbf16>
    %845 = arith.truncf %843 : vector<22x32xf32> to vector<22x32xbf16>
    %cst_292 = arith.constant dense<0.000000e+00> : vector<22x32xf32>
    %846 = tpu.matmul %844, %845, %cst_292 {dimension_numbers = #tpu.dot_dimension_numbers<[1], [0], [0], [1], [0, 0, 1, 1], [], []>} : vector<22x22xbf16>, vector<22x32xbf16>, vector<22x32xf32> -> vector<22x32xf32>
    %847 = arith.addf %816, %846 : vector<22x32xf32>
    %c24_i32_293 = arith.constant 24 : i32
    %848 = vector.broadcast %c24_i32_293 : i32 to vector<1x32xi32>
    %849 = arith.cmpi sge, %753, %848 : vector<1x32xi32>
    %c32_i32_294 = arith.constant 32 : i32
    %850 = vector.broadcast %c32_i32_294 : i32 to vector<1x32xi32>
    %851 = arith.cmpi slt, %753, %850 : vector<1x32xi32>
    %852 = arith.andi %849, %851 : vector<1x32xi1>
    %853 = arith.extui %852 : vector<1x32xi1> to vector<1x32xi32>
    %854 = arith.sitofp %853 : vector<1x32xi32> to vector<1x32xf32>
    %855 = vector.broadcast %854 : vector<1x32xf32> to vector<22x32xf32>
    %856 = arith.mulf %744, %855 : vector<22x32xf32>
    %857 = arith.truncf %856 : vector<22x32xf32> to vector<22x32xbf16>
    %858 = arith.truncf %748 : vector<22x32xf32> to vector<22x32xbf16>
    %cst_295 = arith.constant dense<0.000000e+00> : vector<22x22xf32>
    %859 = tpu.matmul %857, %858, %cst_295 {dimension_numbers = #tpu.dot_dimension_numbers<[1], [1], [0], [0], [0, 0, 1, 0], [], []>} : vector<22x32xbf16>, vector<22x32xbf16>, vector<22x22xf32> -> vector<22x22xf32>
    %cst_296 = arith.constant 0.353553385 : f32
    %860 = vector.broadcast %cst_296 : f32 to vector<22x22xf32>
    %861 = arith.mulf %859, %860 : vector<22x22xf32>
    %862 = arith.addf %861, %465 : vector<22x22xf32>
    %cst_297 = arith.constant dense<0xFF800000> : vector<22xf32>
    %863 = vector.multi_reduction <maximumf>, %862, %cst_297 [1] : vector<22x22xf32> to vector<22xf32>
    %864 = vector.shape_cast %863 : vector<22xf32> to vector<22x1xf32>
    %865 = vector.broadcast %864 : vector<22x1xf32> to vector<22x22xf32>
    %866 = arith.subf %862, %865 : vector<22x22xf32>
    %867 = math.exp %866 : vector<22x22xf32>
    %cst_298 = arith.constant dense<0.000000e+00> : vector<22xf32>
    %868 = vector.multi_reduction <add>, %867, %cst_298 [1] : vector<22x22xf32> to vector<22xf32>
    %869 = vector.shape_cast %868 : vector<22xf32> to vector<22x1xf32>
    %870 = tpu.reciprocal %869 {approx = true} : vector<22x1xf32> -> vector<22x1xf32>
    %871 = vector.broadcast %870 : vector<22x1xf32> to vector<22x22xf32>
    %872 = arith.mulf %867, %871 : vector<22x22xf32>
    %873 = vector.broadcast %854 : vector<1x32xf32> to vector<22x32xf32>
    %874 = arith.mulf %752, %873 : vector<22x32xf32>
    %875 = arith.truncf %872 : vector<22x22xf32> to vector<22x22xbf16>
    %876 = arith.truncf %874 : vector<22x32xf32> to vector<22x32xbf16>
    %cst_299 = arith.constant dense<0.000000e+00> : vector<22x32xf32>
    %877 = tpu.matmul %875, %876, %cst_299 {dimension_numbers = #tpu.dot_dimension_numbers<[1], [0], [0], [1], [0, 0, 1, 1], [], []>} : vector<22x22xbf16>, vector<22x32xbf16>, vector<22x32xf32> -> vector<22x32xf32>
    %878 = arith.addf %847, %877 : vector<22x32xf32>
    %879 = arith.truncf %878 : vector<22x32xf32> to vector<22x32xbf16>
    %cst_300 = arith.constant dense<0.000000e+00> : vector<22x32xf32>
    %880 = tpu.matmul %879, %704, %cst_300 {dimension_numbers = #tpu.dot_dimension_numbers<[1], [0], [0], [1], [0, 0, 1, 1], [], []>} : vector<22x32xbf16>, vector<32x32xbf16>, vector<22x32xf32> -> vector<22x32xf32>
    %881 = arith.addf %696, %880 : vector<22x32xf32>
    %882 = vector.broadcast %714 : vector<1x32xf32> to vector<22x32xf32>
    %883 = arith.addf %881, %882 : vector<22x32xf32>
    %cst_301 = arith.constant dense<0.000000e+00> : vector<22xf32>
    %884 = vector.multi_reduction <add>, %883, %cst_301 [1] : vector<22x32xf32> to vector<22xf32>
    %885 = vector.shape_cast %884 : vector<22xf32> to vector<22x1xf32>
    %cst_302 = arith.constant 3.200000e+01 : f32
    %886 = vector.broadcast %cst_302 : f32 to vector<22x1xf32>
    %887 = arith.divf %885, %886 : vector<22x1xf32>
    %888 = vector.broadcast %887 : vector<22x1xf32> to vector<22x32xf32>
    %889 = arith.subf %883, %888 : vector<22x32xf32>
    %890 = arith.mulf %889, %889 : vector<22x32xf32>
    %cst_303 = arith.constant dense<0.000000e+00> : vector<22xf32>
    %891 = vector.multi_reduction <add>, %890, %cst_303 [1] : vector<22x32xf32> to vector<22xf32>
    %892 = vector.shape_cast %891 : vector<22xf32> to vector<22x1xf32>
    %cst_304 = arith.constant 3.200000e+01 : f32
    %893 = vector.broadcast %cst_304 : f32 to vector<22x1xf32>
    %894 = arith.divf %892, %893 : vector<22x1xf32>
    %895 = vector.broadcast %887 : vector<22x1xf32> to vector<22x32xf32>
    %896 = arith.subf %883, %895 : vector<22x32xf32>
    %cst_305 = arith.constant 9.99999974E-6 : f32
    %897 = vector.broadcast %cst_305 : f32 to vector<22x1xf32>
    %898 = arith.addf %894, %897 : vector<22x1xf32>
    %899 = math.rsqrt %898 : vector<22x1xf32>
    %900 = vector.broadcast %899 : vector<22x1xf32> to vector<22x32xf32>
    %901 = arith.mulf %896, %900 : vector<22x32xf32>
    %902 = vector.broadcast %715 : vector<1x32xf32> to vector<22x32xf32>
    %903 = arith.mulf %901, %902 : vector<22x32xf32>
    %904 = vector.broadcast %716 : vector<1x32xf32> to vector<22x32xf32>
    %905 = arith.addf %903, %904 : vector<22x32xf32>
    %906 = arith.truncf %905 : vector<22x32xf32> to vector<22x32xbf16>
    %cst_306 = arith.constant dense<0.000000e+00> : vector<22x64xf32>
    %907 = tpu.matmul %906, %706, %cst_306 {dimension_numbers = #tpu.dot_dimension_numbers<[1], [0], [0], [1], [0, 0, 1, 1], [], []>} : vector<22x32xbf16>, vector<32x64xbf16>, vector<22x64xf32> -> vector<22x64xf32>
    %908 = vector.broadcast %717 : vector<1x64xf32> to vector<22x64xf32>
    %909 = arith.addf %907, %908 : vector<22x64xf32>
    %910 = arith.mulf %909, %909 : vector<22x64xf32>
    %911 = arith.mulf %909, %910 : vector<22x64xf32>
    %cst_307 = arith.constant 4.471500e-02 : f32
    %912 = vector.broadcast %cst_307 : f32 to vector<22x64xf32>
    %913 = arith.mulf %912, %911 : vector<22x64xf32>
    %914 = arith.addf %909, %913 : vector<22x64xf32>
    %cst_308 = arith.constant 0.797884583 : f32
    %915 = vector.broadcast %cst_308 : f32 to vector<22x64xf32>
    %916 = arith.mulf %915, %914 : vector<22x64xf32>
    %917 = math.tanh %916 : vector<22x64xf32>
    %cst_309 = arith.constant 1.000000e+00 : f32
    %918 = vector.broadcast %cst_309 : f32 to vector<22x64xf32>
    %919 = arith.addf %918, %917 : vector<22x64xf32>
    %cst_310 = arith.constant 5.000000e-01 : f32
    %920 = vector.broadcast %cst_310 : f32 to vector<22x64xf32>
    %921 = arith.mulf %920, %919 : vector<22x64xf32>
    %922 = arith.mulf %909, %921 : vector<22x64xf32>
    %923 = arith.truncf %922 : vector<22x64xf32> to vector<22x64xbf16>
    %cst_311 = arith.constant dense<0.000000e+00> : vector<22x32xf32>
    %924 = tpu.matmul %923, %708, %cst_311 {dimension_numbers = #tpu.dot_dimension_numbers<[1], [0], [0], [1], [0, 0, 1, 1], [], []>} : vector<22x64xbf16>, vector<64x32xbf16>, vector<22x32xf32> -> vector<22x32xf32>
    %925 = arith.addf %883, %924 : vector<22x32xf32>
    %926 = vector.broadcast %718 : vector<1x32xf32> to vector<22x32xf32>
    %927 = arith.addf %925, %926 : vector<22x32xf32>
    %c20 = arith.constant 20 : index
    %c0_312 = arith.constant 0 : index
    %928 = vector.load %arg18[%c20, %c0_312] : memref<23x128xf32, #tpu.memory_space<vmem>>, vector<1x32xf32>
    %c21 = arith.constant 21 : index
    %c0_313 = arith.constant 0 : index
    %929 = vector.load %arg18[%c21, %c0_313] : memref<23x128xf32, #tpu.memory_space<vmem>>, vector<1x32xf32>
    %cst_314 = arith.constant dense<0.000000e+00> : vector<22xf32>
    %930 = vector.multi_reduction <add>, %927, %cst_314 [1] : vector<22x32xf32> to vector<22xf32>
    %931 = vector.shape_cast %930 : vector<22xf32> to vector<22x1xf32>
    %cst_315 = arith.constant 3.200000e+01 : f32
    %932 = vector.broadcast %cst_315 : f32 to vector<22x1xf32>
    %933 = arith.divf %931, %932 : vector<22x1xf32>
    %934 = vector.broadcast %933 : vector<22x1xf32> to vector<22x32xf32>
    %935 = arith.subf %927, %934 : vector<22x32xf32>
    %936 = arith.mulf %935, %935 : vector<22x32xf32>
    %cst_316 = arith.constant dense<0.000000e+00> : vector<22xf32>
    %937 = vector.multi_reduction <add>, %936, %cst_316 [1] : vector<22x32xf32> to vector<22xf32>
    %938 = vector.shape_cast %937 : vector<22xf32> to vector<22x1xf32>
    %cst_317 = arith.constant 3.200000e+01 : f32
    %939 = vector.broadcast %cst_317 : f32 to vector<22x1xf32>
    %940 = arith.divf %938, %939 : vector<22x1xf32>
    %941 = vector.broadcast %933 : vector<22x1xf32> to vector<22x32xf32>
    %942 = arith.subf %927, %941 : vector<22x32xf32>
    %cst_318 = arith.constant 9.99999974E-6 : f32
    %943 = vector.broadcast %cst_318 : f32 to vector<22x1xf32>
    %944 = arith.addf %940, %943 : vector<22x1xf32>
    %945 = math.rsqrt %944 : vector<22x1xf32>
    %946 = vector.broadcast %945 : vector<22x1xf32> to vector<22x32xf32>
    %947 = arith.mulf %942, %946 : vector<22x32xf32>
    %948 = vector.broadcast %928 : vector<1x32xf32> to vector<22x32xf32>
    %949 = arith.mulf %947, %948 : vector<22x32xf32>
    %950 = vector.broadcast %929 : vector<1x32xf32> to vector<22x32xf32>
    %951 = arith.addf %949, %950 : vector<22x32xf32>
    %c0_319 = arith.constant 0 : index
    %c0_320 = arith.constant 0 : index
    %952 = vector.load %arg17[%c0_319, %c0_320] : memref<32x128xbf16, #tpu.memory_space<vmem>>, vector<32x128xbf16>
    %953 = arith.truncf %951 : vector<22x32xf32> to vector<22x32xbf16>
    %cst_321 = arith.constant dense<0.000000e+00> : vector<22x128xf32>
    %954 = tpu.matmul %953, %952, %cst_321 {dimension_numbers = #tpu.dot_dimension_numbers<[1], [0], [0], [1], [0, 0, 1, 1], [], []>} : vector<22x32xbf16>, vector<32x128xbf16>, vector<22x128xf32> -> vector<22x128xf32>
    %c22 = arith.constant 22 : index
    %c0_322 = arith.constant 0 : index
    %955 = vector.load %arg18[%c22, %c0_322] : memref<23x128xf32, #tpu.memory_space<vmem>>, vector<1x128xf32>
    %956 = vector.broadcast %955 : vector<1x128xf32> to vector<22x128xf32>
    %957 = arith.addf %954, %956 : vector<22x128xf32>
    %c0_323 = arith.constant 0 : index
    %c0_324 = arith.constant 0 : index
    %958 = vector.load %arg19[%c0_323, %c0_324] : memref<22x128xf32, #tpu.memory_space<vmem>>, vector<22x128xf32>
    tpu.vector_store %arg19[%c0_323, %c0_324], %957 {strides = array<i32>} : memref<22x128xf32, #tpu.memory_space<vmem>>, vector<22x128xf32>,
    %c0_325 = arith.constant 0 : index
    %c0_326 = arith.constant 0 : index
    %959 = vector.load %arg5[%c0_325, %c0_326] : memref<22x1xi32, #tpu.memory_space<vmem>>, vector<22x1xi32>
    %960 = tpu.iota {dimensions = array<i32: 1>} : vector<22x128xi32>
    %c64_i32 = arith.constant 64 : i32
    %961 = vector.broadcast %c64_i32 : i32 to vector<22x128xi32>
    %962 = arith.cmpi slt, %960, %961 : vector<22x128xi32>
    %cst_327 = arith.constant -1.000000e+09 : f32
    %963 = vector.broadcast %cst_327 : f32 to vector<22x128xf32>
    %964 = arith.select %962, %957, %963 : vector<22x128xi1>, vector<22x128xf32>
    %cst_328 = arith.constant dense<0xFF800000> : vector<22xf32>
    %965 = vector.multi_reduction <maximumf>, %964, %cst_328 [1] : vector<22x128xf32> to vector<22xf32>
    %966 = vector.shape_cast %965 : vector<22xf32> to vector<22x1xf32>
    %967 = vector.broadcast %966 : vector<22x1xf32> to vector<22x128xf32>
    %968 = arith.subf %964, %967 : vector<22x128xf32>
    %969 = math.exp %968 : vector<22x128xf32>
    %cst_329 = arith.constant dense<0.000000e+00> : vector<22xf32>
    %970 = vector.multi_reduction <add>, %969, %cst_329 [1] : vector<22x128xf32> to vector<22xf32>
    %971 = vector.shape_cast %970 : vector<22xf32> to vector<22x1xf32>
    %972 = math.log %971 : vector<22x1xf32>
    %973 = arith.addf %972, %966 : vector<22x1xf32>
    %974 = vector.broadcast %959 : vector<22x1xi32> to vector<22x128xi32>
    %975 = arith.cmpi eq, %960, %974 : vector<22x128xi32>
    %cst_330 = arith.constant 0.000000e+00 : f32
    %976 = vector.broadcast %cst_330 : f32 to vector<22x128xf32>
    %977 = arith.select %975, %957, %976 : vector<22x128xi1>, vector<22x128xf32>
    %cst_331 = arith.constant dense<0.000000e+00> : vector<22xf32>
    %978 = vector.multi_reduction <add>, %977, %cst_331 [1] : vector<22x128xf32> to vector<22xf32>
    %979 = vector.shape_cast %978 : vector<22xf32> to vector<22x1xf32>
    %c-100_i32 = arith.constant -100 : i32
    %980 = vector.broadcast %c-100_i32 : i32 to vector<22x1xi32>
    %981 = arith.cmpi ne, %959, %980 : vector<22x1xi32>
    %982 = arith.extui %981 : vector<22x1xi1> to vector<22x1xi32>
    %983 = arith.sitofp %982 : vector<22x1xi32> to vector<22x1xf32>
    %984 = arith.subf %973, %979 : vector<22x1xf32>
    %985 = arith.mulf %984, %983 : vector<22x1xf32>
    %986 = vector.shape_cast %985 : vector<22x1xf32> to vector<1x22x1xf32>
    %cst_332 = arith.constant dense<0.000000e+00> : vector<1xf32>
    %987 = vector.multi_reduction <add>, %986, %cst_332 [1, 2] : vector<1x22x1xf32> to vector<1xf32>
    %988 = vector.shape_cast %987 : vector<1xf32> to vector<1x1x1xf32>
    %989 = vector.extract %988[0, 0, 0] : f32 from vector<1x1x1xf32>
    %990 = vector.shape_cast %983 : vector<22x1xf32> to vector<1x22x1xf32>
    %cst_333 = arith.constant dense<0.000000e+00> : vector<1xf32>
    %991 = vector.multi_reduction <add>, %990, %cst_333 [1, 2] : vector<1x22x1xf32> to vector<1xf32>
    %992 = vector.shape_cast %991 : vector<1xf32> to vector<1x1x1xf32>
    %993 = vector.extract %992[0, 0, 0] : f32 from vector<1x1x1xf32>
    %994 = tpu.iota {dimensions = array<i32: 1>} : vector<1x128xi32>
    %c0_i32_334 = arith.constant 0 : i32
    %995 = vector.broadcast %c0_i32_334 : i32 to vector<1x128xi32>
    %996 = arith.cmpi eq, %994, %995 : vector<1x128xi32>
    %cst_335 = arith.constant 0.000000e+00 : f32
    %997 = vector.broadcast %989 : f32 to vector<1x128xf32>
    %998 = vector.broadcast %cst_335 : f32 to vector<1x128xf32>
    %999 = arith.select %996, %997, %998 : vector<1x128xi1>, vector<1x128xf32>
    %c1_i32 = arith.constant 1 : i32
    %1000 = vector.broadcast %c1_i32 : i32 to vector<1x128xi32>
    %1001 = arith.cmpi eq, %994, %1000 : vector<1x128xi32>
    %cst_336 = arith.constant 0.000000e+00 : f32
    %1002 = vector.broadcast %993 : f32 to vector<1x128xf32>
    %1003 = vector.broadcast %cst_336 : f32 to vector<1x128xf32>
    %1004 = arith.select %1001, %1002, %1003 : vector<1x128xi1>, vector<1x128xf32>
    %1005 = arith.addf %999, %1004 : vector<1x128xf32>
    %c0_337 = arith.constant 0 : index
    %c0_338 = arith.constant 0 : index
    %1006 = vector.load %arg20[%c0_337, %c0_338] : memref<1x128xf32, #tpu.memory_space<vmem>>, vector<1x128xf32>
    tpu.vector_store %arg20[%c0_337, %c0_338], %1005 {strides = array<i32>} : memref<1x128xf32, #tpu.memory_space<vmem>>, vector<1x128xf32>,
    return
  }
  func.func @transform_0(%arg0: i32, %arg1: memref<2xi32, #tpu.memory_space<smem>>) -> (i32, i32) {
    %c0_i32 = arith.constant 0 : i32
    %c0_i32_0 = arith.constant 0 : i32
    %c0_i32_1 = arith.constant 0 : i32
    return %c0_i32, %c0_i32_0 : i32, i32
  }
  func.func @transform_1(%arg0: i32, %arg1: memref<2xi32, #tpu.memory_space<smem>>) -> (i32, i32) {
    %c0_i32 = arith.constant 0 : i32
    %c0_i32_0 = arith.constant 0 : i32
    %c0_i32_1 = arith.constant 0 : i32
    return %c0_i32, %c0_i32_0 : i32, i32
  }
  func.func @transform_2(%arg0: i32, %arg1: memref<2xi32, #tpu.memory_space<smem>>) -> (i32, i32) {
    %c0_i32 = arith.constant 0 : i32
    %c0_i32_0 = arith.constant 0 : i32
    %c0_i32_1 = arith.constant 0 : i32
    return %c0_i32, %c0_i32_0 : i32, i32
  }
  func.func @transform_3(%arg0: i32, %arg1: memref<2xi32, #tpu.memory_space<smem>>) -> (i32, i32) {
    %c0_i32 = arith.constant 0 : i32
    %c0_i32_0 = arith.constant 0 : i32
    %c0_i32_1 = arith.constant 0 : i32
    return %c0_i32, %c0_i32_0 : i32, i32
  }
  func.func @transform_4(%arg0: i32, %arg1: memref<2xi32, #tpu.memory_space<smem>>) -> (i32, i32) {
    %c0_i32 = arith.constant 0 : i32
    %c0_i32_0 = arith.constant 0 : i32
    %c0_i32_1 = arith.constant 0 : i32
    return %c0_i32, %c0_i32_0 : i32, i32
  }
  func.func @transform_5(%arg0: i32, %arg1: memref<2xi32, #tpu.memory_space<smem>>) -> (i32, i32, i32) {
    %c0_i32 = arith.constant 0 : i32
    %c0_i32_0 = arith.constant 0 : i32
    %c0_i32_1 = arith.constant 0 : i32
    %c0_i32_2 = arith.constant 0 : i32
    return %c0_i32, %c0_i32_0, %c0_i32_1 : i32, i32, i32
  }
  func.func @transform_6(%arg0: i32, %arg1: memref<2xi32, #tpu.memory_space<smem>>) -> (i32, i32) {
    %c0_i32 = arith.constant 0 : i32
    %c0_i32_0 = arith.constant 0 : i32
    %c0_i32_1 = arith.constant 0 : i32
    return %c0_i32, %c0_i32_0 : i32, i32
  }
  func.func @transform_7(%arg0: i32, %arg1: memref<2xi32, #tpu.memory_space<smem>>) -> (i32, i32) {
    %c0_i32 = arith.constant 0 : i32
    %c0_i32_0 = arith.constant 0 : i32
    %c0_i32_1 = arith.constant 0 : i32
    return %c0_i32, %c0_i32_0 : i32, i32
  }
  func.func @transform_8(%arg0: i32, %arg1: memref<2xi32, #tpu.memory_space<smem>>) -> (i32, i32) {
    %c0_i32 = arith.constant 0 : i32
    %c0_i32_0 = arith.constant 0 : i32
    %c0_i32_1 = arith.constant 0 : i32
    return %c0_i32, %c0_i32_0 : i32, i32
  }
  func.func @transform_9(%arg0: i32, %arg1: memref<2xi32, #tpu.memory_space<smem>>) -> (i32, i32) {
    %c0_i32 = arith.constant 0 : i32
    %c0_i32_0 = arith.constant 0 : i32
    %c0_i32_1 = arith.constant 0 : i32
    return %c0_i32, %c0_i32_0 : i32, i32
  }
  func.func @transform_10(%arg0: i32, %arg1: memref<2xi32, #tpu.memory_space<smem>>) -> (i32, i32) {
    %c0_i32 = arith.constant 0 : i32
    %c0_i32_0 = arith.constant 0 : i32
    %c0_i32_1 = arith.constant 0 : i32
    return %c0_i32, %c0_i32_0 : i32, i32
  }
  func.func @transform_11(%arg0: i32, %arg1: memref<2xi32, #tpu.memory_space<smem>>) -> (i32, i32, i32) {
    %c0_i32 = arith.constant 0 : i32
    %c0_i32_0 = arith.constant 0 : i32
    %c0_i32_1 = arith.constant 0 : i32
    %c0_i32_2 = arith.constant 0 : i32
    return %c0_i32, %c0_i32_0, %c0_i32_1 : i32, i32, i32
  }
  func.func @transform_12(%arg0: i32, %arg1: memref<2xi32, #tpu.memory_space<smem>>) -> (i32, i32, i32) {
    %c0_i32 = arith.constant 0 : i32
    %c0_i32_0 = arith.constant 0 : i32
    %c0_i32_1 = arith.constant 0 : i32
    %c0_i32_2 = arith.constant 0 : i32
    return %c0_i32, %c0_i32_0, %c0_i32_1 : i32, i32, i32
  }
  func.func @transform_13(%arg0: i32, %arg1: memref<2xi32, #tpu.memory_space<smem>>) -> (i32, i32, i32) {
    %c0_i32 = arith.constant 0 : i32
    %c0_i32_0 = arith.constant 0 : i32
    %c0_i32_1 = arith.constant 0 : i32
    %c0_i32_2 = arith.constant 0 : i32
    return %c0_i32, %c0_i32_0, %c0_i32_1 : i32, i32, i32
  }
  func.func @transform_14(%arg0: i32, %arg1: memref<2xi32, #tpu.memory_space<smem>>) -> (i32, i32, i32) {
    %c0_i32 = arith.constant 0 : i32
    %c0_i32_0 = arith.constant 0 : i32
    %c0_i32_1 = arith.constant 0 : i32
    %c0_i32_2 = arith.constant 0 : i32
    return %c0_i32, %c0_i32_0, %c0_i32_1 : i32, i32, i32
  }
  func.func @transform_15(%arg0: i32, %arg1: memref<2xi32, #tpu.memory_space<smem>>) -> (i32, i32) {
    %c0_i32 = arith.constant 0 : i32
    %c0_i32_0 = arith.constant 0 : i32
    %c0_i32_1 = arith.constant 0 : i32
    return %c0_i32, %c0_i32_0 : i32, i32
  }
  func.func @transform_16(%arg0: i32, %arg1: memref<2xi32, #tpu.memory_space<smem>>) -> (i32, i32) {
    %c0_i32 = arith.constant 0 : i32
    %c0_i32_0 = arith.constant 0 : i32
    %c0_i32_1 = arith.constant 0 : i32
    return %c0_i32, %c0_i32_0 : i32, i32
  }
  func.func @transform_17(%arg0: i32, %arg1: memref<2xi32, #tpu.memory_space<smem>>) -> (i32, i32) {
    %c0_i32 = arith.constant 0 : i32
    %c0_i32_0 = arith.constant 0 : i32
    %c0_i32_1 = arith.constant 0 : i32
    return %c0_i32, %c0_i32_0 : i32, i32
  }
  func.func @transform_18(%arg0: i32, %arg1: memref<2xi32, #tpu.memory_space<smem>>) -> (i32, i32) {
    %c0_i32 = arith.constant 0 : i32
    %c0_i32_0 = arith.constant 0 : i32
    %c0_i32_1 = arith.constant 0 : i32
    return %c0_i32, %c0_i32_0 : i32, i32
  }
}

</mosaic_0001>

<bundles_post_ra>
// kernel: alm_forward.1
= control target key start
LH: loop header
LB: loop body
LE: loop exit
PB: predicated region body
PF: predicated region fallthrough
CT: control target
= control target key end

     0   :  { %s6750_s0 = inlined_call_operand.vmem [shape: s32[2], index: 0, kind: input, shape index: {}]   ;;  %s6751_s1 = inlined_call_operand.vmem [shape: f32[8,16], index: 1, kind: input, shape index: {}]   ;;  %s6752_s2 = inlined_call_operand.vmem [shape: f32[16,32], index: 2, kind: input, shape index: {}]   ;;  %s6753_s3 = inlined_call_operand.vmem [shape: f32[1,22], index: 3, kind: input, shape index: {}]   ;;  %s6754_s4 = inlined_call_operand.vmem [shape: s32[22,1], index: 4, kind: input, shape index: {}]   ;;  %s6755_s5 = inlined_call_operand.vmem [shape: bf16[16,32], index: 5, kind: input, shape index: {}]   ;;  %s6756_s6 = inlined_call_operand.vmem [shape: bf16[3,32,32], index: 6, kind: input, shape index: {}]   ;;  %s6757_s7 = inlined_call_operand.vmem [shape: bf16[32,32], index: 7, kind: input, shape index: {}]   ;;  %s6758_s8 = inlined_call_operand.vmem [shape: bf16[32,64], index: 8, kind: input, shape index: {}]   ;;  %s6759_s9 = inlined_call_operand.vmem [shape: bf16[64,32], index: 9, kind: input, shape index: {}]   ;;  %s6760_s10 = inlined_call_operand.vmem [shape: bf16[32,32], index: 10, kind: input, shape index: {}]   ;;  %s6761_s11 = inlined_call_operand.vmem [shape: f32[14,128], index: 11, kind: input, shape index: {}]   ;;  %s6762_s12 = inlined_call_operand.vmem [shape: bf16[6,32,32], index: 12, kind: input, shape index: {}]   ;;  %s6763_s13 = inlined_call_operand.vmem [shape: bf16[2,32,32], index: 13, kind: input, shape index: {}]   ;;  %s6764_s14 = inlined_call_operand.vmem [shape: bf16[2,32,64], index: 14, kind: input, shape index: {}]   ;;  %s6765_s15 = inlined_call_operand.vmem [shape: bf16[2,64,32], index: 15, kind: input, shape index: {}]   ;;  %s6766_s16 = inlined_call_operand.vmem [shape: bf16[32,128], index: 16, kind: input, shape index: {}]   ;;  %s6767_s17 = inlined_call_operand.vmem [shape: f32[23,128], index: 17, kind: input, shape index: {}]   ;;  %s6768_s18 = inlined_call_operand.vmem [shape: f32[22,128], index: 18, kind: output, shape index: {0}]   ;;  %s6769_s19 = inlined_call_operand.vmem [shape: f32[1,128], index: 19, kind: output, shape index: {1}]  }
   0x1   :  { %6790 = sst [smem:[#allocation5_spill]] %s6750_s0 }
   0x2   :  { %6791 = sst [smem:[#allocation6_spill]] %s6751_s1 }
   0x3   :  { %6792 = sst [smem:[#allocation7_spill]] %s6752_s2 }
   0x4   :  { %6793 = sst [smem:[#allocation8_spill]] %s6753_s3 }
   0x5   :  { %6794 = sst [smem:[#allocation9_spill]] %s6754_s4 }
   0x6   :  { %s6795_s20 = sld [smem:[#allocation5_spill]] }
   0xc   :  { %s25_s4 = sshll.u32 %s6795_s20, 4  ;;  %s26_s4 = int_to_ptr.vmem [resolvable:$true] %s25_s4 }
   0xd   :  { %s5417_s21 = scalar_lea.vmem %s26_s4, 16  ;;  %p5422_p1 = scmp.lt.s32.totalorder %s26_s4, %s26_s4 }
   0xe   :  { %p5418_p0 = scmp.ne.s32.totalorder %s26_s4, %s5417_s21  ;;  %p5423_p2 = scmp.lt.s32.totalorder %s5417_s21, %s5417_s21 }
  0x10   :  { %p5424_p3 = por %p5423_p2, %p5422_p1 }
  0x12   :  { %p5425_p4 = pnand %p5424_p3, %p5418_p0 }
  0x14   :  { %5428 = shalt.err (!%p5425_p4)  }
  0x15   :  { %s5431_s1 = smov [#allocation3]  }
  0x16   :  { %28 = dma.vmem_to_smem %s26_s4, 16, %s5431_s1, [#allocation2] }
  0x17   :  { %5429 = dma.done.wait [#allocation2], 16 }
  0x18   :  { %5430 = vsyncadd [#allocation2], 4294967280 }
  0x19   :  { %30 = sfence }
  0x1a   :  { %v5196_v0 = vld [vmem:[%s6755_s5] sm:$0xff]   ;;  %v5432_v1 = vmov 0.0   ;;  %s6796_s25 = sld [smem:[#allocation6_spill]]  ;;  %vm6782_vm0 = vcmask 130048   ;;  %vm6780_vm1 = vmmov 0   ;;  %vm6773_vm2 = vcmask 261120  }
  0x1b   :  { %4783 = vmatprep.subr.bf16.mxu0 %v5432_v1  ;;  %4789 = vmatprep.subr.bf16.mxu1 %v5432_v1  ;;  %v4378_v4 = vld [vmem:[%s6761_s11] ss:$0 sm:$0xff]  ;;  %v5197_v16 = vld [vmem:[%s6756_s6 + $0x8] sm:$0xff]   ;;  %v5198_v17 = vld [vmem:[%s6756_s6 + $0x18] sm:$0xff]   ;;  %v125_v32 = vlaneseq  ;;  %vm522_vm13 = vcmask 1043456   ;;  %s6801_s26 = sld [smem:[#allocation7_spill]] }
  0x1c   :  { %4784 = vmatpush3.bf16.msra.mxu0 %v5196_v0  ;;  %4785 = vmatprep.mubr.msk.bf16.mxu0 %vm6780_vm1, %v5432_v1  ;;  %v5199_v18 = vld [vmem:[%s6756_s6] sm:$0xff]   ;;  %v5200_v19 = vld [vmem:[%s6756_s6 + $0x10] sm:$0xff]   ;;  %v5201_v29 = vld [vmem:[%s6756_s6 + $0x28] sm:$0xff]   ;;  %s6813_s20 = sld [smem:[#allocation8_spill]] }
  0x1d   :  { %4797 = vmatprep.subr.bf16.mxu0 %v5432_v1  ;;  %4793 = vmatprep.mubr.msk.bf16.mxu1 %vm6780_vm1, %v5432_v1  ;;  %v4389_v24 = vld [vmem:[%s6761_s11 + $0x1] ss:$0 sm:$0xff]  ;;  %v4390_v26 = vld [vmem:[%s6761_s11 + $0x2] ss:$0 sm:$0xff]  ;;  %v5604_v33 = vand.u32 127, %v125_v32  ;;  %s6925_s3 = sld [smem:[#allocation9_spill]] }
  0x1e   :  { %4790 = vmatpush3.bf16.msra.mxu1 %v5197_v16  ;;  %v5202_v31 = vld [vmem:[%s6756_s6 + $0x20] sm:$0xff]   ;;  %v5435_v16 = vmov -1e+09   ;;  %s5818_s6 = sld [smem:[#allocation3 + $0x1]] }
  0x1f   :  { %4791 = vmatprep.subr.bf16.mxu1 %v5432_v1  ;;  %v4395_v34 = vld [vmem:[%s6761_s11 + $0x4] ss:$0 sm:$0xff]  ;;  %vm6778_vm3 = vcmp.ge.s32.totalorder %v5604_v33, 8  ;;  %vm6776_vm4 = vcmp.lt.s32.totalorder %v5604_v33, 16  ;;  %v4391_v37 = vld [vmem:[%s6761_s11 + $0x3] ss:$0 sm:$0xff] }
  0x20   :  { %v66_v2 = vld [vmem:[%s6796_s25] sm:$0xff]  ;;  %vm6783_vm5 = vcmp.lt.s32.totalorder %v5604_v33, 8  ;;  %vm455_vm6 = vmand %vm6778_vm3, %vm6776_vm4  ;;  %vm612_vm7 = vcmp.ge.s32.totalorder %v5604_v33, 16  ;;  %vm613_vm8 = vcmp.lt.s32.totalorder %v5604_v33, 24  ;;  %vm725_vm9 = vcmp.ge.s32.totalorder %v5604_v33, 24 }
  0x21   :  { %v69_v3 = vpack.c.bf16 %v66_v2, %v66_v2  ;;  %vm726_vm10 = vcmp.lt.s32.totalorder %v5604_v33, 32  ;;  %v5628_v45 = vsel %vm6783_vm5, 1.0, %v5432_v1  ;;  %v5631_v46 = vsel %vm455_vm6, 1.0, %v5432_v1  ;;  %vm614_vm11 = vmand %vm612_vm7, %vm613_vm8  ;;  %v4399_v50 = vld [vmem:[%s6761_s11 + $0x5] ss:$0 sm:$0xff] }
  0x22   :  { %4792 = vmatpush3.bf16.msra.mxu1 %v5199_v18  ;;  %vm727_vm12 = vmand %vm725_vm9, %vm726_vm10  ;;  %v5648_v55 = vsel %vm614_vm11, 1.0, %v5432_v1  ;;  %vm6775_vm15 = vcmp.ge.s32.totalorder %v5604_v33, 4  ;;  %vm135_vm7 = vcmp.lt.s32.totalorder %v5604_v33, 4 }
  0x23   :  { %4786 = vmatmul.mubr.msk.bf16.vlgmr.msra.gmra.mxu0 %vm6782_vm0, %v69_v3  ;;  %4805 = vmatprep.subr.bf16.mxu1 %v5432_v1  ;;  %v5651_v56 = vsel %vm727_vm12, 1.0, %v5432_v1  ;;  %vm6774_vm12 = vcmask 64512  }
  0x24   :  { %4801 = vmatprep.mubr.msk.bf16.mxu0 %vm6780_vm1, %v5432_v1  ;;  %4798 = vmatpush3.bf16.msra.mxu0 %v5198_v17  ;;  %s1278_s27 = sadd.s32 4, %s5818_s6 }
  0x25   :  { %4799 = vmatprep.subr.bf16.mxu0 %v5432_v1 }
  0x28   :  { %4800 = vmatpush3.bf16.msra.mxu0 %v5200_v19 }
  0x29   :  { %4813 = vmatprep.subr.bf16.mxu0 %v5432_v1 }
  0xe3   :  { %v119_v5 = vpop.f32.mrf.mxu0 }
  0xe4   :  { %v5558_v6 = vadd.f32 %v4378_v4, %v119_v5 }
  0xe5   :  { %v4787_v7 = vpop.f32.mrf.mxu0 }
  0xe6   :  { %v188_v8 = vsel %vm6773_vm2, %v5558_v6, 0.0 }
  0xe7   :  { %189 = vadd.xlane.f32.xlu0 %v188_v8  ;;  %v122_v9 = vpop.f32.mrf.mxu0 }
  0xe9   :  { %v4788_v10 = vpop.f32.mrf.mxu0 }
 0x170   :  { %v190_v11 = vpop.xlane.xlu0 %189 }
 0x171   :  { %v192_v12 = vmul.f32 0.03125, %v190_v11 }
 0x173   :  { %v193_v13 = vsub.f32 %v5558_v6, %v192_v12  ;;  %v5434_v12 = vmov 0  }
 0x174   :  { %5194 = vset.pattern.permute.xlu1 %v5434_v12  ;;  %5195 = vset.pattern.permute.xlu0 %v5434_v12 }
 0x175   :  { %v194_v14 = vmul.f32 %v193_v13, %v193_v13 }
 0x177   :  { %v195_v15 = vsel %vm6773_vm2, %v194_v14, 0.0 }
 0x178   :  { %196 = vadd.xlane.f32.xlu0 %v195_v15 }
 0x201   :  { %v197_v20 = vpop.xlane.xlu0 %196 }
 0x202   :  { %v198_v21 = vmul.f32 0.03125, %v197_v20 }
 0x204   :  { %v199_v22 = vadd.f32 1e-05, %v198_v21 }
 0x206   :  { %5243 = vrsqrt.f32 %v199_v22 }
 0x213   :  { %v5244_v23 = vpop.eup %5243 }
 0x214   :  { %v201_v25 = vmul.f32 %v5244_v23, %v193_v13  ;;  %v5672_v13 = vshrl.u32 %v125_v32, 7 }
 0x216   :  { %v206_v27 = vmul.f32 %v4389_v24, %v201_v25  ;;  %vm138_vm14 = vcmp.ge.s32.totalorder %v5672_v13, 4  ;;  %vm131_vm6 = vcmp.lt.s32.totalorder %v5672_v13, 4 }
 0x217   :  { %vm142_vm8 = vmand %vm138_vm14, %vm6775_vm15 }
 0x218   :  { %v211_v28 = vadd.f32 %v4390_v26, %v206_v27  ;;  %vm136_vm9 = vmand %vm131_vm6, %vm135_vm7 }
 0x219   :  { %vm144_vm10 = vmand %vm142_vm8, %vm6783_vm5 }
 0x21a   :  { %v212_v30 = vpack.c.bf16 %v211_v28, %v211_v28  ;;  %vm145_vm11 = vmor %vm136_vm9, %vm144_vm10 }
 0x21b   :  { %v5685_v17 = vsel %vm145_vm11, 0.0, %v5435_v16  ;;  %vm1180_vm11 = vcmp.eq.s32.totalorder %v5604_v33, %v5672_v13 }
 0x21c   :  { %4794 = vmatmul.mubr.msk.bf16.vlgmr.msra.gmra.mxu1 %vm6773_vm2, %v212_v30  ;;  %4802 = vmatmul.mubr.msk.bf16.vlgmr.msra.gmra.mxu0 %vm6773_vm2, %v212_v30 }
 0x21d   :  { %4806 = vmatpush3.bf16.msra.mxu1 %v5201_v29  ;;  %4809 = vmatprep.mubr.msk.bf16.mxu1 %vm6780_vm1, %v5432_v1 }
 0x21e   :  { %4807 = vmatprep.subr.bf16.mxu1 %v5432_v1  ;;  %4815 = vmatprep.mubr.msk.bf16.mxu0 %vm6780_vm1, %v5432_v1 }
 0x221   :  { %4808 = vmatpush3.bf16.msra.mxu1 %v5202_v31 }
 0x222   :  { %4819 = vmatprep.subr.bf16.mxu1 %v5432_v1 }
 0x224   :  { %4810 = vmatmul.mubr.msk.bf16.vlgmr.msra.gmra.mxu1 %vm6773_vm2, %v212_v30 }
 0x225   :  { %4821 = vmatprep.mubr.msk.bf16.mxu1 %vm6780_vm1, %v5432_v1 }
 0x2dc   :  { %v266_v35 = vpop.f32.mrf.mxu1  ;;  %v322_v36 = vpop.f32.mrf.mxu0 }
 0x2dd   :  { %v323_v38 = vadd.f32 %v4395_v34, %v322_v36  ;;  %v5621_v41 = vadd.f32 %v4391_v37, %v266_v35 }
 0x2de   :  { %v4795_v39 = vpop.f32.mrf.mxu1  ;;  %v4803_v40 = vpop.f32.mrf.mxu0 }
 0x2df   :  { %v389_v42 = vpack.c.bf16 %v323_v38, %v323_v38  ;;  %v387_v51 = vmul.f32 %v5628_v45, %v5621_v41  ;;  %v458_v52 = vmul.f32 %v5631_v46, %v5621_v41  ;;  %v617_v40 = vmul.f32 %v5648_v55, %v5621_v41 }
 0x2e0   :  { %v269_v43 = vpop.f32.mrf.mxu1  ;;  %v325_v44 = vpop.f32.mrf.mxu0 }
 0x2e1   :  { %v5634_v47 = vsel %vm6773_vm2, %v389_v42, 0  ;;  %v388_v62 = vpack.c.bf16 %v387_v51, %v387_v51  ;;  %v459_v63 = vpack.c.bf16 %v458_v52, %v458_v52  ;;  %v618_v42 = vpack.c.bf16 %v617_v40, %v617_v40  ;;  %v5204_v40 = vld [vmem:[%s6757_s7] sm:$0xff]  }
 0x2e2   :  { %v4796_v48 = vpop.f32.mrf.mxu1  ;;  %v4804_v49 = vpop.f32.mrf.mxu0  ;;  %4814 = vmatpush3.bf16.xpose.msra.mxu0 %v5634_v47  ;;  %4820 = vmatpush3.bf16.xpose.msra.mxu1 %v5634_v47  ;;  %v730_v43 = vmul.f32 %v5651_v56, %v5621_v41 }
 0x2e3   :  { %4825 = vmatprep.subr.bf16.mxu0 %v5432_v1  ;;  %4831 = vmatprep.subr.bf16.mxu1 %v5432_v1 }
 0x2e4   :  { %v378_v53 = vpop.f32.mrf.mxu1  ;;  %v731_v44 = vpack.c.bf16 %v730_v43, %v730_v43 }
 0x2e5   :  { %v379_v54 = vadd.f32 %v4399_v50, %v378_v53 }
 0x2e6   :  { %v4811_v57 = vpop.f32.mrf.mxu1 }
 0x2e7   :  { %v516_v58 = vmul.f32 %v5631_v46, %v379_v54  ;;  %v450_v59 = vmul.f32 %v5628_v45, %v379_v54  ;;  %v675_v60 = vmul.f32 %v5648_v55, %v379_v54  ;;  %v788_v61 = vmul.f32 %v5651_v56, %v379_v54 }
 0x2e8   :  { %v381_v0 = vpop.f32.mrf.mxu1 }
 0x2e9   :  { %v518_v2 = vpack.c.bf16 %v516_v58, %v516_v58  ;;  %v452_v3 = vpack.c.bf16 %v450_v59, %v450_v59  ;;  %v677_v4 = vpack.c.bf16 %v675_v60, %v675_v60  ;;  %v790_v5 = vpack.c.bf16 %v788_v61, %v788_v61  ;;  %4816 = vmatmul.mubr.msk.bf16.vlgmr.msra.gmra.mxu0 %vm6773_vm2, %v388_v62 }
 0x2ea   :  { %4822 = vmatmul.mubr.msk.bf16.vlgmr.msra.gmra.mxu1 %vm6773_vm2, %v459_v63  ;;  %v4812_v7 = vpop.f32.mrf.mxu1  ;;  %4827 = vmatprep.mubr.msk.bf16.mxu0 %vm6780_vm1, %v5432_v1 }
 0x2eb   :  { %v524_v8 = vsel %vm522_vm13, %v518_v2, 0  ;;  %v570_v9 = vsel %vm522_vm13, %v452_v3, 0  ;;  %4833 = vmatprep.mubr.msk.bf16.mxu1 %vm6780_vm1, %v5432_v1  ;;  %v5663_v10 = vsel %vm522_vm13, %v677_v4, 0  ;;  %v5665_v11 = vsel %vm522_vm13, %v790_v5, 0 }
 0x2ec   :  { %4826 = vmatpush3.bf16.msra.mxu0 %v524_v8  ;;  %4832 = vmatpush3.bf16.msra.mxu1 %v570_v9  ;;  %vm6772_vm13 = vcmask 523264  }
 0x2ed   :  { %4837 = vmatprep.subr.bf16.mxu0 %v5432_v1  ;;  %4843 = vmatprep.subr.bf16.mxu1 %v5432_v1 }
 0x3a9   :  { %v430_v14 = vpop.f32.mrf.mxu0 }
 0x3aa   :  { %v497_v15 = vpop.f32.mrf.mxu1  ;;  %v436_v18 = vmul.f32 0.35355338, %v430_v14 }
 0x3ab   :  { %v503_v19 = vmul.f32 0.35355338, %v497_v15  ;;  %v4817_v20 = vpop.f32.mrf.mxu0 }
 0x3ac   :  { %v4823_v21 = vpop.f32.mrf.mxu1  ;;  %v437_v23 = vadd.f32 %v436_v18, %v5685_v17 }
 0x3ad   :  { %v504_v22 = vadd.f32 %v503_v19, %v5685_v17  ;;  %v433_v24 = vpop.f32.mrf.mxu0 }
 0x3ae   :  { %v500_v25 = vpop.f32.mrf.mxu1  ;;  %v439_v27 = vsel %vm6774_vm12, %v437_v23, -inf }
 0x3af   :  { %v505_v26 = vsel %vm6774_vm12, %v504_v22, -inf  ;;  %440 = vmax.xlane.f32.xlu0 %v439_v27  ;;  %v4818_v29 = vpop.f32.mrf.mxu0 }
 0x3b0   :  { %506 = vmax.xlane.f32.xlu1 %v505_v26  ;;  %v4824_v28 = vpop.f32.mrf.mxu1 }
 0x438   :  { %v441_v48 = vpop.xlane.xlu0 %440 }
 0x439   :  { %v507_v30 = vpop.xlane.xlu1 %506  ;;  %v442_v49 = vsub.f32 %v437_v23, %v441_v48 }
 0x43a   :  { %v508_v31 = vsub.f32 %v504_v22, %v507_v30 }
 0x43b   :  { %v443_v50 = vmul.f32 1.442695, %v442_v49 }
 0x43c   :  { %v509_v32 = vmul.f32 1.442695, %v508_v31 }
 0x43e   :  { %5245 = vpow2.f32 %v509_v32 }
 0x44b   :  { %v5246_v34 = vpop.eup %5245 }
 0x44c   :  { %v511_v35 = vsel %vm6774_vm12, %v5246_v34, 0.0 }
 0x44d   :  { %512 = vadd.xlane.f32.xlu1 %v511_v35 }
 0x4d6   :  { %v513_v36 = vpop.xlane.xlu1 %512 }
 0x4d7   :  { %5247 = vrcp.f32 %v513_v36 }
 0x4d8   :  { %5249 = vpow2.f32 %v443_v50 }
 0x4e4   :  { %v5248_v37 = vpop.eup %5247 }
 0x4e5   :  { %v515_v38 = vmul.f32 %v5248_v37, %v5246_v34  ;;  %v5250_v61 = vpop.eup %5249 }
 0x4e6   :  { %v445_v2 = vsel %vm6774_vm12, %v5250_v61, 0.0 }
 0x4e7   :  { %v517_v39 = vpack.c.bf16 %v515_v38, %v515_v38 }
 0x4e9   :  { %4828 = vmatmul.mubr.msk.bf16.vlgmr.msra.gmra.mxu0 %vm6774_vm12, %v517_v39 }
 0x4ea   :  { %4838 = vmatpush3.bf16.xpose.msra.mxu0 %v5634_v47  ;;  %4839 = vmatprep.mubr.msk.bf16.mxu0 %vm6780_vm1, %v5432_v1 }
 0x4eb   :  { %4849 = vmatprep.subr.bf16.mxu0 %v5432_v1 }
 0x4f1   :  { %4840 = vmatmul.mubr.msk.bf16.vlgmr.msra.gmra.mxu0 %vm6773_vm2, %v618_v42 }
 0x4f2   :  { %4850 = vmatpush3.bf16.xpose.msra.mxu0 %v5634_v47  ;;  %4851 = vmatprep.mubr.msk.bf16.mxu0 %vm6780_vm1, %v5432_v1 }
 0x4f3   :  { %4861 = vmatprep.subr.bf16.mxu0 %v5432_v1 }
 0x4f9   :  { %4852 = vmatmul.mubr.msk.bf16.vlgmr.msra.gmra.mxu0 %vm6773_vm2, %v731_v44 }
 0x4fa   :  { %4865 = vmatprep.mubr.msk.bf16.mxu0 %vm6780_vm1, %v5432_v1 }
 0x5a9   :  { %v5709_v51 = vpop.f32.mrf.mxu0 }
 0x5ab   :  { %v4829_v47 = vpop.f32.mrf.mxu0 }
 0x5ad   :  { %v563_v52 = vpop.f32.mrf.mxu0 }
 0x5af   :  { %v4830_v53 = vpop.f32.mrf.mxu0 }
 0x5b1   :  { %v656_v54 = vpop.f32.mrf.mxu0 }
 0x5b2   :  { %v662_v57 = vmul.f32 0.35355338, %v656_v54 }
 0x5b3   :  { %v4841_v41 = vpop.f32.mrf.mxu0 }
 0x5b4   :  { %v663_v58 = vadd.f32 %v662_v57, %v5685_v17 }
 0x5b5   :  { %v659_v59 = vpop.f32.mrf.mxu0 }
 0x5b6   :  { %v664_v60 = vsel %vm6774_vm12, %v663_v58, -inf }
 0x5b7   :  { %665 = vmax.xlane.f32.xlu1 %v664_v60  ;;  %v4842_v62 = vpop.f32.mrf.mxu0 }
 0x5b9   :  { %v769_v63 = vpop.f32.mrf.mxu0 }
 0x5ba   :  { %v775_v0 = vmul.f32 0.35355338, %v769_v63 }
 0x5bb   :  { %446 = vadd.xlane.f32.xlu1 %v445_v2  ;;  %v4853_v3 = vpop.f32.mrf.mxu0 }
 0x5bc   :  { %v776_v4 = vadd.f32 %v775_v0, %v5685_v17 }
 0x5bd   :  { %v772_v5 = vpop.f32.mrf.mxu0 }
 0x5be   :  { %v777_v7 = vsel %vm6774_vm12, %v776_v4, -inf }
 0x5bf   :  { %778 = vmax.xlane.f32.xlu0 %v777_v7  ;;  %v4854_v8 = vpop.f32.mrf.mxu0 }
 0x5c0   :  { %v5206_v8 = vld [vmem:[%s6758_s8] sm:$0xff]  }
 0x640   :  { %v666_v9 = vpop.xlane.xlu1 %665 }
 0x641   :  { %v667_v14 = vsub.f32 %v663_v58, %v666_v9  ;;  %v4418_v58 = vld [vmem:[%s6761_s11 + $0x6] ss:$0 sm:$0xff] }
 0x643   :  { %v668_v15 = vmul.f32 1.442695, %v667_v14 }
 0x644   :  { %v447_v18 = vpop.xlane.xlu1 %446 }
 0x645   :  { %5251 = vpow2.f32 %v668_v15 }
 0x646   :  { %5253 = vrcp.f32 %v447_v18 }
 0x648   :  { %v779_v19 = vpop.xlane.xlu0 %778 }
 0x649   :  { %v780_v20 = vsub.f32 %v776_v4, %v779_v19  ;;  %v4419_v19 = vld [vmem:[%s6761_s11 + $0x7] ss:$0 sm:$0xff] }
 0x64b   :  { %v781_v21 = vmul.f32 1.442695, %v780_v20 }
 0x64d   :  { %5255 = vpow2.f32 %v781_v21  ;;  %v4420_v21 = vld [vmem:[%s6761_s11 + $0x8] ss:$0 sm:$0xff] }
 0x652   :  { %v5252_v22 = vpop.eup %5251 }
 0x653   :  { %v5254_v23 = vpop.eup %5253  ;;  %v670_v24 = vsel %vm6774_vm12, %v5252_v22, 0.0 }
 0x654   :  { %671 = vadd.xlane.f32.xlu0 %v670_v24  ;;  %v449_v17 = vmul.f32 %v5254_v23, %v5250_v61 }
 0x656   :  { %v451_v25 = vpack.c.bf16 %v449_v17, %v449_v17  ;;  %v5207_v17 = vld [vmem:[%s6759_s9 + $0x18] sm:$0xff]  }
 0x658   :  { %4834 = vmatmul.mubr.msk.bf16.vlgmr.msra.gmra.mxu1 %vm6774_vm12, %v451_v25  ;;  %v5208_v25 = vld [vmem:[%s6759_s9 + $0x10] sm:$0xff]  }
 0x659   :  { %4844 = vmatpush3.bf16.msra.mxu1 %v5663_v10  ;;  %4845 = vmatprep.mubr.msk.bf16.mxu1 %vm6780_vm1, %v5432_v1 }
 0x65a   :  { %v5256_v26 = vpop.eup %5255  ;;  %4855 = vmatprep.subr.bf16.mxu1 %v5432_v1 }
 0x65b   :  { %v783_v27 = vsel %vm6774_vm12, %v5256_v26, 0.0 }
 0x65c   :  { %784 = vadd.xlane.f32.xlu1 %v783_v27  ;;  %v5210_v27 = vld [vmem:[%s6759_s9] sm:$0xff]  }
 0x6dd   :  { %v672_v28 = vpop.xlane.xlu0 %671 }
 0x6de   :  { %5257 = vrcp.f32 %v672_v28  ;;  %v4421_v28 = vld [vmem:[%s6761_s11 + $0x9] ss:$0 sm:$0xff] }
 0x6e5   :  { %v785_v29 = vpop.xlane.xlu1 %784 }
 0x6e6   :  { %5259 = vrcp.f32 %v785_v29 }
 0x6eb   :  { %v5258_v30 = vpop.eup %5257 }
 0x6ec   :  { %v674_v31 = vmul.f32 %v5258_v30, %v5252_v22 }
 0x6ee   :  { %v676_v32 = vpack.c.bf16 %v674_v31, %v674_v31 }
 0x6f0   :  { %4846 = vmatmul.mubr.msk.bf16.vlgmr.msra.gmra.mxu1 %vm6774_vm12, %v676_v32 }
 0x6f1   :  { %4856 = vmatpush3.bf16.msra.mxu1 %v5665_v11  ;;  %4857 = vmatprep.mubr.msk.bf16.mxu1 %vm6780_vm1, %v5432_v1  ;;  %v5203_v11 = vld [vmem:[%s6757_s7 + $0x8] sm:$0xff]  }
 0x6f2   :  { %4869 = vmatprep.subr.bf16.mxu1 %v5432_v1  ;;  %4862 = vmatpush3.bf16.msra.mxu0 %v5203_v11 }
 0x6f3   :  { %v5260_v10 = vpop.eup %5259  ;;  %4863 = vmatprep.subr.bf16.mxu0 %v5432_v1 }
 0x6f4   :  { %v787_v34 = vmul.f32 %v5260_v10, %v5256_v26  ;;  %v5209_v26 = vld [vmem:[%s6759_s9 + $0x8] sm:$0xff]  }
 0x6f6   :  { %v789_v35 = vpack.c.bf16 %v787_v34, %v787_v34  ;;  %4864 = vmatpush3.bf16.msra.mxu0 %v5204_v40 }
 0x6f7   :  { %4877 = vmatprep.subr.bf16.mxu0 %v5432_v1 }
 0x6f8   :  { %4858 = vmatmul.mubr.msk.bf16.vlgmr.msra.gmra.mxu1 %vm6774_vm12, %v789_v35 }
 0x6f9   :  { %4873 = vmatprep.mubr.msk.bf16.mxu1 %vm6780_vm1, %v5432_v1 }
 0x718   :  { %v606_v36 = vpop.f32.mrf.mxu1 }
 0x719   :  { %v607_v48 = vadd.f32 %v606_v36, %v5709_v51 }
 0x71a   :  { %v4835_v37 = vpop.f32.mrf.mxu1 }
 0x71c   :  { %v609_v38 = vpop.f32.mrf.mxu1 }
 0x71e   :  { %v4836_v39 = vpop.f32.mrf.mxu1 }
 0x7b0   :  { %v718_v42 = vpop.f32.mrf.mxu1 }
 0x7b1   :  { %v724_v50 = vadd.f32 %v718_v42, %v607_v48  ;;  %v4430_v48 = vld [vmem:[%s6761_s11 + $0xa] ss:$0 sm:$0xff] }
 0x7b2   :  { %v4847_v43 = vpop.f32.mrf.mxu1 }
 0x7b4   :  { %v721_v44 = vpop.f32.mrf.mxu1 }
 0x7b6   :  { %v4848_v49 = vpop.f32.mrf.mxu1 }
 0x7b8   :  { %v831_v47 = vpop.f32.mrf.mxu1 }
 0x7b9   :  { %v837_v52 = vadd.f32 %v831_v47, %v724_v50 }
 0x7ba   :  { %v4859_v53 = vpop.f32.mrf.mxu1 }
 0x7bb   :  { %v838_v54 = vpack.c.bf16 %v837_v52, %v837_v52 }
 0x7bc   :  { %v834_v57 = vpop.f32.mrf.mxu1 }
 0x7bd   :  { %4866 = vmatmul.mubr.msk.bf16.vlgmr.msra.gmra.mxu0 %vm6773_vm2, %v838_v54 }
 0x7be   :  { %v4860_v41 = vpop.f32.mrf.mxu1  ;;  %4885 = vmatprep.mubr.msk.bf16.mxu0 %vm6780_vm1, %v5432_v1  ;;  %4878 = vmatpush3.bf16.msra.mxu0 %v5207_v17  ;;  %v1157_v17 = vld [vmem:[%s6801_s26] sm:$0xff] }
 0x7bf   :  { %4879 = vmatprep.subr.bf16.mxu0 %v5432_v1 }
 0x7c2   :  { %4880 = vmatpush3.bf16.msra.mxu0 %v5208_v25 }
 0x7c3   :  { %4881 = vmatprep.subr.bf16.mxu0 %v5432_v1 }
 0x7c6   :  { %4882 = vmatpush3.bf16.msra.mxu0 %v5209_v26  ;;  %v6806_v26 = vmov 0 }
 0x7c7   :  { %4883 = vmatprep.subr.bf16.mxu0 %v5432_v1 }
 0x7ca   :  { %4884 = vmatpush3.bf16.msra.mxu0 %v5210_v27  ;;  %v6808_v27 = vmov 0 }
 0x7cb   :  { %4908 = vmatprep.subr.mxu0 %v5432_v1 }
 0x87d   :  { %v888_v59 = vpop.f32.mrf.mxu0 }
 0x87e   :  { %v894_v51 = vadd.f32 %v888_v59, %v5558_v6  ;;  %v5205_v6 = vld [vmem:[%s6758_s8 + $0x8] sm:$0xff]  }
 0x87f   :  { %v4867_v60 = vpop.f32.mrf.mxu0  ;;  %4870 = vmatpush3.bf16.msra.mxu1 %v5205_v6 }
 0x880   :  { %v5747_v61 = vadd.f32 %v4418_v58, %v894_v51  ;;  %4871 = vmatprep.subr.bf16.mxu1 %v5432_v1  ;;  %v5211_v60 = vld [vmem:[%s6760_s10 + $0x8] sm:$0xff]  }
 0x881   :  { %v891_v62 = vpop.f32.mrf.mxu0 }
 0x882   :  { %v900_v63 = vsel %vm6773_vm2, %v5747_v61, 0.0 }
 0x883   :  { %901 = vadd.xlane.f32.xlu0 %v900_v63  ;;  %v4868_v0 = vpop.f32.mrf.mxu0  ;;  %4872 = vmatpush3.bf16.msra.mxu1 %v5206_v8 }
 0x884   :  { %4889 = vmatprep.subr.bf16.mxu1 %v5432_v1 }
 0x90c   :  { %v902_v2 = vpop.xlane.xlu0 %901 }
 0x90d   :  { %v903_v3 = vmul.f32 0.03125, %v902_v2 }
 0x90f   :  { %v904_v4 = vsub.f32 %v5747_v61, %v903_v3  ;;  %v4431_v3 = vld [vmem:[%s6761_s11 + $0xb] ss:$0 sm:$0xff] }
 0x911   :  { %v905_v5 = vmul.f32 %v904_v4, %v904_v4 }
 0x913   :  { %v906_v7 = vsel %vm6773_vm2, %v905_v5, 0.0  ;;  %v4432_v5 = vld [vmem:[%s6761_s11 + $0xc] ss:$0 sm:$0xff] }
 0x914   :  { %907 = vadd.xlane.f32.xlu1 %v906_v7 }
 0x99d   :  { %v908_v9 = vpop.xlane.xlu1 %907 }
 0x99e   :  { %v909_v14 = vmul.f32 0.03125, %v908_v9  ;;  %v5816_v9 = vadd.s32 8, %v5672_v13 }
 0x9a0   :  { %v910_v15 = vadd.f32 1e-05, %v909_v14  ;;  %vm6779_vm14 = vcmp.lt.s32.totalorder %v5816_v9, 11  ;;  %vm6777_vm6 = vcmp.ge.s32.totalorder %v5816_v9, 11  ;;  %v4437_v14 = vadd.s32 4294967293, %v5672_v13 }
 0x9a1   :  { %vm5827_vm8 = vmand %vm6779_vm14, %vm135_vm7  ;;  %v4446_v25 = vadd.s32 4294967285, %v5816_v9 }
 0x9a2   :  { %5261 = vrsqrt.f32 %v910_v15  ;;  %vm5835_vm9 = vmand %vm6777_vm6, %vm6775_vm15 }
 0x9af   :  { %v5262_v18 = vpop.eup %5261 }
 0x9b0   :  { %v912_v20 = vmul.f32 %v5262_v18, %v904_v4 }
 0x9b2   :  { %v917_v22 = vmul.f32 %v4419_v19, %v912_v20 }
 0x9b4   :  { %v922_v23 = vadd.f32 %v4420_v21, %v917_v22  ;;  %v1158_v21 = vld [vmem:[%s6801_s26 + $0x8] sm:$0xff] }
 0x9b6   :  { %v923_v24 = vpack.c.bf16 %v922_v23, %v922_v23 }
 0x9b8   :  { %4874 = vmatmul.mubr.msk.bf16.vlgmr.msra.gmra.mxu1 %vm6773_vm2, %v923_v24 }
 0x9b9   :  { %4893 = vmatprep.mubr.msk.bf16.mxu1 %vm6780_vm1, %v5432_v1  ;;  %4890 = vmatpush3.bf16.msra.mxu1 %v5211_v60 }
 0x9ba   :  { %4891 = vmatprep.subr.bf16.mxu1 %v5432_v1 }
 0xa78   :  { %v977_v29 = vpop.f32.mrf.mxu1 }
 0xa79   :  { %v978_v30 = vadd.f32 %v4421_v28, %v977_v29  ;;  %v5877_v29 = vstv %s5818_s6 }
 0xa7a   :  { %v4875_v31 = vpop.f32.mrf.mxu1 }
 0xa7b   :  { %v983_v32 = vmul.f32 %v978_v30, %v978_v30  ;;  %v1327_v31 = vsub.s32 %v4446_v25, %v5877_v29 }
 0xa7c   :  { %v980_v10 = vpop.f32.mrf.mxu1 }
 0xa7d   :  { %v984_v34 = vmul.f32 %v983_v32, %v978_v30  ;;  %v4454_v10 = vadd.s32 4294967292, %v5604_v33 }
 0xa7e   :  { %v4876_v35 = vpop.f32.mrf.mxu1 }
 0xa7f   :  { %v985_v36 = vmul.f32 0.044715, %v984_v34  ;;  %v5903_v34 = vadd.s32 16, %v5672_v13 }
 0xa81   :  { %v986_v37 = vadd.f32 %v985_v36, %v978_v30  ;;  %v5910_v36 = vadd.s32 4294967285, %v5903_v34 }
 0xa83   :  { %v987_v38 = vmul.f32 0.7978846, %v986_v37  ;;  %v4438_v37 = vadd.s32 4294967293, %v5816_v9 }
 0xa85   :  { %5263 = vtanh.f32 %v987_v38  ;;  %v1328_v38 = vsub.s32 %v5910_v36, %v5877_v29 }
 0xa92   :  { %v5264_v39 = vpop.eup %5263 }
 0xa93   :  { %v989_v11 = vadd.f32 1.0, %v5264_v39 }
 0xa95   :  { %v990_v40 = vmul.f32 0.5, %v989_v11 }
 0xa97   :  { %v991_v42 = vmul.f32 %v990_v40, %v978_v30  ;;  %v5879_v30 = vstv %s1278_s27  ;;  %v4448_v40 = vadd.s32 4294967288, %v5604_v33 }
 0xa99   :  { %v992_v43 = vpack.c.bf16 %v991_v42, %v991_v42 }
 0xa9b   :  { %4886 = vmatmul.mubr.msk.bf16.vlgmr.msra.gmra.mxu0 %vm6772_vm13, %v992_v43  ;;  %v4450_v43 = vadd.s32 4294967293, %v4446_v25 }
 0xa9c   :  { %4912 = vmatprep.mubr.msk.f32.mxu0 %vm6780_vm1, %v5432_v1  ;;  %4909 = vmatpush3.msra.mxu0 %v1158_v21 }
 0xa9d   :  { %4910 = vmatprep.subr.mxu0 %v5432_v1 }
 0xa9e   :  { %4911 = vmatpush3.msra.mxu0 %v1157_v17 }
 0xb5b   :  { %v1055_v44 = vpop.f32.mrf.mxu0 }
 0xb5c   :  { %v1061_v49 = vadd.f32 %v1055_v44, %v5747_v61  ;;  %v5212_v61 = vld [vmem:[%s6760_s10] sm:$0xff]   ;;  %s1161_s10 = sld [smem:[#allocation3]] }
 0xb5d   :  { %v4887_v50 = vpop.f32.mrf.mxu0  ;;  %4892 = vmatpush3.bf16.msra.mxu1 %v5212_v61  ;;  %v1522_v44 = vld [vmem:[%s6813_s20] sm:$0x1] }
 0xb5e   :  { %v1066_v47 = vadd.f32 %v4430_v48, %v1061_v49  ;;  %4897 = vmatprep.subr.mxu1 %v5432_v1  ;;  %v1553_v48 = vsub.s32 0, %v5672_v13 }
 0xb5f   :  { %v1058_v52 = vpop.f32.mrf.mxu0 }
 0xb60   :  { %v1069_v53 = vsel %vm6773_vm2, %v1066_v47, 0.0 }
 0xb61   :  { %1070 = vadd.xlane.f32.xlu0 %v1069_v53  ;;  %v4888_v54 = vpop.f32.mrf.mxu0 }
 0xb62   :  { %s1186_s8 = sadd.s32 4, %s1161_s10  ;;  %v1176_v18 = vstv %s1161_s10  ;;  %v6819_v54 = vmov 0 }
 0xb63   :  { %v1187_v19 = vstv %s1186_s8  ;;  %vm1177_vm10 = vcmp.lt.s32.totalorder %v5672_v13, %v1176_v18  ;;  %vm1218_vm15 = vcmp.ge.s32.totalorder %v5672_v13, %v1176_v18  ;;  %v1230_v23 = vsub.s32 %v5672_v13, %v1176_v18 }
 0xb64   :  { %vm1188_vm13 = vcmp.ge.s32.totalorder %v5672_v13, %v1187_v19  ;;  %vm5847_vm12 = vmand %vm1177_vm10, %vm1180_vm11  ;;  %vm1224_vm11 = vcmp.lt.s32.totalorder %v5672_v13, %v1187_v19  ;;  %v1231_v28 = vsub.s32 %v5816_v9, %v1176_v18  ;;  %vm1225_vm3 = vcmp.lt.s32.totalorder %v5816_v9, %v1187_v19 }
 0xb65   :  { %vm1221_vm10 = vmand %vm135_vm7, %vm1218_vm15  ;;  %vm1219_vm7 = vcmp.ge.s32.totalorder %v5816_v9, %v1176_v18 }
 0xb66   :  { %vm5866_vm6 = vmand %vm1221_vm10, %vm1224_vm11  ;;  %vm1321_vm10 = vcmp.lt.s32.totalorder %v4446_v25, %v5879_v30  ;;  %vm5897_vm15 = vcmp.eq.s32.totalorder %v5604_v33, %v1231_v28 }
 0xb67   :  { %v6807_v26 = vsel %vm5866_vm6, 4294967295, %v6806_v26  ;;  %vm1287_vm6 = vcmp.eq.s32.totalorder %v4448_v40, %v4450_v43  ;;  %v5214_v43 = vld [vmem:[%s6762_s12 + $0x18] sm:$0xff]  }
 0xb68   :  { %4929 = vmatprep.subr.bf16.mxu0 %v5214_v43 }
 0xbea   :  { %v1071_v57 = vpop.xlane.xlu0 %1070 }
 0xbeb   :  { %v1072_v41 = vmul.f32 0.03125, %v1071_v57  ;;  %v4451_v57 = vadd.s32 4294967293, %v5910_v36 }
 0xbed   :  { %v1073_v58 = vsub.f32 %v1066_v47, %v1072_v41  ;;  %v6827_v41 = vmov 0 }
 0xbef   :  { %v1074_v59 = vmul.f32 %v1073_v58, %v1073_v58 }
 0xbf1   :  { %v1075_v51 = vsel %vm6773_vm2, %v1074_v59, 0.0  ;;  %v4433_v59 = vld [vmem:[%s6761_s11 + $0xd] ss:$0 sm:$0xff] }
 0xbf2   :  { %1076 = vadd.xlane.f32.xlu1 %v1075_v51 }
 0xc7b   :  { %v1077_v62 = vpop.xlane.xlu1 %1076 }
 0xc7c   :  { %v1078_v63 = vmul.f32 0.03125, %v1077_v62 }
 0xc7e   :  { %v1079_v0 = vadd.f32 1e-05, %v1078_v63 }
 0xc80   :  { %5265 = vrsqrt.f32 %v1079_v0 }
 0xc8d   :  { %v5266_v2 = vpop.eup %5265 }
 0xc8e   :  { %v1081_v4 = vmul.f32 %v5266_v2, %v1073_v58 }
 0xc90   :  { %v1086_v7 = vmul.f32 %v4431_v3, %v1081_v4 }
 0xc92   :  { %v1091_v6 = vadd.f32 %v4432_v5, %v1086_v7 }
 0xc94   :  { %v1096_v8 = vpack.c.bf16 %v1091_v6, %v1091_v6 }
 0xc96   :  { %4894 = vmatmul.mubr.msk.bf16.vlgmr.msra.gmra.mxu1 %vm6773_vm2, %v1096_v8  ;;  %vm1194_vm2 = vcmp.eq.s32.totalorder %v5604_v33, %v4437_v14 }
 0xc97   :  { %4899 = vmatprep.mubr.msk.f32.mxu1 %vm6780_vm1, %v5432_v1  ;;  %vm5854_vm4 = vmand %vm1188_vm13, %vm1194_vm2  ;;  %vm5871_vm2 = vcmp.eq.s32.totalorder %v5604_v33, %v1230_v23  ;;  %vm1315_vm13 = vcmp.ge.s32.totalorder %v4446_v25, %v5877_v29 }
 0xc98   :  { %v6809_v27 = vsel %vm5871_vm2, 4294967295, %v6808_v27  ;;  %vm1200_vm11 = vmor %vm5847_vm12, %vm5854_vm4  ;;  %vm1281_vm2 = vcmp.ge.s32.totalorder %v4446_v25, %v5879_v30 }
 0xc99   :  { %vm1203_vm14 = vmand %vm6783_vm5, %vm1200_vm11 }
 0xc9a   :  { %v4440_v35 = vsel %vm1203_vm14, 1.0, %v5432_v1  ;;  %vm1222_vm4 = vmand %vm5827_vm8, %vm1219_vm7  ;;  %vm1330_vm8 = vcmp.eq.s32.totalorder %v4454_v10, %v1327_v31  ;;  %vm1195_vm7 = vcmp.eq.s32.totalorder %v5604_v33, %v4438_v37 }
 0xc9b   :  { %4913 = vmatmul.mubr.msk.f32.vlgmr.msra.gmra.mxu0 %vm6782_vm0, %v4440_v35  ;;  %vm1228_vm12 = vmand %vm1222_vm4, %vm1225_vm3  ;;  %vm1189_vm0 = vcmp.ge.s32.totalorder %v5816_v9, %v1187_v19  ;;  %vm6814_vm3 = vcmp.ge.s32.totalorder %v5604_v33, 8 }
 0xc9c   :  { %4915 = vmatprep.mubr.msk.f32.mxu0 %vm6780_vm1, %v5432_v1  ;;  %vm1237_vm11 = vmand %vm1228_vm12, %vm5897_vm15  ;;  %vm1181_vm12 = vcmp.eq.s32.totalorder %v5604_v33, %v5816_v9  ;;  %4930 = vmatpush3.bf16.msra.mxu0 %v5214_v43 }
 0xc9d   :  { %vm1312_vm14 = vmand %vm5835_vm9, %vm6783_vm5  ;;  %v4443_v39 = vsel %vm1237_vm11, 1.0, %v5432_v1  ;;  %vm1178_vm9 = vcmp.lt.s32.totalorder %v5816_v9, %v1176_v18 }
 0xc9e   :  { %vm1318_vm15 = vmand %vm1312_vm14, %vm1315_vm13  ;;  %vm6812_vm13 = vcmp.lt.s32.totalorder %v5816_v9, 11 }
 0xc9f   :  { %vm1324_vm4 = vmand %vm1318_vm15, %vm1321_vm10 }
 0xca0   :  { %vm1333_vm1 = vmand %vm1324_vm4, %vm1330_vm8  ;;  %vm1273_vm4 = vcmp.eq.s32.totalorder %v4448_v40, %v4446_v25 }
 0xca1   :  { %v4455_v11 = vsel %vm1333_vm1, 1.0, %v5432_v1  ;;  %vm1174_vm11 = vmand %vm6812_vm13, %vm6783_vm5  ;;  %vm1270_vm1 = vcmp.lt.s32.totalorder %v4446_v25, %v5877_v29  ;;  %vm6815_vm13 = vcmp.ge.s32.totalorder %v5816_v9, 11 }
 0xca2   :  { %v5943_v42 = vadd.f32 %v4455_v11, %v4443_v39  ;;  %vm1184_vm10 = vmand %vm1178_vm9, %vm1181_vm12  ;;  %vm1549_vm9 = vcmp.gt.f32.partialorder %v1522_v44, 0.0  ;;  %v5215_v44 = vld [vmem:[%s6762_s12] sm:$0xff]  }
 0xca3   :  { %vm1198_vm14 = vmand %vm1189_vm0, %vm1195_vm7  ;;  %vm6816_vm0 = vcmp.lt.s32.totalorder %v5604_v33, 16  ;;  %v1550_v49 = vsel %vm1549_vm9, 1, %v5434_v12  ;;  %vm6788_vm9 = vcmp.lt.s32.totalorder %v5604_v33, 22 }
 0xca4   :  { %vm1201_vm8 = vmor %vm1184_vm10, %vm1198_vm14  ;;  %v5965_v52 = vrot.slane %v1550_v49, %v1553_v48  ;;  %v5216_v48 = vld [vmem:[%s6762_s12 + $0x10] sm:$0xff]   ;;  %v5217_v49 = vld [vmem:[%s6762_s12 + $0x28] sm:$0xff]  }
 0xca5   :  { %vm1204_vm15 = vmand %vm1174_vm11, %vm1201_vm8  ;;  %vm1258_vm11 = vcmp.lt.s32.totalorder %v5903_v34, 22  ;;  %4931 = vmatprep.subr.bf16.mxu0 %v5216_v48 }
 0xca6   :  { %vm1263_vm5 = vmand %vm6815_vm13, %vm6814_vm3  ;;  %v4441_v50 = vsel %vm1204_vm15, 1.0, %v5432_v1  ;;  %vm6817_vm3 = vcmp.ge.s32.totalorder %v5604_v33, 4  ;;  %vm6786_vm15 = vcmp.ge.s32.totalorder %v5604_v33, 11  ;;  %4932 = vmatpush3.bf16.msra.mxu0 %v5216_v48 }
 0xca7   :  { %vm1266_vm7 = vmand %vm1263_vm5, %vm6816_vm0  ;;  %vm6818_vm5 = vcmp.lt.s32.totalorder %v5604_v33, 8  ;;  %vm6822_vm0 = vcmask 130048  }
 0xca8   :  { %vm1276_vm12 = vmand %vm1270_vm1, %vm1273_vm4  ;;  %vm6821_vm1 = vcmp.ge.s32.totalorder %v5910_v36, %v5877_v29 }
 0xca9   :  { %vm1290_vm10 = vmand %vm1281_vm2, %vm1287_vm6  ;;  %vm5969_vm2 = vcmp.eq.s32.totalorder %v4454_v10, %v1328_v38 }
 0xcaa   :  { %vm1293_vm14 = vmor %vm1276_vm12, %vm1290_vm10  ;;  %v6820_v54 = vsel %vm5969_vm2, 4294967295, %v6819_v54  ;;  %vm6826_vm10 = vmmov 0   ;;  %vm6831_vm2 = vcmask 130048  }
 0xcab   :  { %vm1296_vm8 = vmand %vm1266_vm7, %vm1293_vm14  ;;  %vm6823_vm7 = vcmp.lt.s32.totalorder %v5910_v36, %v5879_v30 }
 0xcac   :  { %v4452_v47 = vsel %vm1296_vm8, 1.0, %v5432_v1  ;;  %vm1310_vm13 = vmand %vm1258_vm11, %vm6817_vm3  ;;  %vm1545_vm8 = vcmp.le.s32.totalorder %v5604_v33, %v5903_v34  ;;  %vm6787_vm3 = vcmp.eq.s32.totalorder %v5965_v52, 1 }
 0xcad   :  { %v1305_v53 = vadd.f32 %v4452_v47, %v4441_v50  ;;  %vm1313_vm6 = vmand %vm1310_vm13, %vm6818_vm5 }
 0xcae   :  { %vm1319_vm4 = vmand %vm1313_vm6, %vm6821_vm1 }
 0xcaf   :  { %4916 = vmatmul.mubr.msk.f32.gmra.mxu0 %vm6822_vm0, %v1305_v53  ;;  %vm5982_vm12 = vmand %vm1319_vm4, %vm6823_vm7  ;;  %vm1271_vm4 = vcmp.lt.s32.totalorder %v5910_v36, %v5877_v29  ;;  %vm1274_vm0 = vcmp.eq.s32.totalorder %v4448_v40, %v5910_v36  ;;  %vm6829_vm7 = vcmp.ge.s32.totalorder %v5604_v33, 8 }
 0xcb0   :  { %4918 = vmatprep.mubr.msk.f32.mxu0 %vm6826_vm10, %v5432_v1  ;;  %vm1535_vm13 = vmand %vm1258_vm11, %vm6786_vm15 }
 0xcb1   :  { %vm1539_vm5 = vmand %vm1535_vm13, %vm6788_vm9  ;;  %vm1282_vm13 = vcmp.ge.s32.totalorder %v5910_v36, %v5879_v30 }
 0xcb2   :  { %vm1548_vm6 = vmand %vm1539_vm5, %vm1545_vm8  ;;  %vm1288_vm8 = vcmp.eq.s32.totalorder %v4448_v40, %v4451_v57  ;;  %vm6830_vm5 = vcmp.lt.s32.totalorder %v5604_v33, 16 }
 0xcb3   :  { %vm6004_vm1 = vmand %vm1548_vm6, %vm6787_vm3 }
 0xcb4   :  { %v6828_v41 = vsel %vm6004_vm1, 4294967295, %v6827_v41  ;;  %vm1264_vm15 = vmand %vm1258_vm11, %vm6829_vm7  ;;  %vm6832_vm11 = vnez %v6807_v26  ;;  %vm6833_vm7 = vnez %v6809_v27 }
 0xcb5   :  { %vm1267_vm6 = vmand %vm1264_vm15, %vm6830_vm5 }
 0xcb6   :  { %vm1277_vm3 = vmand %vm1271_vm4, %vm1274_vm0  ;;  %vm1608_vm4 = vcmask 259072  }
 0xcb7   :  { %vm1291_vm9 = vmand %vm1282_vm13, %vm1288_vm8 }
 0xcb8   :  { %vm1294_vm14 = vmor %vm1277_vm3, %vm1291_vm9  ;;  %vm6835_vm9 = vcmask 64512  }
 0xcb9   :  { %vm1297_vm1 = vmand %vm1267_vm6, %vm1294_vm14  ;;  %vm6837_vm14 = vnez %v6820_v54 }
 0xcba   :  { %v4453_v58 = vsel %vm1297_vm1, 1.0, %v5432_v1  ;;  %vm6834_vm15 = vmand %vm6832_vm11, %vm6833_vm7 }
 0xcbb   :  { %4919 = vmatmul.mubr.msk.f32.gmra.mxu0 %vm6831_vm2, %v4453_v58  ;;  %v4442_v61 = vsel %vm6834_vm15, 1.0, %v5432_v1  ;;  %vm6836_vm2 = vmmov %vm6835_vm9 }
 0xcbc   :  { %vm6838_vm3 = vmand %vm5982_vm12, %vm6837_vm14 }
 0xcbd   :  { %v4456_v2 = vsel %vm6838_vm3, 1.0, %v5432_v1  ;;  %vm6839_vm1 = vmmov %vm6836_vm2 }
 0xd56   :  { %v1151_v51 = vpop.f32.mrf.mxu1 }
 0xd57   :  { %v1152_v60 = vadd.f32 %v4433_v59, %v1151_v51 }
 0xd58   :  { %v4895_v62 = vpop.f32.mrf.mxu1 }
 0xd59   :  { %4898 = vmatpush3.msra.mxu1 %v1152_v60  ;;  %v4471_v62 = vld [vmem:[%s6767_s17] ss:$0 sm:$0xff] }
 0xd5a   :  { %v1154_v63 = vpop.f32.mrf.mxu1  ;;  %4900 = vmatmul.mubr.msk.f32.vlgmr.msra.gmra.mxu1 %vm6835_vm9, %v4442_v61 }
 0xd5b   :  { %4902 = vmatprep.mubr.msk.f32.mxu1 %vm6826_vm10, %v5432_v1  ;;  %v1508_v3 = vpop.f32.mrf.mxu0 }
 0xd5c   :  { %v4896_v0 = vpop.f32.mrf.mxu1 }
 0xd5d   :  { %v4914_v4 = vpop.f32.mrf.mxu0 }
 0xd5e   :  { %4903 = vmatmul.mubr.msk.f32.gmra.mxu1 %vm6836_vm2, %v5943_v42  ;;  %v5213_v42 = vld [vmem:[%s6762_s12 + $0x8] sm:$0xff]  }
 0xd5f   :  { %4905 = vmatprep.mubr.msk.f32.mxu1 %vm6826_vm10, %v5432_v1  ;;  %vm6840_vm10 = vcmask 261120   ;;  %4921 = vmatprep.subr.bf16.mxu1 %v5213_v42 }
 0xd60   :  { %vm6841_vm12 = vmmov %vm6840_vm10  ;;  %4922 = vmatpush3.bf16.msra.mxu1 %v5213_v42 }
 0xd61   :  { %vm6842_vm0 = vmmov %vm6840_vm10  ;;  %4923 = vmatprep.subr.bf16.mxu1 %v5215_v44 }
 0xd62   :  { %4906 = vmatmul.mubr.msk.f32.gmra.mxu1 %vm6839_vm1, %v4456_v2  ;;  %vm6843_vm13 = vmmov %vm6842_vm0 }
 0xd63   :  { %vm6844_vm8 = vmmov %vm6842_vm0 }
 0xd64   :  { %4924 = vmatpush3.bf16.msra.mxu1 %v5215_v44  ;;  %vm6845_vm5 = vmmov %vm6842_vm0 }
 0xd65   :  { %4937 = vmatprep.subr.bf16.mxu1 %v5217_v49  ;;  %vm6846_vm6 = vmmov %vm6842_vm0 }
 0xd66   :  { %vm6847_vm11 = vmmov %vm6842_vm0 }
 0xd67   :  { %vm6848_vm7 = vmmov %vm6842_vm0 }
 0xd68   :  { %vm6849_vm15 = vmmov %vm6842_vm0 }
 0xd69   :  { %vm6850_vm9 = vmmov %vm6842_vm0 }
 0xd6a   :  { %vm6851_vm2 = vmmov %vm6842_vm0 }
 0xd6b   :  { %vm6852_vm14 = vmmov %vm6842_vm0 }
 0xd6c   :  { %vm6853_vm3 = vmmov %vm6842_vm0 }
 0xd6d   :  { %vm6854_vm1 = vmmov %vm6842_vm0 }
 0xd6f   :  { %v1513_v5 = vpop.f32.mrf.mxu0 }
 0xd71   :  { %v4917_v7 = vpop.f32.mrf.mxu0 }
 0xd7b   :  { %v1518_v6 = vpop.f32.mrf.mxu0 }
 0xd7d   :  { %v4920_v8 = vpop.f32.mrf.mxu0 }
 0xe1a   :  { %v1419_v14 = vpop.f32.mrf.mxu1 }
 0xe1b   :  { %v6044_v15 = vadd.f32 %v1508_v3, %v1419_v14  ;;  %v4472_v3 = vld [vmem:[%s6767_s17 + $0x1] ss:$0 sm:$0xff] }
 0xe1c   :  { %v4901_v18 = vpop.f32.mrf.mxu1 }
 0xe1d   :  { %v1602_v19 = vsel %vm6840_vm10, %v6044_v15, 0.0  ;;  %vm6855_vm10 = vmmov %vm6842_vm0 }
 0xe1e   :  { %v1424_v20 = vpop.f32.mrf.mxu1  ;;  %1603 = vadd.xlane.f32.xlu0 %v1602_v19 }
 0xe1f   :  { %v6048_v21 = vadd.f32 %v1513_v5, %v1424_v20 }
 0xe20   :  { %v4904_v22 = vpop.f32.mrf.mxu1 }
 0xe21   :  { %v1605_v23 = vsel %vm6841_vm12, %v6048_v21, 0.0  ;;  %v5218_v22 = vld [vmem:[%s6762_s12 + $0x20] sm:$0xff]   ;;  %vm6856_vm12 = vmmov %vm6842_vm0 }
 0xe22   :  { %v1429_v24 = vpop.f32.mrf.mxu1  ;;  %1606 = vadd.xlane.f32.xlu1 %v1605_v23  ;;  %v4478_v23 = vld [vmem:[%s6767_s17 + $0x3] ss:$0 sm:$0xff] }
 0xe23   :  { %v6052_v17 = vadd.f32 %v1518_v6, %v1429_v24 }
 0xe24   :  { %v4907_v25 = vpop.f32.mrf.mxu1 }
 0xe25   :  { %v1609_v26 = vsel %vm1608_vm4, %v6052_v17, 0.0 }
 0xe26   :  { %1610 = vadd.xlane.f32.xlu0 %v1609_v26 }
 0xea7   :  { %v1604_v27 = vpop.xlane.xlu0 %1603 }
 0xea8   :  { %v1612_v28 = vmul.f32 0.03125, %v1604_v27 }
 0xeaa   :  { %v1615_v29 = vsub.f32 %v6044_v15, %v1612_v28 }
 0xeab   :  { %v1607_v30 = vpop.xlane.xlu1 %1606 }
 0xeac   :  { %v1613_v31 = vmul.f32 0.03125, %v1607_v30  ;;  %v1618_v32 = vmul.f32 %v1615_v29, %v1615_v29 }
 0xeae   :  { %v1616_v10 = vsub.f32 %v6048_v21, %v1613_v31  ;;  %v1621_v34 = vsel %vm6842_vm0, %v1618_v32, 0.0  ;;  %vm2082_vm0 = vcmask 1042432  }
 0xeaf   :  { %1622 = vadd.xlane.f32.xlu1 %v1621_v34  ;;  %v1611_v35 = vpop.xlane.xlu0 %1610 }
 0xeb0   :  { %v1614_v36 = vmul.f32 0.03125, %v1611_v35  ;;  %v1619_v37 = vmul.f32 %v1616_v10, %v1616_v10 }
 0xeb2   :  { %v1617_v38 = vsub.f32 %v6052_v17, %v1614_v36  ;;  %v1624_v39 = vsel %vm6843_vm13, %v1619_v37, 0.0  ;;  %vm6857_vm13 = vmmov %vm6854_vm1 }
 0xeb3   :  { %1625 = vadd.xlane.f32.xlu0 %v1624_v39  ;;  %v4483_v39 = vld [vmem:[%s6767_s17 + $0x4] ss:$0 sm:$0xff] }
 0xeb4   :  { %v1620_v11 = vmul.f32 %v1617_v38, %v1617_v38 }
 0xeb6   :  { %v1627_v40 = vsel %vm1608_vm4, %v1620_v11, 0.0 }
 0xeb7   :  { %1628 = vadd.xlane.f32.xlu1 %v1627_v40 }
 0xf38   :  { %v1623_v50 = vpop.xlane.xlu1 %1622 }
 0xf39   :  { %v1630_v47 = vmul.f32 0.03125, %v1623_v50 }
 0xf3b   :  { %v1633_v53 = vadd.f32 1e-05, %v1630_v47 }
 0xf3c   :  { %v1626_v54 = vpop.xlane.xlu0 %1625 }
 0xf3d   :  { %5267 = vrsqrt.f32 %v1633_v53  ;;  %v1631_v12 = vmul.f32 0.03125, %v1626_v54 }
 0xf3f   :  { %v1634_v57 = vadd.f32 1e-05, %v1631_v12 }
 0xf40   :  { %v1629_v58 = vpop.xlane.xlu1 %1628 }
 0xf41   :  { %5269 = vrsqrt.f32 %v1634_v57  ;;  %v1632_v59 = vmul.f32 0.03125, %v1629_v58 }
 0xf43   :  { %v1635_v51 = vadd.f32 1e-05, %v1632_v59 }
 0xf45   :  { %5271 = vrsqrt.f32 %v1635_v51 }
 0xf4a   :  { %v5268_v60 = vpop.eup %5267 }
 0xf4b   :  { %v1639_v61 = vmul.f32 %v5268_v60, %v1615_v29  ;;  %v4473_v29 = vld [vmem:[%s6767_s17 + $0x2] ss:$0 sm:$0xff] }
 0xf4d   :  { %v1646_v2 = vmul.f32 %v4471_v62, %v1639_v61 }
 0xf4e   :  { %v5270_v63 = vpop.eup %5269 }
 0xf4f   :  { %v1640_v0 = vmul.f32 %v5270_v63, %v1616_v10  ;;  %v1653_v6 = vadd.f32 %v4472_v3, %v1646_v2 }
 0xf51   :  { %v1647_v4 = vmul.f32 %v4471_v62, %v1640_v0 }
 0xf52   :  { %v5272_v5 = vpop.eup %5271 }
 0xf53   :  { %v1641_v7 = vmul.f32 %v5272_v5, %v1617_v38  ;;  %v1654_v8 = vadd.f32 %v4472_v3, %v1647_v4 }
 0xf55   :  { %v1648_v14 = vmul.f32 %v4471_v62, %v1641_v7  ;;  %v1656_v18 = vpack.c.bf16 %v1654_v8, %v1653_v6 }
 0xf57   :  { %v1655_v19 = vadd.f32 %v4472_v3, %v1648_v14  ;;  %4925 = vmatprep.mubr.msk.bf16.mxu1 %vm6844_vm8, %v1656_v18  ;;  %4933 = vmatprep.mubr.msk.bf16.mxu0 %vm6845_vm5, %v1656_v18  ;;  %vm6858_vm8 = vmmov %vm6854_vm1 }
 0xf58   :  { %vm6859_vm5 = vmmov %vm6854_vm1 }
 0xf59   :  { %v1657_v20 = vpack.c.bf16 %v1655_v19, %v1655_v19 }
 0xf5b   :  { %4926 = vmatmul.mubr.msk.bf16.vlgmr.msra.gmra.mxu1 %vm6846_vm6, %v1657_v20  ;;  %4934 = vmatmul.mubr.msk.bf16.vlgmr.msra.gmra.mxu0 %vm6847_vm11, %v1657_v20  ;;  %vm6860_vm6 = vmmov %vm6854_vm1  ;;  %vm6861_vm11 = vcmp.ge.s32.totalorder %v5604_v33, 11 }
 0xf5c   :  { %4938 = vmatpush3.bf16.msra.mxu1 %v5217_v49  ;;  %4941 = vmatprep.mubr.msk.bf16.mxu1 %vm6848_vm7, %v1656_v18  ;;  %vm6862_vm7 = vcmp.ge.s32.totalorder %v5816_v9, 11 }
 0xf5d   :  { %4939 = vmatprep.subr.bf16.mxu1 %v5218_v22 }
 0xf60   :  { %4940 = vmatpush3.bf16.msra.mxu1 %v5218_v22 }
 0xf63   :  { %4942 = vmatmul.mubr.msk.bf16.vlgmr.msra.gmra.mxu1 %vm6849_vm15, %v1657_v20  ;;  %vm1534_vm15 = vmand %vm6862_vm7, %vm6861_vm11 }
0x101b   :  { %v4927_v24 = vpop.f32.mrf.mxu1  ;;  %v4935_v25 = vpop.f32.mrf.mxu0 }
0x101c   :  { %v1787_v26 = vadd.f32 %v4935_v25, %v4478_v23  ;;  %v6132_v51 = vadd.f32 %v4927_v24, %v4473_v29 }
0x101d   :  { %v1714_v27 = vpop.f32.mrf.mxu1  ;;  %v1778_v28 = vpop.f32.mrf.mxu0 }
0x101e   :  { %v6098_v30 = vpack.c.bf16 %v1787_v26, %v1787_v26  ;;  %v1715_v31 = vadd.f32 %v4473_v29, %v1714_v27  ;;  %v1779_v42 = vadd.f32 %v4478_v23, %v1778_v28  ;;  %v1858_v8 = vmul.f32 %v5628_v45, %v6132_v51 }
0x101f   :  { %v4928_v32 = vpop.f32.mrf.mxu1  ;;  %v4936_v10 = vpop.f32.mrf.mxu0  ;;  %v1973_v14 = vmul.f32 %v5631_v46, %v6132_v51 }
0x1020   :  { %5161 = vmatprep.subr.msk.bf16.mxu0 %vm6850_vm9, %v6098_v30  ;;  %5163 = vmatprep.subr.msk.bf16.mxu1 %vm6851_vm2, %v6098_v30  ;;  %v6106_v38 = vsel %vm6852_vm14, %v6098_v30, 0  ;;  %v1856_v11 = vmul.f32 %v5628_v45, %v1715_v31  ;;  %v1971_v40 = vmul.f32 %v5631_v46, %v1715_v31  ;;  %v6116_v44 = vmul.f32 %v5648_v55, %v1715_v31 }
0x1021   :  { %v1717_v34 = vpop.f32.mrf.mxu1  ;;  %v1781_v35 = vpop.f32.mrf.mxu0  ;;  %4946 = vmatpush3.bf16.xpose.msra.mxu0 %v6106_v38  ;;  %4954 = vmatpush3.bf16.xpose.msra.mxu1 %v6106_v38  ;;  %v6143_v63 = vmul.f32 %v5651_v56, %v1715_v31  ;;  %v1860_v27 = vpack.c.bf16 %v1858_v8, %v1858_v8  ;;  %v1975_v28 = vpack.c.bf16 %v1973_v14, %v1973_v14  ;;  %vm1525_vm9 = vcmp.lt.s32.totalorder %v5604_v33, 11 }
0x1022   :  { %v1718_v36 = vadd.f32 %v4473_v29, %v1717_v34  ;;  %v1782_v37 = vadd.f32 %v4478_v23, %v1781_v35  ;;  %vm6863_vm2 = vcmp.lt.s32.totalorder %v5816_v9, 11 }
0x1023   :  { %v4943_v43 = vpop.f32.mrf.mxu1  ;;  %vm1527_vm14 = vmand %vm6863_vm2, %vm1525_vm9 }
0x1024   :  { %v1857_v48 = vmul.f32 %v5628_v45, %v1718_v36  ;;  %v1972_v49 = vmul.f32 %v5631_v46, %v1718_v36  ;;  %v6121_v50 = vmul.f32 %v5648_v55, %v1718_v36  ;;  %v6123_v47 = vpack.c.bf16 %v1782_v37, %v1779_v42 }
0x1025   :  { %v6125_v53 = vadd.f32 %v4943_v43, %v4483_v39  ;;  %v1842_v54 = vpop.f32.mrf.mxu1  ;;  %v6128_v12 = vmul.f32 %v5651_v56, %v1718_v36 }
0x1026   :  { %v1859_v57 = vpack.c.bf16 %v1857_v48, %v1856_v11  ;;  %v1974_v58 = vpack.c.bf16 %v1972_v49, %v1971_v40  ;;  %v2194_v59 = vpack.c.bf16 %v6121_v50, %v6116_v44  ;;  %5162 = vmatprep.subr.msk.bf16.mxu0 %vm6853_vm3, %v6123_v47  ;;  %5164 = vmatprep.subr.msk.bf16.mxu1 %vm6854_vm1, %v6123_v47  ;;  %v6149_v7 = vsel %vm6857_vm13, %v6123_v47, 0 }
0x1027   :  { %v4944_v60 = vpop.f32.mrf.mxu1  ;;  %v2071_v61 = vmul.f32 %v5631_v46, %v6125_v53  ;;  %v1966_v62 = vmul.f32 %v5628_v45, %v6125_v53  ;;  %v1843_v0 = vadd.f32 %v4483_v39, %v1842_v54  ;;  %v2359_v6 = vpack.c.bf16 %v6128_v12, %v6143_v63 }
0x1028   :  { %4949 = vmatprep.mubr.msk.bf16.mxu0 %vm6855_vm10, %v1859_v57  ;;  %4957 = vmatprep.mubr.msk.bf16.mxu1 %vm6856_vm12, %v1974_v58  ;;  %v2291_v32 = vmul.f32 %v5648_v55, %v6125_v53  ;;  %vm1543_vm3 = vcmp.le.s32.totalorder %v5604_v33, %v5672_v13  ;;  %vm6864_vm1 = vcmp.lt.s32.totalorder %v5604_v33, 22 }
0x1029   :  { %v1845_v2 = vpop.f32.mrf.mxu1  ;;  %v2075_v3 = vpack.c.bf16 %v2071_v61, %v2071_v61  ;;  %v1970_v4 = vpack.c.bf16 %v1966_v62, %v1966_v62  ;;  %4948 = vmatpush3.bf16.xpose.msra.mxu0 %v6149_v7  ;;  %4956 = vmatpush3.bf16.xpose.msra.mxu1 %v6149_v7  ;;  %v2454_v18 = vmul.f32 %v5651_v56, %v1843_v0  ;;  %vm1538_vm10 = vmand %vm1534_vm15, %vm6864_vm1 }
0x102a   :  { %v1846_v5 = vadd.f32 %v4483_v39, %v1845_v2  ;;  %v2289_v20 = vmul.f32 %v5648_v55, %v1843_v0  ;;  %v2069_v29 = vmul.f32 %v5631_v46, %v1843_v0  ;;  %v1964_v31 = vmul.f32 %v5628_v45, %v1843_v0  ;;  %vm1546_vm12 = vmand %vm1525_vm9, %vm1543_vm3 }
0x102b   :  { %5165 = vmatprep.subr.msk.bf16.mxu0 %vm2082_vm0, %v2075_v3  ;;  %5166 = vmatprep.subr.msk.bf16.mxu1 %vm2082_vm0, %v1970_v4  ;;  %v2084_v10 = vsel %vm2082_vm0, %v2075_v3, 0  ;;  %v2141_v34 = vsel %vm2082_vm0, %v1970_v4, 0  ;;  %v6179_v37 = vpack.c.bf16 %v2291_v32, %v2291_v32  ;;  %vm1541_vm13 = vmor %vm1527_vm14, %vm1538_vm10  ;;  %vm6867_vm15 = vnez %v6828_v41 }
0x102c   :  { %v2455_v19 = vmul.f32 %v5651_v56, %v1846_v5  ;;  %v2290_v22 = vmul.f32 %v5648_v55, %v1846_v5  ;;  %v2070_v23 = vmul.f32 %v5631_v46, %v1846_v5  ;;  %v1965_v24 = vmul.f32 %v5628_v45, %v1846_v5 }
0x102d   :  { %vm1929_vm9 = vcmask 179200   ;;  %vm1936_vm14 = vcmask 177152   ;;  %vm6868_vm3 = vcmask 261120  }
0x102e   :  { %v6167_v25 = vpack.c.bf16 %v2455_v19, %v2454_v18  ;;  %v6169_v26 = vpack.c.bf16 %v2290_v22, %v2289_v20  ;;  %v2074_v35 = vpack.c.bf16 %v2070_v23, %v2069_v29  ;;  %v1969_v36 = vpack.c.bf16 %v1965_v24, %v1964_v31  ;;  %vm6869_vm1 = vmmov %vm6868_vm3 }
0x102f   :  { %vm6870_vm10 = vmmov %vm6869_vm1 }
0x1030   :  { %4950 = vmatmul.mubr.msk.bf16.vlgmr.msra.gmra.mxu0 %vm6858_vm8, %v1860_v27  ;;  %4958 = vmatmul.mubr.msk.bf16.vlgmr.msra.gmra.mxu1 %vm6859_vm5, %v1975_v28  ;;  %vm1544_vm8 = vcmp.le.s32.totalorder %v5604_v33, %v5816_v9  ;;  %vm6865_vm5 = vcmp.eq.s32.totalorder %v5965_v52, 1  ;;  %v6208_v9 = vsel %vm6867_vm15, 0.0, %v5435_v16  ;;  %vm6879_vm15 = vmmov %vm6869_vm1 }
0x1031   :  { %4962 = vmatpush3.bf16.msra.mxu0 %v2084_v10  ;;  %4970 = vmatpush3.bf16.msra.mxu1 %v2141_v34  ;;  %vm1547_vm11 = vmand %vm1541_vm13, %vm1544_vm8 }
0x1032   :  { %4963 = vmatprep.subr.bf16.mxu0 %v2074_v35  ;;  %4971 = vmatprep.subr.bf16.mxu1 %v1969_v36  ;;  %vm6866_vm7 = vmmov %vm6865_vm5 }
0x1033   :  { %vm1557_vm2 = vmand %vm1547_vm11, %vm6866_vm7 }
0x1034   :  { %v6212_v58 = vsel %vm1557_vm2, 0.0, %v5435_v16  ;;  %vm6872_vm13 = vmmov %vm6869_vm1 }
0x1035   :  { %4964 = vmatpush3.bf16.msra.mxu0 %v2074_v35  ;;  %4972 = vmatpush3.bf16.msra.mxu1 %v1969_v36  ;;  %vm6873_vm8 = vmmov %vm6869_vm1 }
0x1036   :  { %5167 = vmatprep.subr.msk.bf16.mxu0 %vm6860_vm6, %v6098_v30  ;;  %5169 = vmatprep.subr.msk.bf16.mxu1 %vm2082_vm0, %v6179_v37  ;;  %vm1556_vm6 = vmand %vm1546_vm12, %vm6865_vm5 }
0x1037   :  { %v6201_v40 = vsel %vm1556_vm6, 0.0, %v5435_v16  ;;  %vm6871_vm12 = vmmov %vm6869_vm1 }
0x1038   :  { %vm6874_vm5 = vmmov %vm6869_vm1 }
0x1039   :  { %vm6875_vm6 = vmmov %vm6869_vm1 }
0x103a   :  { %vm6876_vm11 = vmmov %vm6869_vm1 }
0x103b   :  { %vm6877_vm7 = vmmov %vm6869_vm1 }
0x103c   :  { %vm6878_vm2 = vmmov %vm6869_vm1 }
0x10f0   :  { %v4951_v39 = vpop.f32.mrf.mxu0  ;;  %v4959_v11 = vpop.f32.mrf.mxu1 }
0x10f1   :  { %v2032_v13 = vmul.f32 0.35355338, %v4959_v11  ;;  %v1925_v34 = vmul.f32 0.35355338, %v4951_v39 }
0x10f2   :  { %v1909_v42 = vpop.f32.mrf.mxu0  ;;  %v2016_v43 = vpop.f32.mrf.mxu1 }
0x10f3   :  { %v2030_v48 = vmul.f32 0.35355338, %v2016_v43  ;;  %v2035_v62 = vadd.f32 %v2032_v13, %v6208_v9  ;;  %v1923_v28 = vmul.f32 0.35355338, %v1909_v42  ;;  %v1928_v42 = vadd.f32 %v1925_v34, %v6208_v9 }
0x10f4   :  { %v4952_v49 = vpop.f32.mrf.mxu0  ;;  %v4960_v54 = vpop.f32.mrf.mxu1 }
0x10f5   :  { %v2033_v57 = vadd.f32 %v2030_v48, %v6201_v40  ;;  %v2042_v0 = vsel %vm1936_vm14, %v2035_v62, -inf  ;;  %v1926_v36 = vadd.f32 %v1923_v28, %v6201_v40  ;;  %v1937_v13 = vsel %vm1936_vm14, %v1928_v42, -inf }
0x10f6   :  { %v2019_v60 = vpop.f32.mrf.mxu1  ;;  %v1912_v22 = vpop.f32.mrf.mxu0 }
0x10f7   :  { %v2031_v61 = vmul.f32 0.35355338, %v2019_v60  ;;  %v2036_v52 = vsel %vm1929_vm9, %v2033_v57, -inf  ;;  %v1924_v24 = vmul.f32 0.35355338, %v1912_v22  ;;  %v1930_v43 = vsel %vm1929_vm9, %v1926_v36, -inf }
0x10f8   :  { %2037 = vmax.xlane.f32.xlu0 %v2036_v52 }
0x10f9   :  { %v2034_v41 = vadd.f32 %v2031_v61, %v6212_v58  ;;  %v1927_v10 = vadd.f32 %v1924_v24, %v6212_v58 }
0x10fb   :  { %v2039_v2 = vsel %vm1929_vm9, %v2034_v41, -inf  ;;  %v1933_v11 = vsel %vm1929_vm9, %v1927_v10, -inf }
0x10fc   :  { %2043 = vmax.xlane.f32.xlu0 %v2042_v0  ;;  %2040 = vmax.xlane.f32.xlu1 %v2039_v2  ;;  %v2456_v2 = vmul.f32 %v5651_v56, %v6125_v53 }
0x1181   :  { %v2038_v3 = vpop.xlane.xlu0 %2037 }
0x1182   :  { %v2045_v4 = vsub.f32 %v2033_v57, %v2038_v3  ;;  %v2460_v3 = vpack.c.bf16 %v2456_v2, %v2456_v2 }
0x1184   :  { %v2048_v16 = vmul.f32 1.442695, %v2045_v4  ;;  %v2193_v4 = vmul.f32 %v5648_v55, %v6132_v51  ;;  %v2468_v44 = vsel %vm2082_vm0, %v2460_v3, 0 }
0x1185   :  { %v2044_v5 = vpop.xlane.xlu0 %2043  ;;  %v2041_v8 = vpop.xlane.xlu1 %2040 }
0x1186   :  { %5273 = vpow2.f32 %v2048_v16  ;;  %v2047_v14 = vsub.f32 %v2035_v62, %v2044_v5  ;;  %v2046_v18 = vsub.f32 %v2034_v41, %v2041_v8  ;;  %v2195_v16 = vpack.c.bf16 %v2193_v4, %v2193_v4 }
0x1188   :  { %v2052_v19 = vmul.f32 1.442695, %v2047_v14  ;;  %v2050_v20 = vmul.f32 1.442695, %v2046_v18 }
0x118a   :  { %5275 = vpow2.f32 %v2052_v19 }
0x118b   :  { %5277 = vpow2.f32 %v2050_v20 }
0x1193   :  { %v5274_v23 = vpop.eup %5273 }
0x1194   :  { %v2054_v27 = vsel %vm1929_vm9, %v5274_v23, 0.0 }
0x1195   :  { %2055 = vadd.xlane.f32.xlu1 %v2054_v27 }
0x1197   :  { %v5276_v29 = vpop.eup %5275 }
0x1198   :  { %v5278_v31 = vpop.eup %5277  ;;  %v2060_v32 = vsel %vm1936_vm14, %v5276_v29, 0.0 }
0x1199   :  { %2061 = vadd.xlane.f32.xlu1 %v2060_v32  ;;  %v2057_v35 = vsel %vm1929_vm9, %v5278_v31, 0.0 }
0x119a   :  { %2058 = vadd.xlane.f32.xlu0 %v2057_v35 }
0x119d   :  { %1934 = vmax.xlane.f32.xlu1 %v1933_v11 }
0x119e   :  { %1931 = vmax.xlane.f32.xlu0 %v1930_v43 }
0x11a2   :  { %1938 = vmax.xlane.f32.xlu0 %v1937_v13 }
0x121e   :  { %v2056_v48 = vpop.xlane.xlu1 %2055 }
0x121f   :  { %5279 = vrcp.f32 %v2056_v48 }
0x1222   :  { %v2062_v39 = vpop.xlane.xlu1 %2061 }
0x1223   :  { %v2059_v49 = vpop.xlane.xlu0 %2058  ;;  %5281 = vrcp.f32 %v2062_v39 }
0x1224   :  { %5283 = vrcp.f32 %v2059_v49 }
0x1226   :  { %v1935_v5 = vpop.xlane.xlu1 %1934 }
0x1227   :  { %v1932_v53 = vpop.xlane.xlu0 %1931  ;;  %v1941_v14 = vsub.f32 %v1927_v10, %v1935_v5 }
0x1228   :  { %v1940_v18 = vsub.f32 %v1926_v36, %v1932_v53 }
0x1229   :  { %v1945_v20 = vmul.f32 1.442695, %v1941_v14 }
0x122a   :  { %v1943_v22 = vmul.f32 1.442695, %v1940_v18 }
0x122b   :  { %v1939_v19 = vpop.xlane.xlu0 %1938  ;;  %5285 = vpow2.f32 %v1945_v20 }
0x122c   :  { %v5280_v54 = vpop.eup %5279  ;;  %5287 = vpow2.f32 %v1943_v22 }
0x122d   :  { %v2066_v52 = vmul.f32 %v5280_v54, %v5274_v23  ;;  %v1942_v23 = vsub.f32 %v1928_v42, %v1939_v19 }
0x122f   :  { %v1947_v27 = vmul.f32 1.442695, %v1942_v23 }
0x1230   :  { %v5282_v57 = vpop.eup %5281 }
0x1231   :  { %v5284_v60 = vpop.eup %5283  ;;  %v2068_v61 = vmul.f32 %v5282_v57, %v5276_v29  ;;  %5289 = vpow2.f32 %v1947_v27 }
0x1232   :  { %v2067_v62 = vmul.f32 %v5284_v60, %v5278_v31 }
0x1233   :  { %v2073_v41 = vpack.c.bf16 %v2068_v61, %v2068_v61 }
0x1234   :  { %v2072_v0 = vpack.c.bf16 %v2067_v62, %v2066_v52 }
0x1236   :  { %4965 = vmatprep.mubr.msk.bf16.mxu0 %vm1929_vm9, %v2072_v0 }
0x1237   :  { %4966 = vmatmul.mubr.msk.bf16.vlgmr.msra.gmra.mxu0 %vm1929_vm9, %v2073_v41 }
0x1238   :  { %4978 = vmatpush3.bf16.xpose.msra.mxu0 %v6106_v38  ;;  %4981 = vmatprep.mubr.msk.bf16.mxu0 %vm6868_vm3, %v2194_v59  ;;  %v5286_v42 = vpop.eup %5285  ;;  %vm6880_vm3 = vmmov %vm6869_vm1 }
0x1239   :  { %5168 = vmatprep.subr.msk.bf16.mxu0 %vm6869_vm1, %v6123_v47  ;;  %v5288_v39 = vpop.eup %5287  ;;  %v1952_v54 = vsel %vm1929_vm9, %v5286_v42, 0.0 }
0x123a   :  { %v1949_v49 = vsel %vm1929_vm9, %v5288_v39, 0.0 }
0x123e   :  { %v5290_v57 = vpop.eup %5289 }
0x123f   :  { %v1955_v60 = vsel %vm1936_vm14, %v5290_v57, 0.0 }
0x1240   :  { %4980 = vmatpush3.bf16.xpose.msra.mxu0 %v6149_v7 }
0x1241   :  { %5172 = vmatprep.subr.msk.bf16.mxu0 %vm2082_vm0, %v2460_v3 }
0x1247   :  { %4982 = vmatmul.mubr.msk.bf16.vlgmr.msra.gmra.mxu0 %vm6870_vm10, %v2195_v16  ;;  %vm6881_vm10 = vmmov %vm6869_vm1 }
0x1248   :  { %5002 = vmatpush3.bf16.msra.mxu0 %v2468_v44 }
0x1249   :  { %5003 = vmatprep.subr.bf16.mxu0 %v6167_v25 }
0x124c   :  { %5004 = vmatpush3.bf16.msra.mxu0 %v6167_v25 }
0x12f7   :  { %v6247_v50 = vpop.f32.mrf.mxu0 }
0x12f9   :  { %v6249_v59 = vpop.f32.mrf.mxu0 }
0x12fb   :  { %v4968_v8 = vpop.f32.mrf.mxu0 }
0x12fd   :  { %v6251_v24 = vpop.f32.mrf.mxu0 }
0x1307   :  { %v4983_v28 = vpop.f32.mrf.mxu0 }
0x1308   :  { %v2252_v29 = vmul.f32 0.35355338, %v4983_v28 }
0x1309   :  { %v2236_v25 = vpop.f32.mrf.mxu0 }
0x130a   :  { %v2250_v31 = vmul.f32 0.35355338, %v2236_v25  ;;  %v2255_v11 = vadd.f32 %v2252_v29, %v6208_v9 }
0x130b   :  { %v4984_v32 = vpop.f32.mrf.mxu0 }
0x130c   :  { %v2253_v34 = vadd.f32 %v2250_v31, %v6201_v40  ;;  %v2262_v48 = vsel %vm1936_vm14, %v2255_v11, -inf }
0x130d   :  { %v2239_v35 = vpop.f32.mrf.mxu0 }
0x130e   :  { %v2251_v10 = vmul.f32 0.35355338, %v2239_v35  ;;  %v2256_v36 = vsel %vm1929_vm9, %v2253_v34, -inf  ;;  %v2303_v35 = vsel %vm2082_vm0, %v6179_v37, 0 }
0x130f   :  { %2257 = vmax.xlane.f32.xlu1 %v2256_v36 }
0x1310   :  { %v2254_v43 = vadd.f32 %v2251_v10, %v6212_v58 }
0x1312   :  { %v2259_v13 = vsel %vm1929_vm9, %v2254_v43, -inf }
0x1313   :  { %2260 = vmax.xlane.f32.xlu0 %v2259_v13  ;;  %2263 = vmax.xlane.f32.xlu1 %v2262_v48 }
0x1317   :  { %1950 = vadd.xlane.f32.xlu0 %v1949_v49  ;;  %1953 = vadd.xlane.f32.xlu1 %v1952_v54 }
0x131b   :  { %1956 = vadd.xlane.f32.xlu0 %v1955_v60 }
0x1398   :  { %v2258_v61 = vpop.xlane.xlu1 %2257 }
0x1399   :  { %v2265_v52 = vsub.f32 %v2253_v34, %v2258_v61 }
0x139b   :  { %v2268_v62 = vmul.f32 1.442695, %v2265_v52 }
0x139c   :  { %v2261_v41 = vpop.xlane.xlu0 %2260  ;;  %v2264_v0 = vpop.xlane.xlu1 %2263 }
0x139d   :  { %5291 = vpow2.f32 %v2268_v62  ;;  %v2266_v2 = vsub.f32 %v2254_v43, %v2261_v41  ;;  %v2267_v3 = vsub.f32 %v2255_v11, %v2264_v0 }
0x139f   :  { %v2270_v4 = vmul.f32 1.442695, %v2266_v2  ;;  %v2272_v16 = vmul.f32 1.442695, %v2267_v3 }
0x13a0   :  { %v1951_v44 = vpop.xlane.xlu0 %1950  ;;  %v1954_v53 = vpop.xlane.xlu1 %1953 }
0x13a1   :  { %5293 = vpow2.f32 %v2270_v4 }
0x13a2   :  { %5295 = vpow2.f32 %v2272_v16 }
0x13a3   :  { %5297 = vrcp.f32 %v1951_v44 }
0x13a4   :  { %5299 = vrcp.f32 %v1954_v53  ;;  %v1957_v5 = vpop.xlane.xlu0 %1956 }
0x13a5   :  { %5301 = vrcp.f32 %v1957_v5 }
0x13aa   :  { %v5292_v8 = vpop.eup %5291 }
0x13ab   :  { %v2274_v14 = vsel %vm1929_vm9, %v5292_v8, 0.0 }
0x13ac   :  { %2275 = vadd.xlane.f32.xlu1 %v2274_v14 }
0x13ae   :  { %v5294_v18 = vpop.eup %5293 }
0x13af   :  { %v5296_v19 = vpop.eup %5295  ;;  %v2277_v20 = vsel %vm1929_vm9, %v5294_v18, 0.0 }
0x13b0   :  { %v5298_v22 = vpop.eup %5297  ;;  %2278 = vadd.xlane.f32.xlu0 %v2277_v20  ;;  %v2280_v23 = vsel %vm1936_vm14, %v5296_v19, 0.0 }
0x13b1   :  { %v5300_v27 = vpop.eup %5299  ;;  %2281 = vadd.xlane.f32.xlu1 %v2280_v23  ;;  %v1961_v28 = vmul.f32 %v5298_v22, %v5288_v39 }
0x13b2   :  { %v5302_v25 = vpop.eup %5301  ;;  %v1962_v29 = vmul.f32 %v5300_v27, %v5286_v42 }
0x13b3   :  { %v1963_v31 = vmul.f32 %v5302_v25, %v5290_v57 }
0x13b4   :  { %v1967_v32 = vpack.c.bf16 %v1962_v29, %v1961_v28 }
0x13b5   :  { %v1968_v34 = vpack.c.bf16 %v1963_v31, %v1963_v31 }
0x13b6   :  { %4973 = vmatprep.mubr.msk.bf16.mxu1 %vm1929_vm9, %v1967_v32 }
0x13b7   :  { %4974 = vmatmul.mubr.msk.bf16.vlgmr.msra.gmra.mxu1 %vm1929_vm9, %v1968_v34 }
0x13b8   :  { %4986 = vmatpush3.bf16.msra.mxu1 %v2303_v35 }
0x13b9   :  { %4987 = vmatprep.subr.bf16.mxu1 %v6169_v26 }
0x13bc   :  { %4988 = vmatpush3.bf16.msra.mxu1 %v6169_v26 }
0x13bd   :  { %5170 = vmatprep.subr.msk.bf16.mxu1 %vm6871_vm12, %v6098_v30  ;;  %v2358_v30 = vmul.f32 %v5651_v56, %v6132_v51  ;;  %vm6882_vm12 = vcmask 523264  }
0x13bf   :  { %v2360_v26 = vpack.c.bf16 %v2358_v30, %v2358_v30 }
0x1435   :  { %v2276_v10 = vpop.xlane.xlu1 %2275 }
0x1436   :  { %5303 = vrcp.f32 %v2276_v10 }
0x1439   :  { %v2279_v36 = vpop.xlane.xlu0 %2278 }
0x143a   :  { %5305 = vrcp.f32 %v2279_v36  ;;  %v2282_v11 = vpop.xlane.xlu1 %2281 }
0x143b   :  { %5307 = vrcp.f32 %v2282_v11 }
0x1443   :  { %v5304_v43 = vpop.eup %5303 }
0x1444   :  { %v2286_v48 = vmul.f32 %v5304_v43, %v5292_v8 }
0x1447   :  { %v5306_v42 = vpop.eup %5305 }
0x1448   :  { %v5308_v13 = vpop.eup %5307  ;;  %v2287_v39 = vmul.f32 %v5306_v42, %v5294_v18 }
0x1449   :  { %v2288_v37 = vmul.f32 %v5308_v13, %v5296_v19 }
0x144a   :  { %v2292_v49 = vpack.c.bf16 %v2287_v39, %v2286_v48 }
0x144b   :  { %v2293_v54 = vpack.c.bf16 %v2288_v37, %v2288_v37 }
0x144c   :  { %4989 = vmatprep.mubr.msk.bf16.mxu1 %vm1929_vm9, %v2292_v49 }
0x144d   :  { %4990 = vmatmul.mubr.msk.bf16.vlgmr.msra.gmra.mxu1 %vm1929_vm9, %v2293_v54 }
0x144e   :  { %4994 = vmatpush3.bf16.xpose.msra.mxu1 %v6106_v38  ;;  %4997 = vmatprep.mubr.msk.bf16.mxu1 %vm6872_vm13, %v2359_v6  ;;  %vm6883_vm13 = vmmov %vm6882_vm12 }
0x144f   :  { %5171 = vmatprep.subr.msk.bf16.mxu1 %vm6873_vm8, %v6123_v47  ;;  %vm6884_vm8 = vmmov %vm6869_vm1 }
0x1456   :  { %4996 = vmatpush3.bf16.xpose.msra.mxu1 %v6149_v7 }
0x145d   :  { %4998 = vmatmul.mubr.msk.bf16.vlgmr.msra.gmra.mxu1 %vm6874_vm5, %v2360_v26  ;;  %vm6885_vm5 = vmmov %vm6869_vm1 }
0x1477   :  { %v4975_v57 = vpop.f32.mrf.mxu1 }
0x1478   :  { %v2186_v12 = vadd.f32 %v4975_v57, %v6247_v50  ;;  %v5219_v57 = vld [vmem:[%s6763_s13 + $0x8] sm:$0xff]  }
0x1479   :  { %v2177_v60 = vpop.f32.mrf.mxu1  ;;  %5009 = vmatprep.subr.bf16.mxu0 %v5219_v57 }
0x147a   :  { %v2178_v6 = vadd.f32 %v2177_v60, %v6249_v59  ;;  %v5220_v60 = vld [vmem:[%s6763_s13] sm:$0xff]  }
0x147b   :  { %v4976_v61 = vpop.f32.mrf.mxu1 }
0x147d   :  { %v6286_v38 = vpop.f32.mrf.mxu1 }
0x150d   :  { %v4991_v63 = vpop.f32.mrf.mxu1 }
0x150e   :  { %v6290_v52 = vadd.f32 %v4991_v63, %v2186_v12  ;;  %v2181_v63 = vadd.f32 %v6286_v38, %v6251_v24  ;;  %v4508_v38 = vld [vmem:[%s6767_s17 + $0x5] ss:$0 sm:$0xff] }
0x150f   :  { %v2339_v47 = vpop.f32.mrf.mxu1 }
0x1510   :  { %v6292_v7 = vadd.f32 %v2339_v47, %v2178_v6 }
0x1511   :  { %v4992_v62 = vpop.f32.mrf.mxu1 }
0x1513   :  { %v6294_v51 = vpop.f32.mrf.mxu1 }
0x1514   :  { %v2354_v47 = vadd.f32 %v6294_v51, %v2181_v63 }
0x151d   :  { %v4999_v41 = vpop.f32.mrf.mxu1 }
0x151e   :  { %v2417_v2 = vmul.f32 0.35355338, %v4999_v41 }
0x151f   :  { %v2401_v0 = vpop.f32.mrf.mxu1 }
0x1520   :  { %v2415_v3 = vmul.f32 0.35355338, %v2401_v0  ;;  %v2420_v59 = vadd.f32 %v2417_v2, %v6208_v9 }
0x1521   :  { %v5000_v4 = vpop.f32.mrf.mxu1 }
0x1522   :  { %v2418_v16 = vadd.f32 %v2415_v3, %v6201_v40  ;;  %v2427_v8 = vsel %vm1936_vm14, %v2420_v59, -inf }
0x1523   :  { %v2404_v44 = vpop.f32.mrf.mxu1 }
0x1524   :  { %v2416_v50 = vmul.f32 0.35355338, %v2404_v44  ;;  %v2421_v53 = vsel %vm1929_vm9, %v2418_v16, -inf }
0x1525   :  { %2422 = vmax.xlane.f32.xlu0 %v2421_v53 }
0x1526   :  { %v2419_v5 = vadd.f32 %v2416_v50, %v6212_v58 }
0x1528   :  { %v2424_v14 = vsel %vm1929_vm9, %v2419_v5, -inf }
0x1529   :  { %2428 = vmax.xlane.f32.xlu0 %v2427_v8  ;;  %2425 = vmax.xlane.f32.xlu1 %v2424_v14 }
0x15ae   :  { %v2423_v18 = vpop.xlane.xlu0 %2422 }
0x15af   :  { %v2430_v19 = vsub.f32 %v2418_v16, %v2423_v18 }
0x15b1   :  { %v2433_v20 = vmul.f32 1.442695, %v2430_v19 }
0x15b2   :  { %v2429_v22 = vpop.xlane.xlu0 %2428  ;;  %v2426_v23 = vpop.xlane.xlu1 %2425 }
0x15b3   :  { %5309 = vpow2.f32 %v2433_v20  ;;  %v2432_v27 = vsub.f32 %v2420_v59, %v2429_v22  ;;  %v2431_v28 = vsub.f32 %v2419_v5, %v2426_v23 }
0x15b5   :  { %v2437_v25 = vmul.f32 1.442695, %v2432_v27  ;;  %v2435_v29 = vmul.f32 1.442695, %v2431_v28 }
0x15b7   :  { %5311 = vpow2.f32 %v2437_v25 }
0x15b8   :  { %5313 = vpow2.f32 %v2435_v29 }
0x15c0   :  { %v5310_v31 = vpop.eup %5309 }
0x15c1   :  { %v2439_v32 = vsel %vm1929_vm9, %v5310_v31, 0.0 }
0x15c2   :  { %2440 = vadd.xlane.f32.xlu1 %v2439_v32 }
0x15c4   :  { %v5312_v34 = vpop.eup %5311 }
0x15c5   :  { %v5314_v35 = vpop.eup %5313  ;;  %v2445_v10 = vsel %vm1936_vm14, %v5312_v34, 0.0 }
0x15c6   :  { %2446 = vadd.xlane.f32.xlu1 %v2445_v10  ;;  %v2442_v36 = vsel %vm1929_vm9, %v5314_v35, 0.0  ;;  %v5221_v10 = vld [vmem:[%s6764_s14 + $0x8] sm:$0xff]  }
0x15c7   :  { %2443 = vadd.xlane.f32.xlu0 %v2442_v36  ;;  %v5222_v36 = vld [vmem:[%s6764_s14] sm:$0xff]   ;;  %5017 = vmatprep.subr.bf16.mxu1 %v5221_v10 }
0x15c8   :  { %5018 = vmatpush3.bf16.msra.mxu1 %v5221_v10 }
0x15c9   :  { %5019 = vmatprep.subr.bf16.mxu1 %v5222_v36 }
0x15cc   :  { %5020 = vmatpush3.bf16.msra.mxu1 %v5222_v36 }
0x164b   :  { %v2441_v11 = vpop.xlane.xlu1 %2440 }
0x164c   :  { %5315 = vrcp.f32 %v2441_v11 }
0x164f   :  { %v2447_v43 = vpop.xlane.xlu1 %2446 }
0x1650   :  { %v2444_v42 = vpop.xlane.xlu0 %2443  ;;  %5317 = vrcp.f32 %v2447_v43 }
0x1651   :  { %5319 = vrcp.f32 %v2444_v42 }
0x1659   :  { %v5316_v13 = vpop.eup %5315 }
0x165a   :  { %v2451_v49 = vmul.f32 %v5316_v13, %v5310_v31 }
0x165d   :  { %v5318_v48 = vpop.eup %5317 }
0x165e   :  { %v5320_v39 = vpop.eup %5319  ;;  %v2453_v37 = vmul.f32 %v5318_v48, %v5312_v34 }
0x165f   :  { %v2452_v54 = vmul.f32 %v5320_v39, %v5314_v35 }
0x1660   :  { %v2458_v30 = vpack.c.bf16 %v2453_v37, %v2453_v37 }
0x1661   :  { %v2457_v26 = vpack.c.bf16 %v2452_v54, %v2451_v49 }
0x1663   :  { %5005 = vmatprep.mubr.msk.bf16.mxu0 %vm1929_vm9, %v2457_v26 }
0x1664   :  { %5006 = vmatmul.mubr.msk.bf16.vlgmr.msra.gmra.mxu0 %vm1929_vm9, %v2458_v30 }
0x1665   :  { %5010 = vmatpush3.bf16.msra.mxu0 %v5219_v57  ;;  %v4509_v57 = vld [vmem:[%s6767_s17 + $0x6] ss:$0 sm:$0xff] }
0x1666   :  { %5011 = vmatprep.subr.bf16.mxu0 %v5220_v60 }
0x1669   :  { %5012 = vmatpush3.bf16.msra.mxu0 %v5220_v60 }
0x1724   :  { %v5007_v61 = vpop.f32.mrf.mxu0 }
0x1725   :  { %v2520_v62 = vadd.f32 %v5007_v61, %v6290_v52 }
0x1726   :  { %v2504_v12 = vpop.f32.mrf.mxu0 }
0x1727   :  { %v2518_v0 = vadd.f32 %v2504_v12, %v6292_v7  ;;  %v2522_v4 = vpack.c.bf16 %v2520_v62, %v2520_v62 }
0x1728   :  { %v5008_v6 = vpop.f32.mrf.mxu0 }
0x172a   :  { %v2507_v41 = vpop.f32.mrf.mxu0 }
0x172b   :  { %v2519_v2 = vadd.f32 %v2507_v41, %v2354_v47  ;;  %v4510_v47 = vld [vmem:[%s6767_s17 + $0x7] ss:$0 sm:$0xff] }
0x172d   :  { %v2521_v3 = vpack.c.bf16 %v2519_v2, %v2518_v0 }
0x172f   :  { %5013 = vmatprep.mubr.msk.bf16.mxu0 %vm6875_vm6, %v2521_v3  ;;  %vm6886_vm6 = vmmov %vm6869_vm1 }
0x1730   :  { %5014 = vmatmul.mubr.msk.bf16.vlgmr.msra.gmra.mxu0 %vm6876_vm11, %v2522_v4  ;;  %vm6887_vm11 = vmmov %vm6869_vm1 }
0x17f0   :  { %v5015_v16 = vpop.f32.mrf.mxu0 }
0x17f1   :  { %v2591_v50 = vadd.f32 %v5015_v16, %v6052_v17 }
0x17f2   :  { %v2575_v44 = vpop.f32.mrf.mxu0 }
0x17f3   :  { %v2589_v24 = vadd.f32 %v2575_v44, %v6044_v15  ;;  %v6327_v53 = vadd.f32 %v4508_v38, %v2591_v50  ;;  %v5223_v44 = vld [vmem:[%s6765_s15 + $0x18] sm:$0xff]   ;;  %v5224_v50 = vld [vmem:[%s6765_s15 + $0x10] sm:$0xff]  }
0x17f4   :  { %v5016_v52 = vpop.f32.mrf.mxu0  ;;  %5025 = vmatprep.subr.bf16.mxu0 %v5223_v44 }
0x17f5   :  { %v6325_v51 = vadd.f32 %v4508_v38, %v2589_v24  ;;  %v2605_v15 = vsel %vm1608_vm4, %v6327_v53, 0.0  ;;  %5026 = vmatpush3.bf16.msra.mxu0 %v5223_v44  ;;  %v5225_v24 = vld [vmem:[%s6765_s15 + $0x8] sm:$0xff]  }
0x17f6   :  { %v2578_v7 = vpop.f32.mrf.mxu0  ;;  %5027 = vmatprep.subr.bf16.mxu0 %v5224_v50  ;;  %v4511_v52 = vld [vmem:[%s6767_s17 + $0x8] ss:$0 sm:$0xff] }
0x17f7   :  { %v2590_v59 = vadd.f32 %v2578_v7, %v6048_v21  ;;  %v2599_v5 = vsel %vm6877_vm7, %v6325_v51, 0.0  ;;  %vm6888_vm7 = vmmov %vm6869_vm1 }
0x17f8   :  { %2600 = vadd.xlane.f32.xlu0 %v2599_v5 }
0x17f9   :  { %v6332_v8 = vadd.f32 %v4508_v38, %v2590_v59  ;;  %5028 = vmatpush3.bf16.msra.mxu0 %v5224_v50  ;;  %v5226_v38 = vld [vmem:[%s6765_s15] sm:$0xff]  }
0x17fa   :  { %5029 = vmatprep.subr.bf16.mxu0 %v5225_v24 }
0x17fb   :  { %v2602_v17 = vsel %vm6878_vm2, %v6332_v8, 0.0  ;;  %vm6889_vm2 = vmmov %vm6869_vm1 }
0x17fc   :  { %2606 = vadd.xlane.f32.xlu0 %v2605_v15  ;;  %2603 = vadd.xlane.f32.xlu1 %v2602_v17 }
0x17fd   :  { %5030 = vmatpush3.bf16.msra.mxu0 %v5225_v24 }
0x17fe   :  { %5031 = vmatprep.subr.bf16.mxu0 %v5226_v38 }
0x1801   :  { %5032 = vmatpush3.bf16.msra.mxu0 %v5226_v38 }
0x1881   :  { %v2601_v14 = vpop.xlane.xlu0 %2600 }
0x1882   :  { %v2608_v18 = vmul.f32 0.03125, %v2601_v14 }
0x1884   :  { %v2611_v19 = vsub.f32 %v6325_v51, %v2608_v18 }
0x1885   :  { %v2607_v20 = vpop.xlane.xlu0 %2606  ;;  %v2604_v21 = vpop.xlane.xlu1 %2603 }
0x1886   :  { %v2610_v22 = vmul.f32 0.03125, %v2607_v20  ;;  %v2609_v23 = vmul.f32 0.03125, %v2604_v21  ;;  %v2614_v27 = vmul.f32 %v2611_v19, %v2611_v19 }
0x1888   :  { %v2613_v28 = vsub.f32 %v6327_v53, %v2610_v22  ;;  %v2612_v25 = vsub.f32 %v6332_v8, %v2609_v23  ;;  %v2617_v29 = vsel %vm6879_vm15, %v2614_v27, 0.0  ;;  %vm6890_vm15 = vmmov %vm6869_vm1 }
0x1889   :  { %2618 = vadd.xlane.f32.xlu1 %v2617_v29 }
0x188a   :  { %v2616_v31 = vmul.f32 %v2613_v28, %v2613_v28  ;;  %v2615_v32 = vmul.f32 %v2612_v25, %v2612_v25 }
0x188c   :  { %v2623_v34 = vsel %vm1608_vm4, %v2616_v31, 0.0  ;;  %v2620_v35 = vsel %vm6880_vm3, %v2615_v32, 0.0  ;;  %vm6891_vm3 = vmmov %vm6869_vm1 }
0x188d   :  { %2624 = vadd.xlane.f32.xlu1 %v2623_v34  ;;  %2621 = vadd.xlane.f32.xlu0 %v2620_v35 }
0x1912   :  { %v2619_v11 = vpop.xlane.xlu1 %2618 }
0x1913   :  { %v2626_v43 = vmul.f32 0.03125, %v2619_v11 }
0x1915   :  { %v2629_v42 = vadd.f32 1e-05, %v2626_v43 }
0x1916   :  { %v2622_v13 = vpop.xlane.xlu0 %2621  ;;  %v2625_v48 = vpop.xlane.xlu1 %2624 }
0x1917   :  { %5321 = vrsqrt.f32 %v2629_v42  ;;  %v2627_v39 = vmul.f32 0.03125, %v2622_v13  ;;  %v2628_v37 = vmul.f32 0.03125, %v2625_v48 }
0x1919   :  { %v2630_v49 = vadd.f32 1e-05, %v2627_v39  ;;  %v2631_v54 = vadd.f32 1e-05, %v2628_v37 }
0x191b   :  { %5323 = vrsqrt.f32 %v2630_v49 }
0x191c   :  { %5325 = vrsqrt.f32 %v2631_v54 }
0x1924   :  { %v5322_v30 = vpop.eup %5321 }
0x1925   :  { %v2635_v26 = vmul.f32 %v5322_v30, %v2611_v19 }
0x1927   :  { %v2642_v63 = vmul.f32 %v4509_v57, %v2635_v26 }
0x1928   :  { %v5324_v60 = vpop.eup %5323 }
0x1929   :  { %v5326_v61 = vpop.eup %5325  ;;  %v2636_v12 = vmul.f32 %v5324_v60, %v2612_v25  ;;  %v2649_v0 = vadd.f32 %v4510_v47, %v2642_v63 }
0x192a   :  { %v2637_v6 = vmul.f32 %v5326_v61, %v2613_v28 }
0x192b   :  { %v2643_v62 = vmul.f32 %v4509_v57, %v2636_v12 }
0x192c   :  { %v2644_v41 = vmul.f32 %v4509_v57, %v2637_v6 }
0x192d   :  { %v2650_v2 = vadd.f32 %v4510_v47, %v2643_v62  ;;  %v4522_v62 = vld [vmem:[%s6767_s17 + $0x9] ss:$0 sm:$0xff] }
0x192e   :  { %v2651_v3 = vadd.f32 %v4510_v47, %v2644_v41 }
0x192f   :  { %v2652_v4 = vpack.c.bf16 %v2650_v2, %v2649_v0 }
0x1930   :  { %v2653_v16 = vpack.c.bf16 %v2651_v3, %v2651_v3 }
0x1931   :  { %5021 = vmatprep.mubr.msk.bf16.mxu1 %vm6869_vm1, %v2652_v4 }
0x1932   :  { %5022 = vmatmul.mubr.msk.bf16.vlgmr.msra.gmra.mxu1 %vm6881_vm10, %v2653_v16  ;;  %vm6892_vm10 = vmmov %vm6869_vm1 }
0x19f2   :  { %v5023_v7 = vpop.f32.mrf.mxu1 }
0x19f3   :  { %v2719_v59 = vadd.f32 %v5023_v7, %v4511_v52 }
0x19f4   :  { %v2710_v5 = vpop.f32.mrf.mxu1 }
0x19f5   :  { %v2726_v15 = vmul.f32 %v2719_v59, %v2719_v59  ;;  %v2711_v17 = vadd.f32 %v4511_v52, %v2710_v5 }
0x19f6   :  { %v5024_v14 = vpop.f32.mrf.mxu1 }
0x19f7   :  { %v2729_v18 = vmul.f32 %v2726_v15, %v2719_v59  ;;  %v2724_v19 = vmul.f32 %v2711_v17, %v2711_v17 }
0x19f8   :  { %v2713_v20 = vpop.f32.mrf.mxu1 }
0x19f9   :  { %v2732_v21 = vmul.f32 0.044715, %v2729_v18  ;;  %v2727_v22 = vmul.f32 %v2724_v19, %v2711_v17  ;;  %v2714_v23 = vadd.f32 %v4511_v52, %v2713_v20 }
0x19fb   :  { %v2735_v27 = vadd.f32 %v2732_v21, %v2719_v59  ;;  %v2730_v28 = vmul.f32 0.044715, %v2727_v22  ;;  %v2725_v25 = vmul.f32 %v2714_v23, %v2714_v23  ;;  %v5227_v22 = vld [vmem:[%s6762_s12 + $0x38] sm:$0xff]  }
0x19fc   :  { %5037 = vmatprep.subr.bf16.mxu1 %v5227_v22 }
0x19fd   :  { %v2738_v29 = vmul.f32 0.7978846, %v2735_v27  ;;  %v2733_v31 = vadd.f32 %v2730_v28, %v2711_v17  ;;  %v2728_v32 = vmul.f32 %v2725_v25, %v2714_v23  ;;  %v5229_v27 = vld [vmem:[%s6762_s12 + $0x30] sm:$0xff]   ;;  %5038 = vmatpush3.bf16.msra.mxu1 %v5227_v22  ;;  %v5231_v25 = vld [vmem:[%s6762_s12 + $0x48] sm:$0xff]  }
0x19fe   :  { %v5230_v28 = vld [vmem:[%s6762_s12 + $0x50] sm:$0xff]   ;;  %5039 = vmatprep.subr.bf16.mxu1 %v5229_v27 }
0x19ff   :  { %5327 = vtanh.f32 %v2738_v29  ;;  %v2736_v34 = vmul.f32 0.7978846, %v2733_v31  ;;  %v2731_v35 = vmul.f32 0.044715, %v2728_v32 }
0x1a01   :  { %5329 = vtanh.f32 %v2736_v34  ;;  %v2734_v10 = vadd.f32 %v2731_v35, %v2714_v23  ;;  %5040 = vmatpush3.bf16.msra.mxu1 %v5229_v27 }
0x1a02   :  { %5045 = vmatprep.subr.bf16.mxu1 %v5231_v25 }
0x1a03   :  { %v2737_v36 = vmul.f32 0.7978846, %v2734_v10 }
0x1a05   :  { %5331 = vtanh.f32 %v2737_v36 }
0x1a0c   :  { %v5328_v11 = vpop.eup %5327 }
0x1a0d   :  { %v2744_v42 = vadd.f32 1.0, %v5328_v11 }
0x1a0e   :  { %v5330_v43 = vpop.eup %5329 }
0x1a0f   :  { %v2742_v13 = vadd.f32 1.0, %v5330_v43  ;;  %v2747_v39 = vmul.f32 0.5, %v2744_v42 }
0x1a11   :  { %v2745_v37 = vmul.f32 0.5, %v2742_v13  ;;  %v2750_v30 = vmul.f32 %v2747_v39, %v2719_v59 }
0x1a12   :  { %v5332_v48 = vpop.eup %5331 }
0x1a13   :  { %v2743_v49 = vadd.f32 1.0, %v5332_v48  ;;  %v2748_v26 = vmul.f32 %v2745_v37, %v2711_v17  ;;  %v2752_v61 = vpack.c.bf16 %v2750_v30, %v2750_v30  ;;  %v4551_v48 = vld [vmem:[%s6767_s17 + $0xa] ss:$0 sm:$0xff] }
0x1a15   :  { %v2746_v54 = vmul.f32 0.5, %v2743_v49 }
0x1a17   :  { %v2749_v57 = vmul.f32 %v2746_v54, %v2714_v23  ;;  %v5228_v23 = vld [vmem:[%s6762_s12 + $0x58] sm:$0xff]  }
0x1a18   :  { %5053 = vmatprep.subr.bf16.mxu0 %v5228_v23 }
0x1a19   :  { %v2751_v60 = vpack.c.bf16 %v2749_v57, %v2748_v26  ;;  %v4552_v26 = vld [vmem:[%s6767_s17 + $0xb] ss:$0 sm:$0xff] }
0x1a1b   :  { %5033 = vmatprep.mubr.msk.bf16.mxu0 %vm6882_vm12, %v2751_v60  ;;  %vm6893_vm12 = vmmov %vm6869_vm1 }
0x1a1c   :  { %5034 = vmatmul.mubr.msk.bf16.vlgmr.msra.gmra.mxu0 %vm6883_vm13, %v2752_v61  ;;  %vm6894_vm13 = vmmov %vm6869_vm1 }
0x1a1d   :  { %5054 = vmatpush3.bf16.msra.mxu0 %v5228_v23 }
0x1a1e   :  { %5055 = vmatprep.subr.bf16.mxu0 %v5230_v28 }
0x1a21   :  { %5056 = vmatpush3.bf16.msra.mxu0 %v5230_v28 }
0x1adc   :  { %v5035_v12 = vpop.f32.mrf.mxu0 }
0x1add   :  { %v2833_v6 = vadd.f32 %v5035_v12, %v6327_v53 }
0x1ade   :  { %v2817_v63 = vpop.f32.mrf.mxu0 }
0x1adf   :  { %v2831_v47 = vadd.f32 %v2817_v63, %v6325_v51  ;;  %v6382_v3 = vadd.f32 %v4522_v62, %v2833_v6 }
0x1ae0   :  { %v5036_v41 = vpop.f32.mrf.mxu0 }
0x1ae1   :  { %v6380_v0 = vadd.f32 %v4522_v62, %v2831_v47  ;;  %v2891_v51 = vsel %vm1608_vm4, %v6382_v3, 0.0 }
0x1ae2   :  { %v2820_v2 = vpop.f32.mrf.mxu0 }
0x1ae3   :  { %v2832_v4 = vadd.f32 %v2820_v2, %v6332_v8  ;;  %v2885_v16 = vsel %vm6884_vm8, %v6380_v0, 0.0  ;;  %vm6895_vm8 = vmmov %vm6869_vm1 }
0x1ae4   :  { %2886 = vadd.xlane.f32.xlu0 %v2885_v16 }
0x1ae5   :  { %v6387_v44 = vadd.f32 %v4522_v62, %v2832_v4  ;;  %v5232_v62 = vld [vmem:[%s6762_s12 + $0x40] sm:$0xff]  }
0x1ae7   :  { %v2888_v53 = vsel %vm6885_vm5, %v6387_v44, 0.0  ;;  %vm6896_vm5 = vmmov %vm6869_vm1 }
0x1ae8   :  { %2892 = vadd.xlane.f32.xlu0 %v2891_v51  ;;  %2889 = vadd.xlane.f32.xlu1 %v2888_v53  ;;  %v4553_v51 = vld [vmem:[%s6767_s17 + $0xc] ss:$0 sm:$0xff] }
0x1b6d   :  { %v2887_v50 = vpop.xlane.xlu0 %2886 }
0x1b6e   :  { %v2894_v24 = vmul.f32 0.03125, %v2887_v50 }
0x1b70   :  { %v2897_v38 = vsub.f32 %v6380_v0, %v2894_v24 }
0x1b71   :  { %v2893_v52 = vpop.xlane.xlu0 %2892  ;;  %v2890_v8 = vpop.xlane.xlu1 %2889 }
0x1b72   :  { %v2896_v7 = vmul.f32 0.03125, %v2893_v52  ;;  %v2895_v59 = vmul.f32 0.03125, %v2890_v8  ;;  %v2900_v5 = vmul.f32 %v2897_v38, %v2897_v38 }
0x1b74   :  { %v2899_v15 = vsub.f32 %v6382_v3, %v2896_v7  ;;  %v2898_v17 = vsub.f32 %v6387_v44, %v2895_v59  ;;  %v2903_v14 = vsel %vm6886_vm6, %v2900_v5, 0.0  ;;  %v4558_v7 = vld [vmem:[%s6767_s17 + $0xd] ss:$0 sm:$0xff]  ;;  %vm6897_vm6 = vmmov %vm6869_vm1 }
0x1b75   :  { %2904 = vadd.xlane.f32.xlu1 %v2903_v14 }
0x1b76   :  { %v2902_v18 = vmul.f32 %v2899_v15, %v2899_v15  ;;  %v2901_v19 = vmul.f32 %v2898_v17, %v2898_v17 }
0x1b78   :  { %v2909_v20 = vsel %vm1608_vm4, %v2902_v18, 0.0  ;;  %v2906_v21 = vsel %vm6887_vm11, %v2901_v19, 0.0  ;;  %vm6898_vm11 = vmmov %vm6869_vm1 }
0x1b79   :  { %2910 = vadd.xlane.f32.xlu1 %v2909_v20  ;;  %2907 = vadd.xlane.f32.xlu0 %v2906_v21 }
0x1bfe   :  { %v2905_v29 = vpop.xlane.xlu1 %2904 }
0x1bff   :  { %v2912_v31 = vmul.f32 0.03125, %v2905_v29 }
0x1c01   :  { %v2915_v32 = vadd.f32 1e-05, %v2912_v31 }
0x1c02   :  { %v2908_v34 = vpop.xlane.xlu0 %2907  ;;  %v2911_v35 = vpop.xlane.xlu1 %2910 }
0x1c03   :  { %5333 = vrsqrt.f32 %v2915_v32  ;;  %v2913_v10 = vmul.f32 0.03125, %v2908_v34  ;;  %v2914_v36 = vmul.f32 0.03125, %v2911_v35 }
0x1c05   :  { %v2916_v11 = vadd.f32 1e-05, %v2913_v10  ;;  %v2917_v43 = vadd.f32 1e-05, %v2914_v36 }
0x1c07   :  { %5335 = vrsqrt.f32 %v2916_v11 }
0x1c08   :  { %5337 = vrsqrt.f32 %v2917_v43 }
0x1c10   :  { %v5334_v42 = vpop.eup %5333 }
0x1c11   :  { %v2921_v13 = vmul.f32 %v5334_v42, %v2897_v38 }
0x1c13   :  { %v2928_v54 = vmul.f32 %v4551_v48, %v2921_v13 }
0x1c14   :  { %v5336_v39 = vpop.eup %5335 }
0x1c15   :  { %v5338_v37 = vpop.eup %5337  ;;  %v2922_v49 = vmul.f32 %v5336_v39, %v2898_v17  ;;  %v2935_v61 = vadd.f32 %v4552_v26, %v2928_v54 }
0x1c16   :  { %v2923_v30 = vmul.f32 %v5338_v37, %v2899_v15  ;;  %v4563_v15 = vld [vmem:[%s6767_s17 + $0xe] ss:$0 sm:$0xff] }
0x1c17   :  { %v2929_v57 = vmul.f32 %v4551_v48, %v2922_v49 }
0x1c18   :  { %v2930_v60 = vmul.f32 %v4551_v48, %v2923_v30 }
0x1c19   :  { %v2936_v12 = vadd.f32 %v4552_v26, %v2929_v57 }
0x1c1a   :  { %v2937_v63 = vadd.f32 %v4552_v26, %v2930_v60 }
0x1c1b   :  { %v2938_v6 = vpack.c.bf16 %v2936_v12, %v2935_v61 }
0x1c1c   :  { %v2939_v47 = vpack.c.bf16 %v2937_v63, %v2937_v63 }
0x1c1d   :  { %5041 = vmatprep.mubr.msk.bf16.mxu1 %vm6888_vm7, %v2938_v6  ;;  %5057 = vmatprep.mubr.msk.bf16.mxu0 %vm6889_vm2, %v2938_v6  ;;  %vm6899_vm7 = vmmov %vm6869_vm1 }
0x1c1e   :  { %5042 = vmatmul.mubr.msk.bf16.vlgmr.msra.gmra.mxu1 %vm6890_vm15, %v2939_v47  ;;  %5058 = vmatmul.mubr.msk.bf16.vlgmr.msra.gmra.mxu0 %vm6891_vm3, %v2939_v47  ;;  %vm6900_vm2 = vmmov %vm6869_vm1 }
0x1c1f   :  { %5046 = vmatpush3.bf16.msra.mxu1 %v5231_v25  ;;  %5049 = vmatprep.mubr.msk.bf16.mxu1 %vm6869_vm1, %v2938_v6  ;;  %vm6901_vm15 = vmmov %vm6869_vm1 }
0x1c20   :  { %5047 = vmatprep.subr.bf16.mxu1 %v5232_v62  ;;  %vm6902_vm3 = vmmov %vm6869_vm1 }
0x1c23   :  { %5048 = vmatpush3.bf16.msra.mxu1 %v5232_v62 }
0x1c26   :  { %5050 = vmatmul.mubr.msk.bf16.vlgmr.msra.gmra.mxu1 %vm6892_vm10, %v2939_v47  ;;  %vm6903_vm10 = vmmov %vm6869_vm1 }
0x1cde   :  { %v5043_v41 = vpop.f32.mrf.mxu1  ;;  %v5059_v2 = vpop.f32.mrf.mxu0 }
0x1cdf   :  { %v6455_v35 = vadd.f32 %v5059_v2, %v4563_v15  ;;  %v6492_v61 = vadd.f32 %v5043_v41, %v4553_v51 }
0x1ce0   :  { %v2996_v4 = vpop.f32.mrf.mxu1  ;;  %v3124_v16 = vpop.f32.mrf.mxu0 }
0x1ce1   :  { %v2997_v53 = vadd.f32 %v4553_v51, %v2996_v4  ;;  %v3125_v21 = vadd.f32 %v4563_v15, %v3124_v16  ;;  %v3351_v57 = vmul.f32 %v5631_v46, %v6455_v35  ;;  %v3246_v60 = vmul.f32 %v5628_v45, %v6455_v35 }
0x1ce2   :  { %v5044_v50 = vpop.f32.mrf.mxu1  ;;  %v5060_v24 = vpop.f32.mrf.mxu0  ;;  %v3140_v47 = vmul.f32 %v5628_v45, %v6492_v61  ;;  %v3253_v62 = vmul.f32 %v5631_v46, %v6492_v61 }
0x1ce3   :  { %v3138_v59 = vmul.f32 %v5628_v45, %v2997_v53  ;;  %v3251_v17 = vmul.f32 %v5631_v46, %v2997_v53  ;;  %v6446_v20 = vmul.f32 %v5648_v55, %v2997_v53  ;;  %v6458_v10 = vmul.f32 %v5651_v56, %v2997_v53 }
0x1ce4   :  { %v2999_v38 = vpop.f32.mrf.mxu1  ;;  %v3127_v8 = vpop.f32.mrf.mxu0  ;;  %v3733_v42 = vmul.f32 %v5651_v56, %v3125_v21  ;;  %v3568_v48 = vmul.f32 %v5648_v55, %v3125_v21  ;;  %v3355_v63 = vpack.c.bf16 %v3351_v57, %v3351_v57  ;;  %v3250_v6 = vpack.c.bf16 %v3246_v60, %v3246_v60 }
0x1ce5   :  { %v3000_v52 = vadd.f32 %v4553_v51, %v2999_v38  ;;  %v3128_v22 = vadd.f32 %v4563_v15, %v3127_v8  ;;  %v3142_v4 = vpack.c.bf16 %v3140_v47, %v3140_v47  ;;  %v3255_v16 = vpack.c.bf16 %v3253_v62, %v3253_v62 }
0x1ce6   :  { %v5051_v5 = vpop.f32.mrf.mxu1  ;;  %v3349_v51 = vmul.f32 %v5631_v46, %v3125_v21  ;;  %v3244_v53 = vmul.f32 %v5628_v45, %v3125_v21  ;;  %v3570_v50 = vmul.f32 %v5648_v55, %v6455_v35  ;;  %v3363_v24 = vsel %vm2082_vm0, %v3355_v63, 0 }
0x1ce7   :  { %v3139_v14 = vmul.f32 %v5628_v45, %v3000_v52  ;;  %v3252_v18 = vmul.f32 %v5631_v46, %v3000_v52  ;;  %v6443_v19 = vmul.f32 %v5648_v55, %v3000_v52  ;;  %v3069_v23 = vadd.f32 %v5051_v5, %v4558_v7 }
0x1ce8   :  { %v3060_v27 = vpop.f32.mrf.mxu1  ;;  %v6449_v28 = vmul.f32 %v5651_v56, %v3000_v52  ;;  %v3734_v13 = vmul.f32 %v5651_v56, %v3128_v22  ;;  %v3569_v37 = vmul.f32 %v5648_v55, %v3128_v22  ;;  %v3350_v41 = vmul.f32 %v5631_v46, %v3128_v22 }
0x1ce9   :  { %v3141_v25 = vpack.c.bf16 %v3139_v14, %v3138_v59  ;;  %v3254_v29 = vpack.c.bf16 %v3252_v18, %v3251_v17  ;;  %v6451_v31 = vpack.c.bf16 %v3069_v23, %v3069_v23  ;;  %v3473_v34 = vpack.c.bf16 %v6443_v19, %v6446_v20 }
0x1cea   :  { %v5052_v32 = vpop.f32.mrf.mxu1  ;;  %v3061_v36 = vadd.f32 %v4558_v7, %v3060_v27  ;;  %v3638_v49 = vpack.c.bf16 %v6449_v28, %v6458_v10  ;;  %v6478_v54 = vpack.c.bf16 %v3734_v13, %v3733_v42  ;;  %v6482_v26 = vpack.c.bf16 %v3569_v37, %v3568_v48 }
0x1ceb   :  { %5065 = vmatprep.mubr.msk.bf16.mxu1 %vm6893_vm12, %v3141_v25  ;;  %5073 = vmatprep.mubr.msk.bf16.mxu0 %vm6894_vm13, %v3254_v29  ;;  %v6468_v43 = vsel %vm6897_vm6, %v6451_v31, 0  ;;  %v3245_v2 = vmul.f32 %v5628_v45, %v3128_v22  ;;  %v3420_v38 = vsel %vm2082_vm0, %v3250_v6, 0  ;;  %v3354_v52 = vpack.c.bf16 %v3350_v41, %v3349_v51  ;;  %vm6904_vm12 = vmmov %vm6869_vm1 }
0x1cec   :  { %5173 = vmatprep.subr.msk.bf16.mxu1 %vm6895_vm8, %v6451_v31  ;;  %5175 = vmatprep.subr.msk.bf16.mxu0 %vm6896_vm5, %v6451_v31  ;;  %v3063_v11 = vpop.f32.mrf.mxu1  ;;  %v6516_v46 = vpack.c.bf16 %v3570_v50, %v3570_v50  ;;  %vm6905_vm13 = vmmov %vm6869_vm1 }
0x1ced   :  { %v3064_v39 = vadd.f32 %v4558_v7, %v3063_v11  ;;  %5062 = vmatpush3.bf16.xpose.msra.mxu1 %v6468_v43  ;;  %5070 = vmatpush3.bf16.xpose.msra.mxu0 %v6468_v43  ;;  %v3249_v8 = vpack.c.bf16 %v3245_v2, %v3244_v53  ;;  %vm6906_vm8 = vmmov %vm6869_vm1 }
0x1cef   :  { %v6480_v30 = vpack.c.bf16 %v3064_v39, %v3061_v36 }
0x1cf1   :  { %5174 = vmatprep.subr.msk.bf16.mxu1 %vm6898_vm11, %v6480_v30  ;;  %5176 = vmatprep.subr.msk.bf16.mxu0 %vm6899_vm7, %v6480_v30  ;;  %v6496_v12 = vsel %vm6900_vm2, %v6480_v30, 0 }
0x1cf5   :  { %5064 = vmatpush3.bf16.xpose.msra.mxu1 %v6496_v12  ;;  %5072 = vmatpush3.bf16.xpose.msra.mxu0 %v6496_v12 }
0x1cf6   :  { %5177 = vmatprep.subr.msk.bf16.mxu1 %vm2082_vm0, %v3355_v63  ;;  %5178 = vmatprep.subr.msk.bf16.mxu0 %vm2082_vm0, %v3250_v6 }
0x1cfc   :  { %5066 = vmatmul.mubr.msk.bf16.vlgmr.msra.gmra.mxu1 %vm6901_vm15, %v3142_v4  ;;  %5074 = vmatmul.mubr.msk.bf16.vlgmr.msra.gmra.mxu0 %vm6902_vm3, %v3255_v16 }
0x1cfd   :  { %5078 = vmatpush3.bf16.msra.mxu1 %v3363_v24  ;;  %5086 = vmatpush3.bf16.msra.mxu0 %v3420_v38 }
0x1cfe   :  { %5079 = vmatprep.subr.bf16.mxu1 %v3354_v52  ;;  %5087 = vmatprep.subr.bf16.mxu0 %v3249_v8 }
0x1d01   :  { %5080 = vmatpush3.bf16.msra.mxu1 %v3354_v52  ;;  %5088 = vmatpush3.bf16.msra.mxu0 %v3249_v8 }
0x1d02   :  { %5179 = vmatprep.subr.msk.bf16.mxu1 %vm6869_vm1, %v6451_v31  ;;  %5181 = vmatprep.subr.msk.bf16.mxu0 %vm2082_vm0, %v6516_v46 }
0x1dbc   :  { %v5067_v45 = vpop.f32.mrf.mxu1  ;;  %v5075_v7 = vpop.f32.mrf.mxu0 }
0x1dbd   :  { %v3312_v15 = vmul.f32 0.35355338, %v5075_v7  ;;  %v3207_v50 = vmul.f32 0.35355338, %v5067_v45 }
0x1dbe   :  { %v3191_v59 = vpop.f32.mrf.mxu1  ;;  %v3296_v5 = vpop.f32.mrf.mxu0 }
0x1dbf   :  { %v3310_v17 = vmul.f32 0.35355338, %v3296_v5  ;;  %v3315_v25 = vadd.f32 %v3312_v15, %v6208_v9  ;;  %v3205_v2 = vmul.f32 0.35355338, %v3191_v59  ;;  %v3210_v7 = vadd.f32 %v3207_v50, %v6208_v9 }
0x1dc0   :  { %v5068_v14 = vpop.f32.mrf.mxu1  ;;  %v5076_v18 = vpop.f32.mrf.mxu0 }
0x1dc1   :  { %v3313_v21 = vadd.f32 %v3310_v17, %v6201_v40  ;;  %v3322_v32 = vsel %vm1936_vm14, %v3315_v25, -inf  ;;  %v3208_v38 = vadd.f32 %v3205_v2, %v6201_v40  ;;  %v3217_v59 = vsel %vm1936_vm14, %v3210_v7, -inf }
0x1dc2   :  { %v3299_v22 = vpop.f32.mrf.mxu0  ;;  %v3194_v6 = vpop.f32.mrf.mxu1 }
0x1dc3   :  { %v3311_v23 = vmul.f32 0.35355338, %v3299_v22  ;;  %v3316_v27 = vsel %vm1929_vm9, %v3313_v21, -inf  ;;  %v3206_v62 = vmul.f32 0.35355338, %v3194_v6  ;;  %v3211_v8 = vsel %vm1929_vm9, %v3208_v38, -inf }
0x1dc4   :  { %3317 = vmax.xlane.f32.xlu0 %v3316_v27 }
0x1dc5   :  { %v3314_v29 = vadd.f32 %v3311_v23, %v6212_v58  ;;  %v3209_v53 = vadd.f32 %v3206_v62, %v6212_v58 }
0x1dc7   :  { %v3319_v36 = vsel %vm1929_vm9, %v3314_v29, -inf  ;;  %v3214_v52 = vsel %vm1929_vm9, %v3209_v53, -inf }
0x1dc8   :  { %3323 = vmax.xlane.f32.xlu0 %v3322_v32  ;;  %3320 = vmax.xlane.f32.xlu1 %v3319_v36  ;;  %v3472_v36 = vmul.f32 %v5648_v55, %v6492_v61 }
0x1e4d   :  { %v3318_v11 = vpop.xlane.xlu0 %3317 }
0x1e4e   :  { %v3325_v42 = vsub.f32 %v3313_v21, %v3318_v11  ;;  %v3474_v11 = vpack.c.bf16 %v3472_v36, %v3472_v36 }
0x1e50   :  { %v3328_v13 = vmul.f32 1.442695, %v3325_v42 }
0x1e51   :  { %v3324_v48 = vpop.xlane.xlu0 %3323  ;;  %v3321_v39 = vpop.xlane.xlu1 %3320 }
0x1e52   :  { %5339 = vpow2.f32 %v3328_v13  ;;  %v3327_v37 = vsub.f32 %v3315_v25, %v3324_v48  ;;  %v3326_v57 = vsub.f32 %v3314_v29, %v3321_v39  ;;  %v3735_v29 = vmul.f32 %v5651_v56, %v6455_v35 }
0x1e54   :  { %v3332_v60 = vmul.f32 1.442695, %v3327_v37  ;;  %v3330_v63 = vmul.f32 1.442695, %v3326_v57  ;;  %v3739_v32 = vpack.c.bf16 %v3735_v29, %v3735_v29 }
0x1e56   :  { %5341 = vpow2.f32 %v3332_v60  ;;  %v3747_v19 = vsel %vm2082_vm0, %v3739_v32, 0 }
0x1e57   :  { %5343 = vpow2.f32 %v3330_v63 }
0x1e5f   :  { %v5340_v47 = vpop.eup %5339 }
0x1e60   :  { %v3334_v41 = vsel %vm1929_vm9, %v5340_v47, 0.0 }
0x1e61   :  { %3335 = vadd.xlane.f32.xlu1 %v3334_v41 }
0x1e63   :  { %v5342_v4 = vpop.eup %5341 }
0x1e64   :  { %v5344_v16 = vpop.eup %5343  ;;  %v3340_v51 = vsel %vm1936_vm14, %v5342_v4, 0.0 }
0x1e65   :  { %3341 = vadd.xlane.f32.xlu1 %v3340_v51  ;;  %v3337_v24 = vsel %vm1929_vm9, %v5344_v16, 0.0 }
0x1e66   :  { %3338 = vadd.xlane.f32.xlu0 %v3337_v24 }
0x1e69   :  { %3215 = vmax.xlane.f32.xlu1 %v3214_v52 }
0x1e6a   :  { %3212 = vmax.xlane.f32.xlu0 %v3211_v8 }
0x1e6e   :  { %3218 = vmax.xlane.f32.xlu0 %v3217_v59 }
0x1eea   :  { %v3336_v5 = vpop.xlane.xlu1 %3335 }
0x1eeb   :  { %5345 = vrcp.f32 %v3336_v5 }
0x1eee   :  { %v3342_v45 = vpop.xlane.xlu1 %3341 }
0x1eef   :  { %v3339_v15 = vpop.xlane.xlu0 %3338  ;;  %5347 = vrcp.f32 %v3342_v45 }
0x1ef0   :  { %5349 = vrcp.f32 %v3339_v15 }
0x1ef2   :  { %v3216_v42 = vpop.xlane.xlu1 %3215 }
0x1ef3   :  { %v3221_v55 = vsub.f32 %v3209_v53, %v3216_v42 }
0x1ef5   :  { %v3225_v37 = vmul.f32 1.442695, %v3221_v55 }
0x1ef7   :  { %5351 = vpow2.f32 %v3225_v37 }
0x1ef8   :  { %v5346_v17 = vpop.eup %5345 }
0x1ef9   :  { %v3346_v22 = vmul.f32 %v5346_v17, %v5340_v47 }
0x1efc   :  { %v5348_v14 = vpop.eup %5347 }
0x1efd   :  { %v5350_v18 = vpop.eup %5349  ;;  %v3348_v21 = vmul.f32 %v5348_v14, %v5342_v4 }
0x1efe   :  { %v3347_v23 = vmul.f32 %v5350_v18, %v5344_v16 }
0x1eff   :  { %v3353_v27 = vpack.c.bf16 %v3348_v21, %v3348_v21 }
0x1f00   :  { %v3352_v25 = vpack.c.bf16 %v3347_v23, %v3346_v22 }
0x1f02   :  { %5081 = vmatprep.mubr.msk.bf16.mxu1 %vm1929_vm9, %v3352_v25 }
0x1f03   :  { %5082 = vmatmul.mubr.msk.bf16.vlgmr.msra.gmra.mxu1 %vm1929_vm9, %v3353_v27 }
0x1f04   :  { %5094 = vmatpush3.bf16.xpose.msra.mxu1 %v6468_v43  ;;  %5097 = vmatprep.mubr.msk.bf16.mxu1 %vm6903_vm10, %v3473_v34  ;;  %v3213_v34 = vpop.xlane.xlu0 %3212  ;;  %vm6918_vm10 = vcmask 523264  }
0x1f05   :  { %5180 = vmatprep.subr.msk.bf16.mxu1 %vm6904_vm12, %v6480_v30  ;;  %v3220_v48 = vsub.f32 %v3208_v38, %v3213_v34  ;;  %v5352_v38 = vpop.eup %5351  ;;  %vm6919_vm12 = vmmov %vm6918_vm10 }
0x1f06   :  { %v3232_v5 = vsel %vm1929_vm9, %v5352_v38, 0.0 }
0x1f07   :  { %v3223_v57 = vmul.f32 1.442695, %v3220_v48 }
0x1f08   :  { %v3219_v39 = vpop.xlane.xlu0 %3218 }
0x1f09   :  { %v3222_v60 = vsub.f32 %v3210_v7, %v3219_v39  ;;  %5353 = vpow2.f32 %v3223_v57 }
0x1f0b   :  { %v3227_v6 = vmul.f32 1.442695, %v3222_v60 }
0x1f0c   :  { %5096 = vmatpush3.bf16.xpose.msra.mxu1 %v6496_v12 }
0x1f0d   :  { %5184 = vmatprep.subr.msk.bf16.mxu1 %vm2082_vm0, %v3739_v32  ;;  %5355 = vpow2.f32 %v3227_v6 }
0x1f13   :  { %5098 = vmatmul.mubr.msk.bf16.vlgmr.msra.gmra.mxu1 %vm6905_vm13, %v3474_v11 }
0x1f14   :  { %5118 = vmatpush3.bf16.msra.mxu1 %v3747_v19 }
0x1f15   :  { %5119 = vmatprep.subr.bf16.mxu1 %v6478_v54 }
0x1f16   :  { %v5354_v7 = vpop.eup %5353 }
0x1f17   :  { %v3229_v59 = vsel %vm1929_vm9, %v5354_v7, 0.0 }
0x1f18   :  { %5120 = vmatpush3.bf16.msra.mxu1 %v6478_v54 }
0x1f1a   :  { %v5356_v45 = vpop.eup %5355 }
0x1f1b   :  { %v3235_v15 = vsel %vm1936_vm14, %v5356_v45, 0.0 }
0x1fc3   :  { %v6556_v20 = vpop.f32.mrf.mxu1 }
0x1fc5   :  { %v6558_v35 = vpop.f32.mrf.mxu1 }
0x1fc7   :  { %v5084_v13 = vpop.f32.mrf.mxu1 }
0x1fc9   :  { %v6560_v63 = vpop.f32.mrf.mxu1 }
0x1fd3   :  { %v5099_v47 = vpop.f32.mrf.mxu1 }
0x1fd4   :  { %v3531_v62 = vmul.f32 0.35355338, %v5099_v47 }
0x1fd5   :  { %v3515_v54 = vpop.f32.mrf.mxu1 }
0x1fd6   :  { %v3529_v41 = vmul.f32 0.35355338, %v3515_v54  ;;  %v3534_v50 = vadd.f32 %v3531_v62, %v6208_v9 }
0x1fd7   :  { %v5100_v2 = vpop.f32.mrf.mxu1 }
0x1fd8   :  { %v3532_v4 = vadd.f32 %v3529_v41, %v6201_v40  ;;  %v3541_v8 = vsel %vm1936_vm14, %v3534_v50, -inf  ;;  %v3582_v41 = vsel %vm2082_vm0, %v6516_v46, 0  ;;  %vm6907_vm0 = vmmov %vm6869_vm1 }
0x1fd9   :  { %v3518_v16 = vpop.f32.mrf.mxu1  ;;  %vm6908_vm5 = vmmov %vm6907_vm0 }
0x1fda   :  { %v3530_v51 = vmul.f32 0.35355338, %v3518_v16  ;;  %v3535_v53 = vsel %vm1929_vm9, %v3532_v4, -inf  ;;  %vm6909_vm6 = vmmov %vm6907_vm0 }
0x1fdb   :  { %3536 = vmax.xlane.f32.xlu1 %v3535_v53  ;;  %vm6912_vm11 = vmmov %vm6907_vm0 }
0x1fdc   :  { %v3533_v24 = vadd.f32 %v3530_v51, %v6212_v58  ;;  %vm6913_vm7 = vmmov %vm6907_vm0 }
0x1fdd   :  { %vm6914_vm2 = vmmov %vm6907_vm0 }
0x1fde   :  { %v3538_v52 = vsel %vm1929_vm9, %v3533_v24, -inf  ;;  %vm6915_vm15 = vmmov %vm6907_vm0 }
0x1fdf   :  { %3539 = vmax.xlane.f32.xlu0 %v3538_v52  ;;  %3542 = vmax.xlane.f32.xlu1 %v3541_v8  ;;  %vm6916_vm3 = vmmov %vm6907_vm0 }
0x1fe0   :  { %vm6917_vm1 = vmmov %vm6907_vm0 }
0x1fe1   :  { %vm6920_vm13 = vmmov %vm6907_vm0 }
0x1fe3   :  { %3230 = vadd.xlane.f32.xlu0 %v3229_v59  ;;  %3233 = vadd.xlane.f32.xlu1 %v3232_v5 }
0x1fe7   :  { %3236 = vadd.xlane.f32.xlu0 %v3235_v15 }
0x2064   :  { %v3537_v17 = vpop.xlane.xlu1 %3536 }
0x2065   :  { %v3544_v14 = vsub.f32 %v3532_v4, %v3537_v17 }
0x2067   :  { %v3547_v18 = vmul.f32 1.442695, %v3544_v14 }
0x2068   :  { %v3540_v21 = vpop.xlane.xlu0 %3539  ;;  %v3543_v22 = vpop.xlane.xlu1 %3542 }
0x2069   :  { %5357 = vpow2.f32 %v3547_v18  ;;  %v3545_v23 = vsub.f32 %v3533_v24, %v3540_v21  ;;  %v3546_v27 = vsub.f32 %v3534_v50, %v3543_v22 }
0x206b   :  { %v3549_v25 = vmul.f32 1.442695, %v3545_v23  ;;  %v3551_v29 = vmul.f32 1.442695, %v3546_v27 }
0x206c   :  { %v3231_v32 = vpop.xlane.xlu0 %3230  ;;  %v3234_v36 = vpop.xlane.xlu1 %3233 }
0x206d   :  { %5359 = vpow2.f32 %v3549_v25 }
0x206e   :  { %5361 = vpow2.f32 %v3551_v29 }
0x206f   :  { %5363 = vrcp.f32 %v3231_v32 }
0x2070   :  { %5365 = vrcp.f32 %v3234_v36  ;;  %v3237_v11 = vpop.xlane.xlu0 %3236 }
0x2071   :  { %5367 = vrcp.f32 %v3237_v11 }
0x2076   :  { %v5358_v19 = vpop.eup %5357 }
0x2077   :  { %v3553_v34 = vsel %vm1929_vm9, %v5358_v19, 0.0 }
0x2078   :  { %3554 = vadd.xlane.f32.xlu1 %v3553_v34 }
0x207a   :  { %v5360_v42 = vpop.eup %5359 }
0x207b   :  { %v5362_v13 = vpop.eup %5361  ;;  %v3556_v55 = vsel %vm1929_vm9, %v5360_v42, 0.0 }
0x207c   :  { %v5364_v48 = vpop.eup %5363  ;;  %3557 = vadd.xlane.f32.xlu0 %v3556_v55  ;;  %v3559_v39 = vsel %vm1936_vm14, %v5362_v13, 0.0 }
0x207d   :  { %v5366_v37 = vpop.eup %5365  ;;  %3560 = vadd.xlane.f32.xlu1 %v3559_v39  ;;  %v3241_v57 = vmul.f32 %v5364_v48, %v5354_v7 }
0x207e   :  { %v5368_v60 = vpop.eup %5367  ;;  %v3242_v6 = vmul.f32 %v5366_v37, %v5352_v38 }
0x207f   :  { %v3243_v47 = vmul.f32 %v5368_v60, %v5356_v45 }
0x2080   :  { %v3247_v54 = vpack.c.bf16 %v3242_v6, %v3241_v57 }
0x2081   :  { %v3248_v62 = vpack.c.bf16 %v3243_v47, %v3243_v47 }
0x2082   :  { %5089 = vmatprep.mubr.msk.bf16.mxu0 %vm1929_vm9, %v3247_v54 }
0x2083   :  { %5090 = vmatmul.mubr.msk.bf16.vlgmr.msra.gmra.mxu0 %vm1929_vm9, %v3248_v62 }
0x2084   :  { %5102 = vmatpush3.bf16.msra.mxu0 %v3582_v41 }
0x2085   :  { %5103 = vmatprep.subr.bf16.mxu0 %v6482_v26 }
0x2088   :  { %5104 = vmatpush3.bf16.msra.mxu0 %v6482_v26 }
0x2089   :  { %5182 = vmatprep.subr.msk.bf16.mxu0 %vm6906_vm8, %v6451_v31  ;;  %v3637_v31 = vmul.f32 %v5651_v56, %v6492_v61  ;;  %vm6921_vm8 = vmmov %vm6907_vm0 }
0x208b   :  { %v3639_v26 = vpack.c.bf16 %v3637_v31, %v3637_v31 }
0x2101   :  { %v3555_v2 = vpop.xlane.xlu1 %3554 }
0x2102   :  { %5369 = vrcp.f32 %v3555_v2 }
0x2105   :  { %v3558_v4 = vpop.xlane.xlu0 %3557 }
0x2106   :  { %5371 = vrcp.f32 %v3558_v4  ;;  %v3561_v16 = vpop.xlane.xlu1 %3560 }
0x2107   :  { %5373 = vrcp.f32 %v3561_v16 }
0x210f   :  { %v5370_v51 = vpop.eup %5369 }
0x2110   :  { %v3565_v24 = vmul.f32 %v5370_v51, %v5358_v19 }
0x2113   :  { %v5372_v53 = vpop.eup %5371 }
0x2114   :  { %v5374_v50 = vpop.eup %5373  ;;  %v3566_v38 = vmul.f32 %v5372_v53, %v5360_v42 }
0x2115   :  { %v3567_v46 = vmul.f32 %v5374_v50, %v5362_v13 }
0x2116   :  { %v3571_v52 = vpack.c.bf16 %v3566_v38, %v3565_v24  ;;  %v5233_v24 = vld [vmem:[%s6763_s13 + $0x18] sm:$0xff]   ;;  %v5234_v38 = vld [vmem:[%s6763_s13 + $0x10] sm:$0xff]  }
0x2117   :  { %v3572_v8 = vpack.c.bf16 %v3567_v46, %v3567_v46  ;;  %5125 = vmatprep.subr.bf16.mxu1 %v5233_v24 }
0x2118   :  { %5105 = vmatprep.mubr.msk.bf16.mxu0 %vm1929_vm9, %v3571_v52 }
0x2119   :  { %5106 = vmatmul.mubr.msk.bf16.vlgmr.msra.gmra.mxu0 %vm1929_vm9, %v3572_v8 }
0x211a   :  { %5110 = vmatpush3.bf16.xpose.msra.mxu0 %v6468_v43  ;;  %5113 = vmatprep.mubr.msk.bf16.mxu0 %vm6907_vm0, %v3638_v49 }
0x211b   :  { %5183 = vmatprep.subr.msk.bf16.mxu0 %vm6908_vm5, %v6480_v30  ;;  %vm6922_vm5 = vmmov %vm6907_vm0 }
0x2122   :  { %5112 = vmatpush3.bf16.xpose.msra.mxu0 %v6496_v12 }
0x2129   :  { %5114 = vmatmul.mubr.msk.bf16.vlgmr.msra.gmra.mxu0 %vm6909_vm6, %v3639_v26  ;;  %vm6924_vm6 = vmmov %vm6907_vm0 }
0x2143   :  { %v5091_v7 = vpop.f32.mrf.mxu0 }
0x2144   :  { %v3465_v28 = vadd.f32 %v5091_v7, %v6556_v20 }
0x2145   :  { %v3456_v59 = vpop.f32.mrf.mxu0 }
0x2146   :  { %v3457_v49 = vadd.f32 %v3456_v59, %v6558_v35 }
0x2147   :  { %v5092_v5 = vpop.f32.mrf.mxu0 }
0x2149   :  { %v6595_v43 = vpop.f32.mrf.mxu0 }
0x214a   :  { %v3460_v8 = vadd.f32 %v6595_v43, %v6560_v63  ;;  %v4588_v43 = vld [vmem:[%s6767_s17 + $0xf] ss:$0 sm:$0xff] }
0x21d9   :  { %v5107_v10 = vpop.f32.mrf.mxu0 }
0x21da   :  { %v6599_v45 = vadd.f32 %v5107_v10, %v3465_v28 }
0x21db   :  { %v3618_v30 = vpop.f32.mrf.mxu0 }
0x21dc   :  { %v6601_v12 = vadd.f32 %v3618_v30, %v3457_v49 }
0x21dd   :  { %v5108_v15 = vpop.f32.mrf.mxu0 }
0x21df   :  { %v6603_v56 = vpop.f32.mrf.mxu0 }
0x21e0   :  { %v3633_v26 = vadd.f32 %v6603_v56, %v3460_v8 }
0x21e9   :  { %v5115_v61 = vpop.f32.mrf.mxu0 }
0x21ea   :  { %v3696_v14 = vmul.f32 0.35355338, %v5115_v61 }
0x21eb   :  { %v3680_v17 = vpop.f32.mrf.mxu0 }
0x21ec   :  { %v3694_v18 = vmul.f32 0.35355338, %v3680_v17  ;;  %v3699_v35 = vadd.f32 %v3696_v14, %v6208_v9 }
0x21ed   :  { %v5116_v21 = vpop.f32.mrf.mxu0 }
0x21ee   :  { %v3697_v22 = vadd.f32 %v3694_v18, %v6201_v40  ;;  %v3706_v29 = vsel %vm1936_vm14, %v3699_v35, -inf }
0x21ef   :  { %v3683_v23 = vpop.f32.mrf.mxu0 }
0x21f0   :  { %v3695_v20 = vmul.f32 0.35355338, %v3683_v23  ;;  %v3700_v27 = vsel %vm1929_vm9, %v3697_v22, -inf }
0x21f1   :  { %3701 = vmax.xlane.f32.xlu0 %v3700_v27 }
0x21f2   :  { %v3698_v25 = vadd.f32 %v3695_v20, %v6212_v58 }
0x21f4   :  { %v3703_v32 = vsel %vm1929_vm9, %v3698_v25, -inf }
0x21f5   :  { %3707 = vmax.xlane.f32.xlu0 %v3706_v29  ;;  %3704 = vmax.xlane.f32.xlu1 %v3703_v32 }
0x227a   :  { %v3702_v36 = vpop.xlane.xlu0 %3701 }
0x227b   :  { %v3709_v11 = vsub.f32 %v3697_v22, %v3702_v36 }
0x227d   :  { %v3712_v19 = vmul.f32 1.442695, %v3709_v11 }
0x227e   :  { %v3708_v34 = vpop.xlane.xlu0 %3707  ;;  %v3705_v40 = vpop.xlane.xlu1 %3704 }
0x227f   :  { %5375 = vpow2.f32 %v3712_v19  ;;  %v3711_v42 = vsub.f32 %v3699_v35, %v3708_v34  ;;  %v3710_v13 = vsub.f32 %v3698_v25, %v3705_v40 }
0x2281   :  { %v3716_v55 = vmul.f32 1.442695, %v3711_v42  ;;  %v3714_v48 = vmul.f32 1.442695, %v3710_v13  ;;  %v5235_v13 = vld [vmem:[%s6764_s14 + $0x18] sm:$0xff]  }
0x2282   :  { %5133 = vmatprep.subr.bf16.mxu0 %v5235_v13 }
0x2283   :  { %5377 = vpow2.f32 %v3716_v55  ;;  %v5236_v55 = vld [vmem:[%s6764_s14 + $0x10] sm:$0xff]   ;;  %5134 = vmatpush3.bf16.msra.mxu0 %v5235_v13 }
0x2284   :  { %5379 = vpow2.f32 %v3714_v48  ;;  %5135 = vmatprep.subr.bf16.mxu0 %v5236_v55 }
0x2287   :  { %5136 = vmatpush3.bf16.msra.mxu0 %v5236_v55 }
0x228c   :  { %v5376_v9 = vpop.eup %5375 }
0x228d   :  { %v3718_v58 = vsel %vm1929_vm9, %v5376_v9, 0.0 }
0x228e   :  { %3719 = vadd.xlane.f32.xlu1 %v3718_v58 }
0x2290   :  { %v5378_v39 = vpop.eup %5377 }
0x2291   :  { %v5380_v37 = vpop.eup %5379  ;;  %v3724_v57 = vsel %vm1936_vm14, %v5378_v39, 0.0  ;;  %vm6911_vm14 = vmmov %vm6907_vm0 }
0x2292   :  { %3725 = vadd.xlane.f32.xlu1 %v3724_v57  ;;  %v3721_v60 = vsel %vm1929_vm9, %v5380_v37, 0.0 }
0x2293   :  { %3722 = vadd.xlane.f32.xlu0 %v3721_v60 }
0x2317   :  { %v3720_v6 = vpop.xlane.xlu1 %3719 }
0x2318   :  { %5381 = vrcp.f32 %v3720_v6 }
0x231b   :  { %v3726_v47 = vpop.xlane.xlu1 %3725 }
0x231c   :  { %v3723_v54 = vpop.xlane.xlu0 %3722  ;;  %5383 = vrcp.f32 %v3726_v47 }
0x231d   :  { %5385 = vrcp.f32 %v3723_v54 }
0x2325   :  { %v5382_v62 = vpop.eup %5381 }
0x2326   :  { %v3730_v16 = vmul.f32 %v5382_v62, %v5376_v9 }
0x2329   :  { %v5384_v41 = vpop.eup %5383 }
0x232a   :  { %v5386_v2 = vpop.eup %5385  ;;  %v3732_v4 = vmul.f32 %v5384_v41, %v5378_v39  ;;  %v4589_v41 = vld [vmem:[%s6767_s17 + $0x10] ss:$0 sm:$0xff] }
0x232b   :  { %v3731_v51 = vmul.f32 %v5386_v2, %v5380_v37 }
0x232c   :  { %v3737_v53 = vpack.c.bf16 %v3732_v4, %v3732_v4 }
0x232d   :  { %v3736_v50 = vpack.c.bf16 %v3731_v51, %v3730_v16 }
0x232f   :  { %5121 = vmatprep.mubr.msk.bf16.mxu1 %vm1929_vm9, %v3736_v50  ;;  %v4590_v50 = vld [vmem:[%s6767_s17 + $0x11] ss:$0 sm:$0xff] }
0x2330   :  { %5122 = vmatmul.mubr.msk.bf16.vlgmr.msra.gmra.mxu1 %vm1929_vm9, %v3737_v53  ;;  %vm6910_vm9 = vmmov %vm6907_vm0 }
0x2331   :  { %5126 = vmatpush3.bf16.msra.mxu1 %v5233_v24 }
0x2332   :  { %5127 = vmatprep.subr.bf16.mxu1 %v5234_v38 }
0x2335   :  { %5128 = vmatpush3.bf16.msra.mxu1 %v5234_v38 }
0x23f0   :  { %v5123_v46 = vpop.f32.mrf.mxu1 }
0x23f1   :  { %v3799_v7 = vadd.f32 %v5123_v46, %v6599_v45 }
0x23f2   :  { %v3783_v52 = vpop.f32.mrf.mxu1 }
0x23f3   :  { %v3797_v5 = vadd.f32 %v3783_v52, %v6601_v12  ;;  %v3801_v49 = vpack.c.bf16 %v3799_v7, %v3799_v7  ;;  %v5237_v7 = vld [vmem:[%s6765_s15 + $0x38] sm:$0xff]  }
0x23f4   :  { %v5124_v31 = vpop.f32.mrf.mxu1  ;;  %5141 = vmatprep.subr.bf16.mxu1 %v5237_v7 }
0x23f6   :  { %v3786_v59 = vpop.f32.mrf.mxu1 }
0x23f7   :  { %v3798_v28 = vadd.f32 %v3786_v59, %v3633_v26  ;;  %v5238_v59 = vld [vmem:[%s6765_s15 + $0x30] sm:$0xff]  }
0x23f9   :  { %v3800_v10 = vpack.c.bf16 %v3798_v28, %v3797_v5  ;;  %v5239_v5 = vld [vmem:[%s6765_s15 + $0x28] sm:$0xff]   ;;  %v5240_v28 = vld [vmem:[%s6765_s15 + $0x20] sm:$0xff]  }
0x23fb   :  { %5129 = vmatprep.mubr.msk.bf16.mxu1 %vm6910_vm9, %v3800_v10  ;;  %v4591_v10 = vld [vmem:[%s6767_s17 + $0x12] ss:$0 sm:$0xff]  ;;  %vm4258_vm9 = vcmp.lt.s32.totalorder %v5604_v33, 64 }
0x23fc   :  { %5130 = vmatmul.mubr.msk.bf16.vlgmr.msra.gmra.mxu1 %vm6911_vm14, %v3801_v49  ;;  %vm4266_vm14 = vcmask 1045504  }
0x23fd   :  { %5142 = vmatpush3.bf16.msra.mxu1 %v5237_v7 }
0x23fe   :  { %5143 = vmatprep.subr.bf16.mxu1 %v5238_v59 }
0x2401   :  { %5144 = vmatpush3.bf16.msra.mxu1 %v5238_v59 }
0x2402   :  { %5145 = vmatprep.subr.bf16.mxu1 %v5239_v5 }
0x2405   :  { %5146 = vmatpush3.bf16.msra.mxu1 %v5239_v5 }
0x2406   :  { %5147 = vmatprep.subr.bf16.mxu1 %v5240_v28 }
0x2409   :  { %5148 = vmatpush3.bf16.msra.mxu1 %v5240_v28 }
0x24bc   :  { %v5131_v30 = vpop.f32.mrf.mxu1 }
0x24bd   :  { %v3870_v61 = vadd.f32 %v5131_v30, %v6382_v3 }
0x24be   :  { %v3854_v15 = vpop.f32.mrf.mxu1 }
0x24bf   :  { %v3868_v63 = vadd.f32 %v3854_v15, %v6380_v0  ;;  %v6636_v17 = vadd.f32 %v4588_v43, %v3870_v61 }
0x24c0   :  { %v5132_v45 = vpop.f32.mrf.mxu1 }
0x24c1   :  { %v6634_v56 = vadd.f32 %v4588_v43, %v3868_v63  ;;  %v3884_v0 = vsel %vm1608_vm4, %v6636_v17, 0.0 }
0x24c2   :  { %v3857_v12 = vpop.f32.mrf.mxu1 }
0x24c3   :  { %v3869_v14 = vadd.f32 %v3857_v12, %v6387_v44  ;;  %v3878_v18 = vsel %vm6912_vm11, %v6634_v56, 0.0 }
0x24c4   :  { %3879 = vadd.xlane.f32.xlu0 %v3878_v18 }
0x24c5   :  { %v6641_v21 = vadd.f32 %v4588_v43, %v3869_v14 }
0x24c7   :  { %v3881_v3 = vsel %vm6913_vm7, %v6641_v21, 0.0 }
0x24c8   :  { %3885 = vadd.xlane.f32.xlu0 %v3884_v0  ;;  %3882 = vadd.xlane.f32.xlu1 %v3881_v3 }
0x254d   :  { %v3880_v22 = vpop.xlane.xlu0 %3879 }
0x254e   :  { %v3887_v23 = vmul.f32 0.03125, %v3880_v22 }
0x2550   :  { %v3890_v20 = vsub.f32 %v6634_v56, %v3887_v23 }
0x2551   :  { %v3886_v27 = vpop.xlane.xlu0 %3885  ;;  %v3883_v44 = vpop.xlane.xlu1 %3882 }
0x2552   :  { %v3889_v35 = vmul.f32 0.03125, %v3886_v27  ;;  %v3888_v25 = vmul.f32 0.03125, %v3883_v44  ;;  %v3893_v29 = vmul.f32 %v3890_v20, %v3890_v20 }
0x2554   :  { %v3892_v32 = vsub.f32 %v6636_v17, %v3889_v35  ;;  %v3891_v36 = vsub.f32 %v6641_v21, %v3888_v25  ;;  %v3896_v11 = vsel %vm6914_vm2, %v3893_v29, 0.0 }
0x2555   :  { %3897 = vadd.xlane.f32.xlu1 %v3896_v11 }
0x2556   :  { %v3895_v19 = vmul.f32 %v3892_v32, %v3892_v32  ;;  %v3894_v34 = vmul.f32 %v3891_v36, %v3891_v36 }
0x2558   :  { %v3902_v40 = vsel %vm1608_vm4, %v3895_v19, 0.0  ;;  %v3899_v42 = vsel %vm6915_vm15, %v3894_v34, 0.0 }
0x2559   :  { %3903 = vadd.xlane.f32.xlu1 %v3902_v40  ;;  %3900 = vadd.xlane.f32.xlu0 %v3899_v42 }
0x25de   :  { %v3898_v48 = vpop.xlane.xlu1 %3897 }
0x25df   :  { %v3905_v9 = vmul.f32 0.03125, %v3898_v48 }
0x25e1   :  { %v3908_v58 = vadd.f32 1e-05, %v3905_v9 }
0x25e2   :  { %v3901_v39 = vpop.xlane.xlu0 %3900  ;;  %v3904_v37 = vpop.xlane.xlu1 %3903 }
0x25e3   :  { %5387 = vrsqrt.f32 %v3908_v58  ;;  %v3906_v57 = vmul.f32 0.03125, %v3901_v39  ;;  %v3907_v60 = vmul.f32 0.03125, %v3904_v37 }
0x25e5   :  { %v3909_v6 = vadd.f32 1e-05, %v3906_v57  ;;  %v3910_v47 = vadd.f32 1e-05, %v3907_v60 }
0x25e7   :  { %5389 = vrsqrt.f32 %v3909_v6 }
0x25e8   :  { %5391 = vrsqrt.f32 %v3910_v47 }
0x25f0   :  { %v5388_v54 = vpop.eup %5387 }
0x25f1   :  { %v3914_v62 = vmul.f32 %v5388_v54, %v3890_v20 }
0x25f3   :  { %v3921_v51 = vmul.f32 %v4589_v41, %v3914_v62 }
0x25f4   :  { %v5390_v2 = vpop.eup %5389 }
0x25f5   :  { %v5392_v4 = vpop.eup %5391  ;;  %v3915_v16 = vmul.f32 %v5390_v2, %v3891_v36  ;;  %v3928_v46 = vadd.f32 %v4590_v50, %v3921_v51  ;;  %v4602_v2 = vld [vmem:[%s6767_s17 + $0x13] ss:$0 sm:$0xff] }
0x25f6   :  { %v3916_v53 = vmul.f32 %v5392_v4, %v3892_v32 }
0x25f7   :  { %v3922_v24 = vmul.f32 %v4589_v41, %v3915_v16 }
0x25f8   :  { %v3923_v38 = vmul.f32 %v4589_v41, %v3916_v53 }
0x25f9   :  { %v3929_v52 = vadd.f32 %v4590_v50, %v3922_v24 }
0x25fa   :  { %v3930_v8 = vadd.f32 %v4590_v50, %v3923_v38 }
0x25fb   :  { %v3931_v31 = vpack.c.bf16 %v3929_v52, %v3928_v46 }
0x25fc   :  { %v3932_v26 = vpack.c.bf16 %v3930_v8, %v3930_v8 }
0x25fd   :  { %5137 = vmatprep.mubr.msk.bf16.mxu0 %vm6916_vm3, %v3931_v31 }
0x25fe   :  { %5138 = vmatmul.mubr.msk.bf16.vlgmr.msra.gmra.mxu0 %vm6917_vm1, %v3932_v26 }
0x26be   :  { %v5139_v49 = vpop.f32.mrf.mxu0 }
0x26bf   :  { %v3998_v30 = vadd.f32 %v5139_v49, %v4591_v10 }
0x26c0   :  { %v3989_v15 = vpop.f32.mrf.mxu0 }
0x26c1   :  { %v4005_v61 = vmul.f32 %v3998_v30, %v3998_v30  ;;  %v3990_v63 = vadd.f32 %v4591_v10, %v3989_v15 }
0x26c2   :  { %v5140_v43 = vpop.f32.mrf.mxu0 }
0x26c3   :  { %v4008_v45 = vmul.f32 %v4005_v61, %v3998_v30  ;;  %v4003_v12 = vmul.f32 %v3990_v63, %v3990_v63  ;;  %v5241_v61 = vld [vmem:[%s6766_s16 + $0x8] sm:$0xff]  }
0x26c4   :  { %v3992_v14 = vpop.f32.mrf.mxu0  ;;  %5153 = vmatprep.subr.bf16.mxu0 %v5241_v61 }
0x26c5   :  { %v4011_v18 = vmul.f32 0.044715, %v4008_v45  ;;  %v4006_v0 = vmul.f32 %v4003_v12, %v3990_v63  ;;  %v3993_v3 = vadd.f32 %v4591_v10, %v3992_v14  ;;  %5154 = vmatpush3.bf16.msra.mxu0 %v5241_v61 }
0x26c7   :  { %v4014_v22 = vadd.f32 %v4011_v18, %v3998_v30  ;;  %v4009_v23 = vmul.f32 0.044715, %v4006_v0  ;;  %v4004_v20 = vmul.f32 %v3993_v3, %v3993_v3 }
0x26c9   :  { %v4017_v27 = vmul.f32 0.7978846, %v4014_v22  ;;  %v4012_v44 = vadd.f32 %v4009_v23, %v3990_v63  ;;  %v4007_v35 = vmul.f32 %v4004_v20, %v3993_v3 }
0x26cb   :  { %5393 = vtanh.f32 %v4017_v27  ;;  %v4015_v25 = vmul.f32 0.7978846, %v4012_v44  ;;  %v4010_v29 = vmul.f32 0.044715, %v4007_v35  ;;  %v4603_v44 = vld [vmem:[%s6767_s17 + $0x14] ss:$0 sm:$0xff] }
0x26cd   :  { %5395 = vtanh.f32 %v4015_v25  ;;  %v4013_v32 = vadd.f32 %v4010_v29, %v3993_v3 }
0x26cf   :  { %v4016_v36 = vmul.f32 0.7978846, %v4013_v32 }
0x26d1   :  { %5397 = vtanh.f32 %v4016_v36 }
0x26d8   :  { %v5394_v11 = vpop.eup %5393 }
0x26d9   :  { %v4023_v34 = vadd.f32 1.0, %v5394_v11  ;;  %v4604_v11 = vld [vmem:[%s6767_s17 + $0x15] ss:$0 sm:$0xff] }
0x26da   :  { %v5396_v19 = vpop.eup %5395 }
0x26db   :  { %v4021_v40 = vadd.f32 1.0, %v5396_v19  ;;  %v4026_v13 = vmul.f32 0.5, %v4023_v34 }
0x26dd   :  { %v4024_v55 = vmul.f32 0.5, %v4021_v40  ;;  %v4029_v58 = vmul.f32 %v4026_v13, %v3998_v30 }
0x26de   :  { %v5398_v42 = vpop.eup %5397 }
0x26df   :  { %v4022_v48 = vadd.f32 1.0, %v5398_v42  ;;  %v4027_v39 = vmul.f32 %v4024_v55, %v3990_v63  ;;  %v4031_v60 = vpack.c.bf16 %v4029_v58, %v4029_v58  ;;  %v5242_v63 = vld [vmem:[%s6766_s16] sm:$0xff]  }
0x26e0   :  { %5155 = vmatprep.subr.bf16.mxu0 %v5242_v63 }
0x26e1   :  { %v4025_v9 = vmul.f32 0.5, %v4022_v48  ;;  %5156 = vmatpush3.bf16.msra.mxu0 %v5242_v63 }
0x26e3   :  { %v4028_v37 = vmul.f32 %v4025_v9, %v3993_v3  ;;  %v4605_v9 = vld [vmem:[%s6767_s17 + $0x16] ss:$0 sm:$0xff] }
0x26e5   :  { %v4030_v57 = vpack.c.bf16 %v4028_v37, %v4027_v39 }
0x26e7   :  { %5149 = vmatprep.mubr.msk.bf16.mxu1 %vm6918_vm10, %v4030_v57  ;;  %vm4332_vm10 = vcmask 7168  }
0x26e8   :  { %5150 = vmatmul.mubr.msk.bf16.vlgmr.msra.gmra.mxu1 %vm6919_vm12, %v4031_v60  ;;  %vm4336_vm12 = vcmask 5120  }
0x27a8   :  { %v5151_v6 = vpop.f32.mrf.mxu1 }
0x27a9   :  { %v4112_v54 = vadd.f32 %v5151_v6, %v6636_v17 }
0x27aa   :  { %v4096_v47 = vpop.f32.mrf.mxu1 }
0x27ab   :  { %v4110_v62 = vadd.f32 %v4096_v47, %v6634_v56  ;;  %v4119_v50 = vadd.f32 %v4602_v2, %v4112_v54 }
0x27ac   :  { %v5152_v41 = vpop.f32.mrf.mxu1 }
0x27ad   :  { %v4117_v4 = vadd.f32 %v4602_v2, %v4110_v62  ;;  %v4128_v38 = vsel %vm1608_vm4, %v4119_v50, 0.0 }
0x27ae   :  { %v4099_v16 = vpop.f32.mrf.mxu1 }
0x27af   :  { %v4111_v51 = vadd.f32 %v4099_v16, %v6641_v21  ;;  %v4122_v53 = vsel %vm6920_vm13, %v4117_v4, 0.0  ;;  %v6730_v16 = vld [vmem:[%s6925_s3 + $0x10] sm:$0x3f]  ;;  %vm4362_vm13 = vcmp.eq.s32.totalorder %v5604_v33, 0 }
0x27b0   :  { %4123 = vadd.xlane.f32.xlu0 %v4122_v53  ;;  %vm4319_vm1 = vcmp.ne.s32.totalorder %v6730_v16, 4294967196 }
0x27b1   :  { %v4118_v24 = vadd.f32 %v4602_v2, %v4111_v51  ;;  %v4256_v51 = vld [vmem:[%s6925_s3 + $0x8] sm:$0xff] }
0x27b2   :  { %vm4318_vm3 = vcmp.ne.s32.totalorder %v4256_v51, 4294967196 }
0x27b3   :  { %v4125_v17 = vsel %vm6921_vm8, %v4118_v24, 0.0  ;;  %vm4365_vm8 = vcmp.eq.s32.totalorder %v5604_v33, 1 }
0x27b4   :  { %4129 = vadd.xlane.f32.xlu0 %v4128_v38  ;;  %4126 = vadd.xlane.f32.xlu1 %v4125_v17 }
0x2839   :  { %v4124_v56 = vpop.xlane.xlu0 %4123 }
0x283a   :  { %v4131_v46 = vmul.f32 0.03125, %v4124_v56 }
0x283c   :  { %v4134_v52 = vsub.f32 %v4117_v4, %v4131_v46  ;;  %v4255_v4 = vld [vmem:[%s6925_s3] sm:$0xff] }
0x283d   :  { %v4130_v8 = vpop.xlane.xlu0 %4129  ;;  %v4127_v31 = vpop.xlane.xlu1 %4126  ;;  %vm4317_vm15 = vcmp.ne.s32.totalorder %v4255_v4, 4294967196 }
0x283e   :  { %v4133_v26 = vmul.f32 0.03125, %v4130_v8  ;;  %v4132_v7 = vmul.f32 0.03125, %v4127_v31  ;;  %v4137_v59 = vmul.f32 %v4134_v52, %v4134_v52 }
0x2840   :  { %v4136_v21 = vsub.f32 %v4119_v50, %v4133_v26  ;;  %v4135_v5 = vsub.f32 %v4118_v24, %v4132_v7  ;;  %v4140_v28 = vsel %vm6907_vm0, %v4137_v59, 0.0 }
0x2841   :  { %4141 = vadd.xlane.f32.xlu1 %v4140_v28 }
0x2842   :  { %v4139_v10 = vmul.f32 %v4136_v21, %v4136_v21  ;;  %v4138_v49 = vmul.f32 %v4135_v5, %v4135_v5 }
0x2844   :  { %v4146_v30 = vsel %vm1608_vm4, %v4139_v10, 0.0  ;;  %v4143_v15 = vsel %vm6922_vm5, %v4138_v49, 0.0  ;;  %vm6923_vm4 = vmmov %vm6907_vm0 }
0x2845   :  { %4147 = vadd.xlane.f32.xlu1 %v4146_v30  ;;  %4144 = vadd.xlane.f32.xlu0 %v4143_v15 }
0x28ca   :  { %v4142_v43 = vpop.xlane.xlu1 %4141 }
0x28cb   :  { %v4149_v45 = vmul.f32 0.03125, %v4142_v43 }
0x28cd   :  { %v4152_v12 = vadd.f32 1e-05, %v4149_v45 }
0x28ce   :  { %v4145_v14 = vpop.xlane.xlu0 %4144  ;;  %v4148_v18 = vpop.xlane.xlu1 %4147 }
0x28cf   :  { %5399 = vrsqrt.f32 %v4152_v12  ;;  %v4150_v0 = vmul.f32 0.03125, %v4145_v14  ;;  %v4151_v3 = vmul.f32 0.03125, %v4148_v18 }
0x28d1   :  { %v4153_v22 = vadd.f32 1e-05, %v4150_v0  ;;  %v4154_v23 = vadd.f32 1e-05, %v4151_v3 }
0x28d3   :  { %5401 = vrsqrt.f32 %v4153_v22 }
0x28d4   :  { %5403 = vrsqrt.f32 %v4154_v23 }
0x28dc   :  { %v5400_v20 = vpop.eup %5399 }
0x28dd   :  { %v4158_v27 = vmul.f32 %v5400_v20, %v4134_v52 }
0x28df   :  { %v4165_v32 = vmul.f32 %v4603_v44, %v4158_v27  ;;  %v4610_v27 = vsel %vm4317_vm15, 1.0, %v5432_v1 }
0x28e0   :  { %v5402_v35 = vpop.eup %5401 }
0x28e1   :  { %v5404_v25 = vpop.eup %5403  ;;  %v4159_v29 = vmul.f32 %v5402_v35, %v4135_v5  ;;  %v4172_v40 = vadd.f32 %v4604_v11, %v4165_v32 }
0x28e2   :  { %v4160_v36 = vmul.f32 %v5404_v25, %v4136_v21  ;;  %v4611_v25 = vsel %vm4318_vm3, 1.0, %v5432_v1 }
0x28e3   :  { %v4166_v19 = vmul.f32 %v4603_v44, %v4159_v29 }
0x28e4   :  { %v4167_v34 = vmul.f32 %v4603_v44, %v4160_v36 }
0x28e5   :  { %v4173_v42 = vadd.f32 %v4604_v11, %v4166_v19 }
0x28e6   :  { %v4174_v13 = vadd.f32 %v4604_v11, %v4167_v34  ;;  %v4612_v11 = vsel %vm4319_vm1, 1.0, %v5432_v1  ;;  %v4348_v34 = vsel %vm4332_vm10, %v4610_v27, 0.0 }
0x28e7   :  { %v4179_v55 = vpack.c.bf16 %v4173_v42, %v4172_v40  ;;  %v4349_v40 = vsel %vm4332_vm10, %v4611_v25, 0.0 }
0x28e8   :  { %v4180_v48 = vpack.c.bf16 %v4174_v13, %v4174_v13 }
0x28e9   :  { %5157 = vmatprep.mubr.msk.bf16.mxu0 %vm6923_vm4, %v4179_v55 }
0x28ea   :  { %5158 = vmatmul.mubr.msk.bf16.vlgmr.msra.gmra.mxu0 %vm6924_vm6, %v4180_v48 }
0x29aa   :  { %v5159_v58 = vpop.f32.mrf.mxu0 }
0x29ab   :  { %v4247_v39 = vadd.f32 %v5159_v58, %v4605_v9  ;;  %v4350_v58 = vadd.f32 %v4349_v40, %v4348_v34 }
0x29ac   :  { %v4238_v37 = vpop.f32.mrf.mxu0 }
0x29ad   :  { %4254 = vst [vmem:[%s6768_s18 + $0x10] sm:$0x3f] %v4247_v39  ;;  %v4239_v57 = vadd.f32 %v4605_v9, %v4238_v37  ;;  %v4261_v54 = vsel %vm4258_vm9, %v4247_v39, -1e+09  ;;  %v4351_v37 = vsel %vm4336_vm12, %v4612_v11, 0.0 }
0x29ae   :  { %v5160_v60 = vpop.f32.mrf.mxu0  ;;  %v4267_v2 = vsel %vm4266_vm14, %v4261_v54, -inf }
0x29af   :  { %4252 = vst [vmem:[%s6768_s18] sm:$0xff] %v4239_v57  ;;  %v4259_v6 = vsel %vm4258_vm9, %v4239_v57, -1e+09 }
0x29b0   :  { %v4241_v47 = vpop.f32.mrf.mxu0  ;;  %4262 = vmax.xlane.f32.xlu0 %v4259_v6 }
0x29b1   :  { %v4242_v62 = vadd.f32 %v4605_v9, %v4241_v47 }
0x29b3   :  { %4253 = vst [vmem:[%s6768_s18 + $0x8] sm:$0xff] %v4242_v62  ;;  %v4260_v41 = vsel %vm4258_vm9, %v4242_v62, -1e+09 }
0x29b4   :  { %4264 = vmax.xlane.f32.xlu1 %v4260_v41  ;;  %4268 = vmax.xlane.f32.xlu0 %v4267_v2 }
0x29c5   :  { %4296 = vperm.xlu1 %5194, %v4255_v4  }
0x29c9   :  { %4302 = vperm.xlu1 %5194, %v6730_v16  }
0x29ca   :  { %4299 = vperm.xlu0 %5195, %v4256_v51  }
0x2a39   :  { %v4263_v53 = vpop.xlane.xlu0 %4262 }
0x2a3a   :  { %v4270_v50 = vsub.f32 %v4259_v6, %v4263_v53  ;;  %v4352_v6 = vadd.f32 %v4351_v37, %v4350_v58 }
0x2a3c   :  { %v4273_v24 = vmul.f32 1.442695, %v4270_v50 }
0x2a3d   :  { %v4265_v38 = vpop.xlane.xlu1 %4264  ;;  %v4269_v17 = vpop.xlane.xlu0 %4268 }
0x2a3e   :  { %5405 = vpow2.f32 %v4273_v24  ;;  %v4271_v56 = vsub.f32 %v4260_v41, %v4265_v38  ;;  %v4272_v46 = vsub.f32 %v4261_v54, %v4269_v17 }
0x2a40   :  { %v4275_v52 = vmul.f32 1.442695, %v4271_v56  ;;  %v4277_v8 = vmul.f32 1.442695, %v4272_v46 }
0x2a41   :  { %v4297_v26 = vpop.permute.xlu1 %4296 }
0x2a42   :  { %5407 = vpow2.f32 %v4275_v52  ;;  %vm4304_vm11 = vcmp.eq.s32.totalorder %v5604_v33, %v4297_v26 }
0x2a43   :  { %5409 = vpow2.f32 %v4277_v8  ;;  %v4307_v10 = vsel %vm4304_vm11, %v4239_v57, 0.0 }
0x2a45   :  { %v4300_v5 = vpop.permute.xlu0 %4299  ;;  %v4303_v28 = vpop.permute.xlu1 %4302 }
0x2a46   :  { %vm4305_vm7 = vcmp.eq.s32.totalorder %v5604_v33, %v4300_v5  ;;  %vm4306_vm2 = vcmp.eq.s32.totalorder %v5604_v33, %v4303_v28 }
0x2a47   :  { %v4308_v49 = vsel %vm4305_vm7, %v4242_v62, 0.0  ;;  %v4309_v30 = vsel %vm4306_vm2, %v4247_v39, 0.0 }
0x2a48   :  { %v4314_v15 = vsel %vm4266_vm14, %v4309_v30, 0.0 }
0x2a4b   :  { %v5406_v31 = vpop.eup %5405 }
0x2a4c   :  { %4279 = vadd.xlane.f32.xlu1 %v5406_v31 }
0x2a4f   :  { %v5408_v7 = vpop.eup %5407 }
0x2a50   :  { %v5410_v59 = vpop.eup %5409  ;;  %4281 = vadd.xlane.f32.xlu0 %v5408_v7 }
0x2a51   :  { %v4283_v21 = vsel %vm4266_vm14, %v5410_v59, 0.0 }
0x2a52   :  { %4284 = vadd.xlane.f32.xlu1 %v4283_v21 }
0x2a56   :  { %4310 = vadd.xlane.f32.xlu1 %v4307_v10 }
0x2a5a   :  { %4312 = vadd.xlane.f32.xlu1 %v4308_v49 }
0x2a5e   :  { %4315 = vadd.xlane.f32.xlu1 %v4314_v15 }
0x2ad5   :  { %v4280_v61 = vpop.xlane.xlu1 %4279 }
0x2ad6   :  { %5411 = vlog2.f32 %v4280_v61 }
0x2ad9   :  { %v4282_v63 = vpop.xlane.xlu0 %4281 }
0x2ada   :  { %5413 = vlog2.f32 %v4282_v63 }
0x2adb   :  { %v4285_v43 = vpop.xlane.xlu1 %4284 }
0x2adc   :  { %5415 = vlog2.f32 %v4285_v43 }
0x2adf   :  { %v4311_v45 = vpop.xlane.xlu1 %4310 }
0x2ae3   :  { %v5412_v12 = vpop.eup %5411  ;;  %v4313_v3 = vpop.xlane.xlu1 %4312 }
0x2ae4   :  { %v4287_v14 = vmul.f32 0.6931472, %v5412_v12 }
0x2ae6   :  { %v4292_v18 = vadd.f32 %v4287_v14, %v4263_v53 }
0x2ae7   :  { %v5414_v0 = vpop.eup %5413  ;;  %v4316_v19 = vpop.xlane.xlu1 %4315 }
0x2ae8   :  { %v4289_v22 = vmul.f32 0.6931472, %v5414_v0  ;;  %v4326_v23 = vsub.f32 %v4292_v18, %v4311_v45 }
0x2ae9   :  { %v5416_v20 = vpop.eup %5415 }
0x2aea   :  { %v4291_v44 = vmul.f32 0.6931472, %v5416_v20  ;;  %v4293_v35 = vadd.f32 %v4289_v22, %v4265_v38  ;;  %v4329_v29 = vmul.f32 %v4610_v27, %v4326_v23 }
0x2aec   :  { %v4327_v32 = vsub.f32 %v4293_v35, %v4313_v3  ;;  %v4294_v36 = vadd.f32 %v4291_v44, %v4269_v17  ;;  %v4333_v55 = vsel %vm4332_vm10, %v4329_v29, 0.0 }
0x2aee   :  { %v4330_v42 = vmul.f32 %v4611_v25, %v4327_v32  ;;  %v4328_v13 = vsub.f32 %v4294_v36, %v4316_v19 }
0x2af0   :  { %v4334_v48 = vsel %vm4332_vm10, %v4330_v42, 0.0  ;;  %v4331_v9 = vmul.f32 %v4612_v11, %v4328_v13 }
0x2af1   :  { %v4335_v39 = vadd.f32 %v4334_v48, %v4333_v55 }
0x2af2   :  { %v4337_v57 = vsel %vm4336_vm12, %v4331_v9, 0.0 }
0x2af3   :  { %v4338_v60 = vadd.f32 %v4337_v57, %v4335_v39 }
0x2af5   :  { %4339 = vadd.xlane.f32.xlu1 %v4338_v60 }
0x2af9   :  { %4353 = vadd.xlane.f32.xlu1 %v4352_v6 }
0x2b7e   :  { %v4340_v47 = vpop.xlane.xlu1 %4339 }
0x2b7f   :  { %v4341_v54 = vrot.slane %v4340_v47, 4 }
0x2b81   :  { %v4342_v1 = vadd.f32 %v4341_v54, %v4340_v47 }
0x2b82   :  { %v4354_v62 = vpop.xlane.xlu1 %4353 }
0x2b83   :  { %v4343_v41 = vrot.slane %v4342_v1, 2  ;;  %v4355_v2 = vrot.slane %v4354_v62, 4 }
0x2b85   :  { %v4356_v4 = vadd.f32 %v4355_v2, %v4354_v62  ;;  %v4344_v16 = vadd.f32 %v4343_v41, %v4342_v1 }
0x2b87   :  { %v4357_v51 = vrot.slane %v4356_v4, 2  ;;  %v4345_v53 = vrot.slane %v4344_v16, 1 }
0x2b89   :  { %v4358_v50 = vadd.f32 %v4357_v51, %v4356_v4  ;;  %v4346_v24 = vadd.f32 %v4345_v53, %v4344_v16 }
0x2b8b   :  { %5185 = vpush %v4346_v24  ;;  %v4359_v38 = vrot.slane %v4358_v50, 1 }
0x2b8d   :  { %v4360_v17 = vadd.f32 %v4359_v38, %v4358_v50 }
0x2b8f   :  { %5187 = vpush %v4360_v17 }
0x2bbc   :  { %s5186_s18 = spop %5185 }
0x2bbd   :  { %v4363_v56 = vstv %s5186_s18 }
0x2bbe   :  { %v4364_v52 = vsel %vm4362_vm13, %v4363_v56, 0.0 }
0x2bc0   :  { %s5188_s12 = spop %5187 }
0x2bc1   :  { %v4366_v46 = vstv %s5188_s12 }
0x2bc2   :  { %v4367_v8 = vsel %vm4365_vm8, %v4366_v46, 0.0 }
0x2bc3   :  { %v4368_v31 = vadd.f32 %v4367_v8, %v4364_v52 }
0x2bc5   :  { %4369 = vst [vmem:[%s6769_s19] sm:$0x1] %v4368_v31 }

</bundles_post_ra>
